<compile_context>
chip_gen: v7x
topology: tpu7x:2x2x1
jax: 0.10.0
libtpu: 0.0.40
codegen_flags: <defaults>
</compile_context>

<pallas_src>
import numpy as np
import jax
import jax.numpy as jnp
from jax.experimental import pallas as pl
from jax.experimental.pallas import tpu as pltpu


# ---------------------------------------------------------------------------
# Pallas kernel (Bb lane-batched images per grid step)
# ---------------------------------------------------------------------------
def _make_kernel(T, C, HW, H, W, ks, WC, Bb):
    f32 = jnp.float32
    bf16 = jnp.bfloat16
    LW = Bb * HW
    pad = ks // 2
    offs = [(kh - pad) * W + (kw - pad) for kh in range(ks) for kw in range(ks)]
    center = (T - 1) // 2
    inv_hw = 1.0 / float(HW)
    M = T * C // 8

    def kernel(x_ref, mask_ref, ind_ref, indT_ref,
               wk_ref, we1x_ref, we1k_ref, we2_ref, be2_ref,
               gmat_ref, gam_ref, bet_ref, w11_ref, sel_ref,
               wse1_ref, bse1_ref, wse2_ref, bse2_ref,
               out_ref, xtaps_ref):
        x = x_ref[0]                                              # (C, LW) f32

        # ---- build zero-padded ks*ks taps ONCE into a bf16 VMEM scratch ----
        # (reused by the key-conv matmul and by the local aggregation: w11 is a
        #  channel-only 1x1 conv, so tap(w11 @ x) == w11 @ tap(x)).
        for t, off in enumerate(offs):
            if t == center:
                continue
            rolled = pltpu.roll(x, shift=(-off) % LW, axis=1)
            xtaps_ref[t * C:(t + 1) * C, :] = (rolled * mask_ref[t:t + 1, :]).astype(bf16)
        xb = x.astype(bf16)
        xtaps_ref[center * C:(center + 1) * C, :] = xb

        # ---- key_embed: grouped ks*ks conv as ONE deep-K bf16 matmul + ReLU ----
        k = jnp.maximum(
            jnp.dot(wk_ref[...], xtaps_ref[...], preferred_element_type=f32), 0.0)
        kb = k.astype(bf16)
        gap_k = jnp.dot(k, ind_ref[...], preferred_element_type=f32)   # (C, Bb)

        # ---- embed: two 1x1 grouped convs; [x|k] halves as accumulated matmuls ----
        e1 = jnp.maximum(
            jnp.dot(we1x_ref[...], xb, preferred_element_type=f32)
            + jnp.dot(we1k_ref[...], kb, preferred_element_type=f32), 0.0)
        e2 = jnp.dot(we2_ref[...], e1.astype(bf16),
                     preferred_element_type=f32) + be2_ref[...]        # (M, LW)

        # ---- GroupNorm (per image; gmat is pre-scaled by 1/(T*HW)) ----
        rs = jnp.dot(e2, ind_ref[...], preferred_element_type=f32)      # (M, Bb)
        rq = jnp.dot(e2 * e2, ind_ref[...], preferred_element_type=f32)  # (M, Bb)
        mean = jnp.dot(gmat_ref[...], rs, preferred_element_type=f32)
        msq = jnp.dot(gmat_ref[...], rq, preferred_element_type=f32)
        var = jnp.maximum(msq - mean * mean, 0.0)
        a = jax.lax.rsqrt(var + 1e-5) * gam_ref[...]                    # (M, Bb)
        b = bet_ref[...] - mean * a
        a_b = jnp.dot(a, indT_ref[...], preferred_element_type=f32)     # (M, LW)
        b_b = jnp.dot(b, indT_ref[...], preferred_element_type=f32)
        wloc = e2 * a_b + b_b                                           # (M, LW)

        # ---- expand shared attention rows to all C channels in ONE matmul ----
        wsel = jnp.dot(sel_ref[...], wloc.astype(bf16),
                       preferred_element_type=f32)                      # (T*C, LW)

        # ---- local aggregation: agg = sum_t wsel_t * (w11 @ xtap_t) ----
        agg = jnp.zeros((C, LW), f32)
        for t in range(T):
            ytap = jnp.dot(w11_ref[...], xtaps_ref[t * C:(t + 1) * C, :],
                           preferred_element_type=f32)
            agg = agg + wsel[t * C:(t + 1) * C] * ytap

        # ---- SiLU (EUP approximate reciprocal) ----
        xa = agg * pl.reciprocal(1.0 + jnp.exp(-agg), approx=True)

        # ---- split attention (radix=2) over {xa, k}, per image ----
        gap = (jnp.dot(xa, ind_ref[...], preferred_element_type=f32) + gap_k) * inv_hw
        a1 = jnp.maximum(
            jnp.dot(wse1_ref[...], gap, preferred_element_type=f32) + bse1_ref[...],
            0.0)
        logit = (jnp.dot(wse2_ref[...], a1, preferred_element_type=f32)
                 + bse2_ref[...])                                       # (2C, Bb)
        l0, l1 = logit[:C], logit[C:]
        mx = jnp.maximum(l0, l1)
        p0, p1 = jnp.exp(l0 - mx), jnp.exp(l1 - mx)
        inv = pl.reciprocal(p0 + p1, approx=True)
        p0b = jnp.dot(p0 * inv, indT_ref[...], preferred_element_type=f32)   # (C, LW)
        p1b = jnp.dot(p1 * inv, indT_ref[...], preferred_element_type=f32)
        out_ref[0] = (xa * p0b + k * p1b).astype(out_ref.dtype)

    return kernel


# ---------------------------------------------------------------------------
# Parameter initialization (deterministic, shapes follow the nn.Module)
# ---------------------------------------------------------------------------
def init_params(key, dim, kernel_size):
    ks = kernel_size
    T = ks * ks
    share_planes, factor, dw_group, radix, reduction = 8, 2, 2, 2, 4
    M = T * dim // share_planes
    A = max(dim * radix // reduction, 32)
    keys = jax.random.split(key, 11)

    def nrm(k, shape, fan_in):
        return (jax.random.normal(k, shape, jnp.float32) / np.sqrt(fan_in)).astype(jnp.float32)

    p = {}
    p['w_key'] = nrm(keys[0], (dim, dim // 8, ks, ks), (dim // 8) * T)               # groups=8
    p['w_e1'] = nrm(keys[1], (dim // factor, 2 * dim // dw_group, 1, 1), 2 * dim // dw_group)
    p['w_e2'] = nrm(keys[2], (M, (dim // factor) // dw_group, 1, 1), (dim // factor) // dw_group)
    p['b_e2'] = 0.1 * jax.random.normal(keys[3], (M,), jnp.float32)
    p['gn_gamma'] = 1.0 + 0.1 * jax.random.normal(keys[4], (M,), jnp.float32)
    p['gn_beta'] = 0.1 * jax.random.normal(keys[5], (M,), jnp.float32)
    p['w_11'] = nrm(keys[6], (dim, dim // dw_group, 1, 1), dim // dw_group)           # groups=2
    p['w_se1'] = nrm(keys[7], (A, dim, 1, 1), dim)
    p['b_se1'] = 0.1 * jax.random.normal(keys[8], (A,), jnp.float32)
    p['w_se2'] = nrm(keys[9], (radix * dim, A, 1, 1), A)
    p['b_se2'] = 0.1 * jax.random.normal(keys[10], (radix * dim,), jnp.float32)
    return p


# ---------------------------------------------------------------------------
# Glue: expand grouped convs to dense block-diagonal matrices, permute the
# embed/GN rows to (tap, group, weight-channel) order, build small constants.
# ---------------------------------------------------------------------------
def _block_diag_1x1(w4d, groups):
    w = np.asarray(w4d)[:, :, 0, 0]
    cout, cing = w.shape
    copg = cout // groups
    dense = np.zeros((cout, cing * groups), np.float32)
    for g in range(groups):
        dense[g * copg:(g + 1) * copg, g * cing:(g + 1) * cing] = w[g * copg:(g + 1) * copg]
    return dense


def _build_operands(p, dim, ks, HW):
    T = ks * ks
    M = T * dim // 8
    Mh = M // 2
    WC = dim // 16                    # weight channels per dw_group
    cpg = dim // 8                    # key-conv channels per group

    # key_embed grouped conv -> one (dim, T*dim) matrix, per-tap blocks along K.
    wk4 = np.asarray(p['w_key'])
    wk_cat = np.zeros((dim, T * dim), np.float32)
    for g in range(8):
        sl = slice(g * cpg, (g + 1) * cpg)
        for kh in range(ks):
            for kw in range(ks):
                t = kh * ks + kw
                wk_cat[sl, t * dim + g * cpg:t * dim + (g + 1) * cpg] = wk4[sl, :, kh, kw]

    # embed conv1 (groups=2) on interleaved [x0,k0,x1,k1,...]: split columns by
    # parity into separate x / k weight halves (two accumulated matmuls).
    we1 = _block_diag_1x1(p['w_e1'], 2)                               # (dim/2, 2*dim)
    we1_x, we1_k = we1[:, 0::2], we1[:, 1::2]

    # embed conv2 (groups=2) + GroupNorm params, rows permuted from the module's
    # (g2, wc, t) order to (t, g2, wc) so each tap's weights are contiguous.
    we2 = _block_diag_1x1(p['w_e2'], 2)                               # (M, dim/2)
    perm = np.empty(M, np.int64)
    for t in range(T):
        for g2 in range(2):
            for wc in range(WC):
                perm[t * 2 * WC + g2 * WC + wc] = g2 * Mh + wc * T + t
    we2p = we2[perm]
    be2p = np.asarray(p['b_e2'])[perm][:, None]
    gammap = np.asarray(p['gn_gamma'])[perm][:, None]
    betap = np.asarray(p['gn_beta'])[perm][:, None]
    grp = (np.arange(M) // T)[perm]                                   # GN group per (permuted) row
    gmat = (grp[:, None] == grp[None, :]).astype(np.float32) / float(T * HW)

    # conv1x1 (groups=2) as dense block-diagonal.
    w11 = _block_diag_1x1(p['w_11'], 2)                               # (dim, dim)

    # block-diagonal tap/channel-share selector: output channel c of tap t uses
    # permuted wloc row t*2*WC + g2(c)*WC + (c_local % WC).
    half = dim // 2
    sel_full = np.zeros((T * dim, M), np.float32)
    for t in range(T):
        for c in range(dim):
            g2, cl = divmod(c, half)
            sel_full[t * dim + c, t * 2 * WC + g2 * WC + (cl % WC)] = 1.0

    # split-attention tail: merge the two radix slots into one matmul.
    wse1 = np.asarray(p['w_se1'])[:, :, 0, 0]
    bse1 = np.asarray(p['b_se1'])[:, None]
    wse2 = np.asarray(p['w_se2'])[:, :, 0, 0]
    bse2 = np.asarray(p['b_se2'])
    wse2m = np.concatenate([wse2[0::2], wse2[1::2]], axis=0)          # (2*dim, A)
    bse2m = np.concatenate([bse2[0::2], bse2[1::2]], axis=0)[:, None]

    bf, f32 = jnp.bfloat16, jnp.float32
    return (jnp.asarray(wk_cat, bf), jnp.asarray(we1_x, bf), jnp.asarray(we1_k, bf),
            jnp.asarray(we2p, bf), jnp.asarray(be2p, f32),
            jnp.asarray(gmat, f32), jnp.asarray(gammap, f32), jnp.asarray(betap, f32),
            jnp.asarray(w11, bf), jnp.asarray(sel_full, bf),
            jnp.asarray(wse1, f32), jnp.asarray(bse1, f32),
            jnp.asarray(wse2m, f32), jnp.asarray(bse2m, f32))


def _pick_batch_block(B, max_bb=8):
    # Largest divisor of B (<= max_bb) that still leaves >= 2 grid steps, so the
    # parallel grid axis can be sharded over both v7x TensorCores.
    best = 1
    for d in range(1, max_bb + 1):
        if B % d == 0 and B // d >= 2:
            best = d
    return best if B >= 2 else 1


# ---------------------------------------------------------------------------
# Wrapper: launch the Pallas kernel (grid over batch blocks; weights invariant).
# ---------------------------------------------------------------------------
def coxt_forward_pallas(x, params, dim, kernel_size, batch_block=None):
    B, C, H, W = x.shape
    assert C == dim and kernel_size % 2 == 1 and dim % 16 == 0
    ks = kernel_size
    T = ks * ks
    HW = H * W
    M = T * dim // 8
    WC = dim // 16
    A = params['w_se1'].shape[0]

    Bb = batch_block if batch_block is not None else _pick_batch_block(B)
    assert B % Bb == 0
    G = B // Bb
    LW = Bb * HW

    ops = _build_operands(params, dim, ks, HW)

    # Host-built, grid-invariant constants: border-validity masks for the ks*ks
    # taps (also zero any cross-image roll leakage when Bb > 1) and the
    # per-image lane indicator used for per-image reductions / broadcasts.
    pad = ks // 2
    lane = np.arange(LW)
    row, col = (lane % HW) // W, lane % W
    masks = np.ones((T, LW), np.float32)
    for kh in range(ks):
        for kw in range(ks):
            t = kh * ks + kw
            dh, dw = kh - pad, kw - pad
            ok = (row + dh >= 0) & (row + dh < H) & (col + dw >= 0) & (col + dw < W)
            masks[t] = ok.astype(np.float32)
    img = lane // HW
    ind = (img[:, None] == np.arange(Bb)[None, :]).astype(np.float32)   # (LW, Bb)
    indT = np.ascontiguousarray(ind.T)                                   # (Bb, LW)

    # Lane-batch Bb images per grid step (layout plumbing only).
    x_lanes = (x.astype(jnp.float32).reshape(G, Bb, C, HW)
               .transpose(0, 2, 1, 3).reshape(G, C, LW))

    kernel = _make_kernel(T, C, HW, H, W, ks, WC, Bb)

    def full(shape):
        return pl.BlockSpec(shape, lambda g, _n=len(shape): (0,) * _n)

    in_specs = [
        pl.BlockSpec((1, C, LW), lambda g: (g, 0, 0)),   # x (only per-step HBM input)
        full((T, LW)),        # tap border masks (hoisted out of the kernel body)
        full((LW, Bb)),       # per-image lane indicator (reductions)
        full((Bb, LW)),       # its transpose (broadcasts)
        full((C, T * C)),     # key conv, per-tap blocks along K (bf16)
        full((C // 2, C)),    # embed conv1, x half (bf16)
        full((C // 2, C)),    # embed conv1, k half (bf16)
        full((M, C // 2)),    # embed conv2, rows permuted to (tap, group, wc) (bf16)
        full((M, 1)),         # embed conv2 bias
        full((M, M)),         # GroupNorm group-mean matrix (pre-scaled by 1/(T*HW))
        full((M, 1)),         # GN gamma
        full((M, 1)),         # GN beta
        full((C, C)),         # conv1x1 (bf16)
        full((T * C, M)),     # block-diag tap/channel-share selector (bf16)
        full((A, C)),         # se conv1
        full((A, 1)),         # se conv1 bias
        full((2 * C, A)),     # se conv2 (both radix slots merged)
        full((2 * C, 1)),     # se conv2 bias
    ]

    out = pl.pallas_call(
        kernel,
        out_shape=jax.ShapeDtypeStruct((G, C, LW), jnp.float32),
        grid_spec=pltpu.PrefetchScalarGridSpec(
            num_scalar_prefetch=0,
            grid=(G,),
            in_specs=in_specs,
            out_specs=pl.BlockSpec((1, C, LW), lambda g: (g, 0, 0)),
            scratch_shapes=[pltpu.VMEM((T * C, LW), jnp.bfloat16)],   # shared tap slab
        ),
        compiler_params=pltpu.CompilerParams(
            dimension_semantics=("parallel",),
            vmem_limit_bytes=32 * 1024 * 1024,
        ),
    )(x_lanes, jnp.asarray(masks), jnp.asarray(ind), jnp.asarray(indT), *ops)

    return (out.reshape(G, C, Bb, HW).transpose(0, 2, 1, 3).reshape(B, C, H, W))


# ---------------------------------------------------------------------------
# Pure-JAX reference (mirrors the PyTorch forward) for the correctness check.
# ---------------------------------------------------------------------------
def _conv2d(x, w, b=None, padding=0, groups=1):
    out = jax.lax.conv_general_dilated(
        x, w, window_strides=(1, 1),
        padding=[(padding, padding), (padding, padding)],
        dimension_numbers=('NCHW', 'OIHW', 'NCHW'),
        feature_group_count=groups,
        precision=jax.lax.Precision.HIGHEST)
    if b is not None:
        out = out + b[None, :, None, None]
    return out


def coxt_forward_reference(x, p, dim, kernel_size):
    ks = kernel_size
    B, C, H, W = x.shape
    T = ks * ks
    M = T * dim // 8
    k = jax.nn.relu(_conv2d(x, p['w_key'], padding=ks // 2, groups=8))
    qk = jnp.stack([x, k], axis=2).reshape(B, 2 * C, H, W)
    e1 = jax.nn.relu(_conv2d(qk, p['w_e1'], groups=2))
    e2 = _conv2d(e1, p['w_e2'], b=p['b_e2'], groups=2)
    G = dim // 8
    e2g = e2.reshape(B, G, M // G, H, W)
    mu = e2g.mean(axis=(2, 3, 4), keepdims=True)
    var = ((e2g - mu) ** 2).mean(axis=(2, 3, 4), keepdims=True)
    wgn = ((e2g - mu) * jax.lax.rsqrt(var + 1e-5)).reshape(B, M, H, W)
    wgn = wgn * p['gn_gamma'][None, :, None, None] + p['gn_beta'][None, :, None, None]
    # LocalConvolution == CoTNet aggregation_zeropad (heads=1)
    y = _conv2d(x, p['w_11'], groups=2).reshape(B * 2, C // 2, H, W)
    pad = (ks - 1) // 2
    ypad = jnp.pad(y, ((0, 0), (0, 0), (pad, pad), (pad, pad)))
    taps = jnp.stack([ypad[:, :, kh:kh + H, kw:kw + W]
                      for kh in range(ks) for kw in range(ks)], axis=2)
    wv = wgn.reshape(B * 2, 1, M // (2 * T), T, H, W)[:, 0]
    WC = (C // 2) // 8
    wsel = wv[:, jnp.arange(C // 2) % WC]
    lc = (wsel * taps).sum(axis=2).reshape(B, C, H, W)
    xa = lc * jax.nn.sigmoid(lc)
    xr = jnp.stack([xa, k], axis=2)
    gap = xr.sum(axis=2).mean(axis=(2, 3), keepdims=True)
    a1 = jax.nn.relu(_conv2d(gap, p['w_se1'], b=p['b_se1']))
    a2 = _conv2d(a1, p['w_se2'], b=p['b_se2'])
    attn = jax.nn.softmax(a2.reshape(B, C, 2), axis=2)
    return (xr * attn.reshape(B, C, 2, 1, 1)).sum(axis=2)


if __name__ == "__main__":
    dim, ks = 32, 3
    B, H, W = 4, 16, 16           # HW = 256 -> lane-dense; Bb=2, grid=(2,)
    key = jax.random.PRNGKey(0)
    kx, kp = jax.random.split(key)
    x = jax.random.normal(kx, (B, dim, H, W), jnp.float32)
    params = init_params(kp, dim, ks)

    out = coxt_forward_pallas(x, params, dim, ks)
    out = jax.block_until_ready(out)
    assert out.shape == (B, dim, H, W)
    assert np.isfinite(np.asarray(out)).all()

    ref = coxt_forward_reference(x, params, dim, ks)
    # Tolerance covers bf16 MXU operands (f32 accumulation) and the EUP
    # approximate reciprocals used for SiLU / softmax; structural errors would
    # show up as O(1) mismatches.
    np.testing.assert_allclose(np.asarray(out), np.asarray(ref), rtol=5e-2, atol=5e-2)
    print("KERNEL_OK")
</pallas_src>

<mosaic_0001>
module attributes {stable_mosaic.version = 11 : i64} {
  func.func @kernel(%arg0: i32, %arg1: memref<1x32x512xf32, #tpu.memory_space<vmem>>, %arg2: memref<9x512xf32, #tpu.memory_space<vmem>>, %arg3: memref<512x2xf32, #tpu.memory_space<vmem>>, %arg4: memref<2x512xf32, #tpu.memory_space<vmem>>, %arg5: memref<32x288xbf16, #tpu.memory_space<vmem>>, %arg6: memref<16x32xbf16, #tpu.memory_space<vmem>>, %arg7: memref<16x32xbf16, #tpu.memory_space<vmem>>, %arg8: memref<36x16xbf16, #tpu.memory_space<vmem>>, %arg9: memref<36x1xf32, #tpu.memory_space<vmem>>, %arg10: memref<36x36xf32, #tpu.memory_space<vmem>>, %arg11: memref<36x1xf32, #tpu.memory_space<vmem>>, %arg12: memref<36x1xf32, #tpu.memory_space<vmem>>, %arg13: memref<32x32xbf16, #tpu.memory_space<vmem>>, %arg14: memref<288x36xbf16, #tpu.memory_space<vmem>>, %arg15: memref<32x32xf32, #tpu.memory_space<vmem>>, %arg16: memref<32x1xf32, #tpu.memory_space<vmem>>, %arg17: memref<64x32xf32, #tpu.memory_space<vmem>>, %arg18: memref<64x1xf32, #tpu.memory_space<vmem>>, %arg19: memref<1x32x512xf32, #tpu.memory_space<vmem>>, %arg20: memref<288x512xbf16, #tpu.memory_space<vmem>>) attributes {dimension_semantics = [#tpu.dimension_semantics<parallel>], iteration_bounds = array<i64: 2>, scalar_prefetch = 0 : i64, scratch_operands = 1 : i64, tpu.core_type = #tpu.core_type<tc>, window_params = [{transform_indices = @transform_0, window_bounds = array<i64: 1, 32, 512>}, {pipeline_mode = #tpu.pipeline_mode<synchronous>, transform_indices = @transform_1, window_bounds = array<i64: 9, 512>}, {pipeline_mode = #tpu.pipeline_mode<synchronous>, transform_indices = @transform_2, window_bounds = array<i64: 512, 2>}, {pipeline_mode = #tpu.pipeline_mode<synchronous>, transform_indices = @transform_3, window_bounds = array<i64: 2, 512>}, {pipeline_mode = #tpu.pipeline_mode<synchronous>, transform_indices = @transform_4, window_bounds = array<i64: 32, 288>}, {pipeline_mode = #tpu.pipeline_mode<synchronous>, transform_indices = @transform_5, window_bounds = array<i64: 16, 32>}, {pipeline_mode = #tpu.pipeline_mode<synchronous>, transform_indices = @transform_6, window_bounds = array<i64: 16, 32>}, {pipeline_mode = #tpu.pipeline_mode<synchronous>, transform_indices = @transform_7, window_bounds = array<i64: 36, 16>}, {pipeline_mode = #tpu.pipeline_mode<synchronous>, transform_indices = @transform_8, window_bounds = array<i64: 36, 1>}, {pipeline_mode = #tpu.pipeline_mode<synchronous>, transform_indices = @transform_9, window_bounds = array<i64: 36, 36>}, {pipeline_mode = #tpu.pipeline_mode<synchronous>, transform_indices = @transform_10, window_bounds = array<i64: 36, 1>}, {pipeline_mode = #tpu.pipeline_mode<synchronous>, transform_indices = @transform_11, window_bounds = array<i64: 36, 1>}, {pipeline_mode = #tpu.pipeline_mode<synchronous>, transform_indices = @transform_12, window_bounds = array<i64: 32, 32>}, {pipeline_mode = #tpu.pipeline_mode<synchronous>, transform_indices = @transform_13, window_bounds = array<i64: 288, 36>}, {pipeline_mode = #tpu.pipeline_mode<synchronous>, transform_indices = @transform_14, window_bounds = array<i64: 32, 32>}, {pipeline_mode = #tpu.pipeline_mode<synchronous>, transform_indices = @transform_15, window_bounds = array<i64: 32, 1>}, {pipeline_mode = #tpu.pipeline_mode<synchronous>, transform_indices = @transform_16, window_bounds = array<i64: 64, 32>}, {pipeline_mode = #tpu.pipeline_mode<synchronous>, transform_indices = @transform_17, window_bounds = array<i64: 64, 1>}, {transform_indices = @transform_18, window_bounds = array<i64: 1, 32, 512>}]} {
    %c0 = arith.constant 0 : index
    %c0_0 = arith.constant 0 : index
    %c0_1 = arith.constant 0 : index
    %0 = vector.load %arg1[%c0, %c0_0, %c0_1] : memref<1x32x512xf32, #tpu.memory_space<vmem>>, vector<1x32x512xf32>
    %1 = vector.shape_cast %0 : vector<1x32x512xf32> to vector<32x512xf32>
    %c17_i32 = arith.constant 17 : i32
    %2 = tpu.dynamic_rotate %1 by %c17_i32 dim 1 : vector<32x512xf32>, i32 -> vector<32x512xf32>
    %c0_2 = arith.constant 0 : index
    %c0_3 = arith.constant 0 : index
    %3 = vector.load %arg2[%c0_2, %c0_3] : memref<9x512xf32, #tpu.memory_space<vmem>>, vector<1x512xf32>
    %4 = vector.broadcast %3 : vector<1x512xf32> to vector<32x512xf32>
    %5 = arith.mulf %2, %4 : vector<32x512xf32>
    %6 = arith.truncf %5 : vector<32x512xf32> to vector<32x512xbf16>
    %c0_4 = arith.constant 0 : index
    %c0_5 = arith.constant 0 : index
    %7 = vector.load %arg20[%c0_4, %c0_5] : memref<288x512xbf16, #tpu.memory_space<vmem>>, vector<32x512xbf16>
    tpu.vector_store %arg20[%c0_4, %c0_5], %6 {strides = array<i32>} : memref<288x512xbf16, #tpu.memory_space<vmem>>, vector<32x512xbf16>,
    %c16_i32 = arith.constant 16 : i32
    %8 = tpu.dynamic_rotate %1 by %c16_i32 dim 1 : vector<32x512xf32>, i32 -> vector<32x512xf32>
    %c1 = arith.constant 1 : index
    %c0_6 = arith.constant 0 : index
    %9 = vector.load %arg2[%c1, %c0_6] : memref<9x512xf32, #tpu.memory_space<vmem>>, vector<1x512xf32>
    %10 = vector.broadcast %9 : vector<1x512xf32> to vector<32x512xf32>
    %11 = arith.mulf %8, %10 : vector<32x512xf32>
    %12 = arith.truncf %11 : vector<32x512xf32> to vector<32x512xbf16>
    %c32 = arith.constant 32 : index
    %c0_7 = arith.constant 0 : index
    %13 = vector.load %arg20[%c32, %c0_7] : memref<288x512xbf16, #tpu.memory_space<vmem>>, vector<32x512xbf16>
    tpu.vector_store %arg20[%c32, %c0_7], %12 {strides = array<i32>} : memref<288x512xbf16, #tpu.memory_space<vmem>>, vector<32x512xbf16>,
    %c15_i32 = arith.constant 15 : i32
    %14 = tpu.dynamic_rotate %1 by %c15_i32 dim 1 : vector<32x512xf32>, i32 -> vector<32x512xf32>
    %c2 = arith.constant 2 : index
    %c0_8 = arith.constant 0 : index
    %15 = vector.load %arg2[%c2, %c0_8] : memref<9x512xf32, #tpu.memory_space<vmem>>, vector<1x512xf32>
    %16 = vector.broadcast %15 : vector<1x512xf32> to vector<32x512xf32>
    %17 = arith.mulf %14, %16 : vector<32x512xf32>
    %18 = arith.truncf %17 : vector<32x512xf32> to vector<32x512xbf16>
    %c64 = arith.constant 64 : index
    %c0_9 = arith.constant 0 : index
    %19 = vector.load %arg20[%c64, %c0_9] : memref<288x512xbf16, #tpu.memory_space<vmem>>, vector<32x512xbf16>
    tpu.vector_store %arg20[%c64, %c0_9], %18 {strides = array<i32>} : memref<288x512xbf16, #tpu.memory_space<vmem>>, vector<32x512xbf16>,
    %c1_i32 = arith.constant 1 : i32
    %20 = tpu.dynamic_rotate %1 by %c1_i32 dim 1 : vector<32x512xf32>, i32 -> vector<32x512xf32>
    %c3 = arith.constant 3 : index
    %c0_10 = arith.constant 0 : index
    %21 = vector.load %arg2[%c3, %c0_10] : memref<9x512xf32, #tpu.memory_space<vmem>>, vector<1x512xf32>
    %22 = vector.broadcast %21 : vector<1x512xf32> to vector<32x512xf32>
    %23 = arith.mulf %20, %22 : vector<32x512xf32>
    %24 = arith.truncf %23 : vector<32x512xf32> to vector<32x512xbf16>
    %c96 = arith.constant 96 : index
    %c0_11 = arith.constant 0 : index
    %25 = vector.load %arg20[%c96, %c0_11] : memref<288x512xbf16, #tpu.memory_space<vmem>>, vector<32x512xbf16>
    tpu.vector_store %arg20[%c96, %c0_11], %24 {strides = array<i32>} : memref<288x512xbf16, #tpu.memory_space<vmem>>, vector<32x512xbf16>,
    %c511_i32 = arith.constant 511 : i32
    %26 = tpu.dynamic_rotate %1 by %c511_i32 dim 1 : vector<32x512xf32>, i32 -> vector<32x512xf32>
    %c5 = arith.constant 5 : index
    %c0_12 = arith.constant 0 : index
    %27 = vector.load %arg2[%c5, %c0_12] : memref<9x512xf32, #tpu.memory_space<vmem>>, vector<1x512xf32>
    %28 = vector.broadcast %27 : vector<1x512xf32> to vector<32x512xf32>
    %29 = arith.mulf %26, %28 : vector<32x512xf32>
    %30 = arith.truncf %29 : vector<32x512xf32> to vector<32x512xbf16>
    %c160 = arith.constant 160 : index
    %c0_13 = arith.constant 0 : index
    %31 = vector.load %arg20[%c160, %c0_13] : memref<288x512xbf16, #tpu.memory_space<vmem>>, vector<32x512xbf16>
    tpu.vector_store %arg20[%c160, %c0_13], %30 {strides = array<i32>} : memref<288x512xbf16, #tpu.memory_space<vmem>>, vector<32x512xbf16>,
    %c497_i32 = arith.constant 497 : i32
    %32 = tpu.dynamic_rotate %1 by %c497_i32 dim 1 : vector<32x512xf32>, i32 -> vector<32x512xf32>
    %c6 = arith.constant 6 : index
    %c0_14 = arith.constant 0 : index
    %33 = vector.load %arg2[%c6, %c0_14] : memref<9x512xf32, #tpu.memory_space<vmem>>, vector<1x512xf32>
    %34 = vector.broadcast %33 : vector<1x512xf32> to vector<32x512xf32>
    %35 = arith.mulf %32, %34 : vector<32x512xf32>
    %36 = arith.truncf %35 : vector<32x512xf32> to vector<32x512xbf16>
    %c192 = arith.constant 192 : index
    %c0_15 = arith.constant 0 : index
    %37 = vector.load %arg20[%c192, %c0_15] : memref<288x512xbf16, #tpu.memory_space<vmem>>, vector<32x512xbf16>
    tpu.vector_store %arg20[%c192, %c0_15], %36 {strides = array<i32>} : memref<288x512xbf16, #tpu.memory_space<vmem>>, vector<32x512xbf16>,
    %c496_i32 = arith.constant 496 : i32
    %38 = tpu.dynamic_rotate %1 by %c496_i32 dim 1 : vector<32x512xf32>, i32 -> vector<32x512xf32>
    %c7 = arith.constant 7 : index
    %c0_16 = arith.constant 0 : index
    %39 = vector.load %arg2[%c7, %c0_16] : memref<9x512xf32, #tpu.memory_space<vmem>>, vector<1x512xf32>
    %40 = vector.broadcast %39 : vector<1x512xf32> to vector<32x512xf32>
    %41 = arith.mulf %38, %40 : vector<32x512xf32>
    %42 = arith.truncf %41 : vector<32x512xf32> to vector<32x512xbf16>
    %c224 = arith.constant 224 : index
    %c0_17 = arith.constant 0 : index
    %43 = vector.load %arg20[%c224, %c0_17] : memref<288x512xbf16, #tpu.memory_space<vmem>>, vector<32x512xbf16>
    tpu.vector_store %arg20[%c224, %c0_17], %42 {strides = array<i32>} : memref<288x512xbf16, #tpu.memory_space<vmem>>, vector<32x512xbf16>,
    %c495_i32 = arith.constant 495 : i32
    %44 = tpu.dynamic_rotate %1 by %c495_i32 dim 1 : vector<32x512xf32>, i32 -> vector<32x512xf32>
    %c8 = arith.constant 8 : index
    %c0_18 = arith.constant 0 : index
    %45 = vector.load %arg2[%c8, %c0_18] : memref<9x512xf32, #tpu.memory_space<vmem>>, vector<1x512xf32>
    %46 = vector.broadcast %45 : vector<1x512xf32> to vector<32x512xf32>
    %47 = arith.mulf %44, %46 : vector<32x512xf32>
    %48 = arith.truncf %47 : vector<32x512xf32> to vector<32x512xbf16>
    %c256 = arith.constant 256 : index
    %c0_19 = arith.constant 0 : index
    %49 = vector.load %arg20[%c256, %c0_19] : memref<288x512xbf16, #tpu.memory_space<vmem>>, vector<32x512xbf16>
    tpu.vector_store %arg20[%c256, %c0_19], %48 {strides = array<i32>} : memref<288x512xbf16, #tpu.memory_space<vmem>>, vector<32x512xbf16>,
    %50 = arith.truncf %1 : vector<32x512xf32> to vector<32x512xbf16>
    %c128 = arith.constant 128 : index
    %c0_20 = arith.constant 0 : index
    %51 = vector.load %arg20[%c128, %c0_20] : memref<288x512xbf16, #tpu.memory_space<vmem>>, vector<32x512xbf16>
    tpu.vector_store %arg20[%c128, %c0_20], %50 {strides = array<i32>} : memref<288x512xbf16, #tpu.memory_space<vmem>>, vector<32x512xbf16>,
    %c0_21 = arith.constant 0 : index
    %c0_22 = arith.constant 0 : index
    %52 = vector.load %arg5[%c0_21, %c0_22] : memref<32x288xbf16, #tpu.memory_space<vmem>>, vector<32x288xbf16>
    %c0_23 = arith.constant 0 : index
    %c0_24 = arith.constant 0 : index
    %53 = vector.load %arg20[%c0_23, %c0_24] : memref<288x512xbf16, #tpu.memory_space<vmem>>, vector<288x512xbf16>
    %cst = arith.constant dense<0.000000e+00> : vector<32x512xf32>
    %54 = tpu.matmul %52, %53, %cst {dimension_numbers = #tpu.dot_dimension_numbers<[1], [0], [0], [1], [0, 0, 1, 1], [], []>} : vector<32x288xbf16>, vector<288x512xbf16>, vector<32x512xf32> -> vector<32x512xf32>
    %cst_25 = arith.constant 0.000000e+00 : f32
    %55 = vector.broadcast %cst_25 : f32 to vector<32x512xf32>
    %56 = arith.maximumf %54, %55 : vector<32x512xf32>
    %57 = arith.truncf %56 : vector<32x512xf32> to vector<32x512xbf16>
    %c0_26 = arith.constant 0 : index
    %c0_27 = arith.constant 0 : index
    %58 = vector.load %arg3[%c0_26, %c0_27] : memref<512x2xf32, #tpu.memory_space<vmem>>, vector<512x2xf32>
    %cst_28 = arith.constant dense<0.000000e+00> : vector<32x2xf32>
    %59 = tpu.matmul %56, %58, %cst_28 {dimension_numbers = #tpu.dot_dimension_numbers<[1], [0], [0], [1], [0, 0, 1, 1], [], []>} : vector<32x512xf32>, vector<512x2xf32>, vector<32x2xf32> -> vector<32x2xf32>
    %c0_29 = arith.constant 0 : index
    %c0_30 = arith.constant 0 : index
    %60 = vector.load %arg6[%c0_29, %c0_30] : memref<16x32xbf16, #tpu.memory_space<vmem>>, vector<16x32xbf16>
    %cst_31 = arith.constant dense<0.000000e+00> : vector<16x512xf32>
    %61 = tpu.matmul %60, %50, %cst_31 {dimension_numbers = #tpu.dot_dimension_numbers<[1], [0], [0], [1], [0, 0, 1, 1], [], []>} : vector<16x32xbf16>, vector<32x512xbf16>, vector<16x512xf32> -> vector<16x512xf32>
    %c0_32 = arith.constant 0 : index
    %c0_33 = arith.constant 0 : index
    %62 = vector.load %arg7[%c0_32, %c0_33] : memref<16x32xbf16, #tpu.memory_space<vmem>>, vector<16x32xbf16>
    %cst_34 = arith.constant dense<0.000000e+00> : vector<16x512xf32>
    %63 = tpu.matmul %62, %57, %cst_34 {dimension_numbers = #tpu.dot_dimension_numbers<[1], [0], [0], [1], [0, 0, 1, 1], [], []>} : vector<16x32xbf16>, vector<32x512xbf16>, vector<16x512xf32> -> vector<16x512xf32>
    %64 = arith.addf %61, %63 : vector<16x512xf32>
    %cst_35 = arith.constant 0.000000e+00 : f32
    %65 = vector.broadcast %cst_35 : f32 to vector<16x512xf32>
    %66 = arith.maximumf %64, %65 : vector<16x512xf32>
    %c0_36 = arith.constant 0 : index
    %c0_37 = arith.constant 0 : index
    %67 = vector.load %arg8[%c0_36, %c0_37] : memref<36x16xbf16, #tpu.memory_space<vmem>>, vector<36x16xbf16>
    %68 = arith.truncf %66 : vector<16x512xf32> to vector<16x512xbf16>
    %cst_38 = arith.constant dense<0.000000e+00> : vector<36x512xf32>
    %69 = tpu.matmul %67, %68, %cst_38 {dimension_numbers = #tpu.dot_dimension_numbers<[1], [0], [0], [1], [0, 0, 1, 1], [], []>} : vector<36x16xbf16>, vector<16x512xbf16>, vector<36x512xf32> -> vector<36x512xf32>
    %c0_39 = arith.constant 0 : index
    %c0_40 = arith.constant 0 : index
    %70 = vector.load %arg9[%c0_39, %c0_40] : memref<36x1xf32, #tpu.memory_space<vmem>>, vector<36x1xf32>
    %71 = vector.broadcast %70 : vector<36x1xf32> to vector<36x512xf32>
    %72 = arith.addf %69, %71 : vector<36x512xf32>
    %c0_41 = arith.constant 0 : index
    %c0_42 = arith.constant 0 : index
    %73 = vector.load %arg3[%c0_41, %c0_42] : memref<512x2xf32, #tpu.memory_space<vmem>>, vector<512x2xf32>
    %cst_43 = arith.constant dense<0.000000e+00> : vector<36x2xf32>
    %74 = tpu.matmul %72, %73, %cst_43 {dimension_numbers = #tpu.dot_dimension_numbers<[1], [0], [0], [1], [0, 0, 1, 1], [], []>} : vector<36x512xf32>, vector<512x2xf32>, vector<36x2xf32> -> vector<36x2xf32>
    %75 = arith.mulf %72, %72 : vector<36x512xf32>
    %c0_44 = arith.constant 0 : index
    %c0_45 = arith.constant 0 : index
    %76 = vector.load %arg3[%c0_44, %c0_45] : memref<512x2xf32, #tpu.memory_space<vmem>>, vector<512x2xf32>
    %cst_46 = arith.constant dense<0.000000e+00> : vector<36x2xf32>
    %77 = tpu.matmul %75, %76, %cst_46 {dimension_numbers = #tpu.dot_dimension_numbers<[1], [0], [0], [1], [0, 0, 1, 1], [], []>} : vector<36x512xf32>, vector<512x2xf32>, vector<36x2xf32> -> vector<36x2xf32>
    %c0_47 = arith.constant 0 : index
    %c0_48 = arith.constant 0 : index
    %78 = vector.load %arg10[%c0_47, %c0_48] : memref<36x36xf32, #tpu.memory_space<vmem>>, vector<36x36xf32>
    %cst_49 = arith.constant dense<0.000000e+00> : vector<36x2xf32>
    %79 = tpu.matmul %78, %74, %cst_49 {dimension_numbers = #tpu.dot_dimension_numbers<[1], [0], [0], [1], [0, 0, 1, 1], [], []>} : vector<36x36xf32>, vector<36x2xf32>, vector<36x2xf32> -> vector<36x2xf32>
    %c0_50 = arith.constant 0 : index
    %c0_51 = arith.constant 0 : index
    %80 = vector.load %arg10[%c0_50, %c0_51] : memref<36x36xf32, #tpu.memory_space<vmem>>, vector<36x36xf32>
    %cst_52 = arith.constant dense<0.000000e+00> : vector<36x2xf32>
    %81 = tpu.matmul %80, %77, %cst_52 {dimension_numbers = #tpu.dot_dimension_numbers<[1], [0], [0], [1], [0, 0, 1, 1], [], []>} : vector<36x36xf32>, vector<36x2xf32>, vector<36x2xf32> -> vector<36x2xf32>
    %82 = arith.mulf %79, %79 : vector<36x2xf32>
    %83 = arith.subf %81, %82 : vector<36x2xf32>
    %cst_53 = arith.constant 0.000000e+00 : f32
    %84 = vector.broadcast %cst_53 : f32 to vector<36x2xf32>
    %85 = arith.maximumf %83, %84 : vector<36x2xf32>
    %cst_54 = arith.constant 9.99999974E-6 : f32
    %86 = vector.broadcast %cst_54 : f32 to vector<36x2xf32>
    %87 = arith.addf %85, %86 : vector<36x2xf32>
    %88 = math.rsqrt %87 : vector<36x2xf32>
    %c0_55 = arith.constant 0 : index
    %c0_56 = arith.constant 0 : index
    %89 = vector.load %arg11[%c0_55, %c0_56] : memref<36x1xf32, #tpu.memory_space<vmem>>, vector<36x1xf32>
    %90 = vector.broadcast %89 : vector<36x1xf32> to vector<36x2xf32>
    %91 = arith.mulf %88, %90 : vector<36x2xf32>
    %c0_57 = arith.constant 0 : index
    %c0_58 = arith.constant 0 : index
    %92 = vector.load %arg12[%c0_57, %c0_58] : memref<36x1xf32, #tpu.memory_space<vmem>>, vector<36x1xf32>
    %93 = arith.mulf %79, %91 : vector<36x2xf32>
    %94 = vector.broadcast %92 : vector<36x1xf32> to vector<36x2xf32>
    %95 = arith.subf %94, %93 : vector<36x2xf32>
    %c0_59 = arith.constant 0 : index
    %c0_60 = arith.constant 0 : index
    %96 = vector.load %arg4[%c0_59, %c0_60] : memref<2x512xf32, #tpu.memory_space<vmem>>, vector<2x512xf32>
    %cst_61 = arith.constant dense<0.000000e+00> : vector<36x512xf32>
    %97 = tpu.matmul %91, %96, %cst_61 {dimension_numbers = #tpu.dot_dimension_numbers<[1], [0], [0], [1], [0, 0, 1, 1], [], []>} : vector<36x2xf32>, vector<2x512xf32>, vector<36x512xf32> -> vector<36x512xf32>
    %c0_62 = arith.constant 0 : index
    %c0_63 = arith.constant 0 : index
    %98 = vector.load %arg4[%c0_62, %c0_63] : memref<2x512xf32, #tpu.memory_space<vmem>>, vector<2x512xf32>
    %cst_64 = arith.constant dense<0.000000e+00> : vector<36x512xf32>
    %99 = tpu.matmul %95, %98, %cst_64 {dimension_numbers = #tpu.dot_dimension_numbers<[1], [0], [0], [1], [0, 0, 1, 1], [], []>} : vector<36x2xf32>, vector<2x512xf32>, vector<36x512xf32> -> vector<36x512xf32>
    %100 = arith.mulf %72, %97 : vector<36x512xf32>
    %101 = arith.addf %100, %99 : vector<36x512xf32>
    %c0_65 = arith.constant 0 : index
    %c0_66 = arith.constant 0 : index
    %102 = vector.load %arg14[%c0_65, %c0_66] : memref<288x36xbf16, #tpu.memory_space<vmem>>, vector<288x36xbf16>
    %103 = arith.truncf %101 : vector<36x512xf32> to vector<36x512xbf16>
    %cst_67 = arith.constant dense<0.000000e+00> : vector<288x512xf32>
    %104 = tpu.matmul %102, %103, %cst_67 {dimension_numbers = #tpu.dot_dimension_numbers<[1], [0], [0], [1], [0, 0, 1, 1], [], []>} : vector<288x36xbf16>, vector<36x512xbf16>, vector<288x512xf32> -> vector<288x512xf32>
    %cst_68 = arith.constant 0.000000e+00 : f32
    %105 = vector.broadcast %cst_68 : f32 to vector<32x512xf32>
    %c0_69 = arith.constant 0 : index
    %c0_70 = arith.constant 0 : index
    %106 = vector.load %arg13[%c0_69, %c0_70] : memref<32x32xbf16, #tpu.memory_space<vmem>>, vector<32x32xbf16>
    %c0_71 = arith.constant 0 : index
    %c0_72 = arith.constant 0 : index
    %107 = vector.load %arg20[%c0_71, %c0_72] : memref<288x512xbf16, #tpu.memory_space<vmem>>, vector<32x512xbf16>
    %cst_73 = arith.constant dense<0.000000e+00> : vector<32x512xf32>
    %108 = tpu.matmul %106, %107, %cst_73 {dimension_numbers = #tpu.dot_dimension_numbers<[1], [0], [0], [1], [0, 0, 1, 1], [], []>} : vector<32x32xbf16>, vector<32x512xbf16>, vector<32x512xf32> -> vector<32x512xf32>
    %109 = vector.extract_strided_slice %104 {offsets = [0, 0], sizes = [32, 512], strides = [1, 1]} : vector<288x512xf32> to vector<32x512xf32>
    %110 = arith.mulf %109, %108 : vector<32x512xf32>
    %111 = arith.addf %105, %110 : vector<32x512xf32>
    %c0_74 = arith.constant 0 : index
    %c0_75 = arith.constant 0 : index
    %112 = vector.load %arg13[%c0_74, %c0_75] : memref<32x32xbf16, #tpu.memory_space<vmem>>, vector<32x32xbf16>
    %c32_76 = arith.constant 32 : index
    %c0_77 = arith.constant 0 : index
    %113 = vector.load %arg20[%c32_76, %c0_77] : memref<288x512xbf16, #tpu.memory_space<vmem>>, vector<32x512xbf16>
    %cst_78 = arith.constant dense<0.000000e+00> : vector<32x512xf32>
    %114 = tpu.matmul %112, %113, %cst_78 {dimension_numbers = #tpu.dot_dimension_numbers<[1], [0], [0], [1], [0, 0, 1, 1], [], []>} : vector<32x32xbf16>, vector<32x512xbf16>, vector<32x512xf32> -> vector<32x512xf32>
    %115 = vector.extract_strided_slice %104 {offsets = [32, 0], sizes = [32, 512], strides = [1, 1]} : vector<288x512xf32> to vector<32x512xf32>
    %116 = arith.mulf %115, %114 : vector<32x512xf32>
    %117 = arith.addf %111, %116 : vector<32x512xf32>
    %c0_79 = arith.constant 0 : index
    %c0_80 = arith.constant 0 : index
    %118 = vector.load %arg13[%c0_79, %c0_80] : memref<32x32xbf16, #tpu.memory_space<vmem>>, vector<32x32xbf16>
    %c64_81 = arith.constant 64 : index
    %c0_82 = arith.constant 0 : index
    %119 = vector.load %arg20[%c64_81, %c0_82] : memref<288x512xbf16, #tpu.memory_space<vmem>>, vector<32x512xbf16>
    %cst_83 = arith.constant dense<0.000000e+00> : vector<32x512xf32>
    %120 = tpu.matmul %118, %119, %cst_83 {dimension_numbers = #tpu.dot_dimension_numbers<[1], [0], [0], [1], [0, 0, 1, 1], [], []>} : vector<32x32xbf16>, vector<32x512xbf16>, vector<32x512xf32> -> vector<32x512xf32>
    %121 = vector.extract_strided_slice %104 {offsets = [64, 0], sizes = [32, 512], strides = [1, 1]} : vector<288x512xf32> to vector<32x512xf32>
    %122 = arith.mulf %121, %120 : vector<32x512xf32>
    %123 = arith.addf %117, %122 : vector<32x512xf32>
    %c0_84 = arith.constant 0 : index
    %c0_85 = arith.constant 0 : index
    %124 = vector.load %arg13[%c0_84, %c0_85] : memref<32x32xbf16, #tpu.memory_space<vmem>>, vector<32x32xbf16>
    %c96_86 = arith.constant 96 : index
    %c0_87 = arith.constant 0 : index
    %125 = vector.load %arg20[%c96_86, %c0_87] : memref<288x512xbf16, #tpu.memory_space<vmem>>, vector<32x512xbf16>
    %cst_88 = arith.constant dense<0.000000e+00> : vector<32x512xf32>
    %126 = tpu.matmul %124, %125, %cst_88 {dimension_numbers = #tpu.dot_dimension_numbers<[1], [0], [0], [1], [0, 0, 1, 1], [], []>} : vector<32x32xbf16>, vector<32x512xbf16>, vector<32x512xf32> -> vector<32x512xf32>
    %127 = vector.extract_strided_slice %104 {offsets = [96, 0], sizes = [32, 512], strides = [1, 1]} : vector<288x512xf32> to vector<32x512xf32>
    %128 = arith.mulf %127, %126 : vector<32x512xf32>
    %129 = arith.addf %123, %128 : vector<32x512xf32>
    %c0_89 = arith.constant 0 : index
    %c0_90 = arith.constant 0 : index
    %130 = vector.load %arg13[%c0_89, %c0_90] : memref<32x32xbf16, #tpu.memory_space<vmem>>, vector<32x32xbf16>
    %c128_91 = arith.constant 128 : index
    %c0_92 = arith.constant 0 : index
    %131 = vector.load %arg20[%c128_91, %c0_92] : memref<288x512xbf16, #tpu.memory_space<vmem>>, vector<32x512xbf16>
    %cst_93 = arith.constant dense<0.000000e+00> : vector<32x512xf32>
    %132 = tpu.matmul %130, %131, %cst_93 {dimension_numbers = #tpu.dot_dimension_numbers<[1], [0], [0], [1], [0, 0, 1, 1], [], []>} : vector<32x32xbf16>, vector<32x512xbf16>, vector<32x512xf32> -> vector<32x512xf32>
    %133 = vector.extract_strided_slice %104 {offsets = [128, 0], sizes = [32, 512], strides = [1, 1]} : vector<288x512xf32> to vector<32x512xf32>
    %134 = arith.mulf %133, %132 : vector<32x512xf32>
    %135 = arith.addf %129, %134 : vector<32x512xf32>
    %c0_94 = arith.constant 0 : index
    %c0_95 = arith.constant 0 : index
    %136 = vector.load %arg13[%c0_94, %c0_95] : memref<32x32xbf16, #tpu.memory_space<vmem>>, vector<32x32xbf16>
    %c160_96 = arith.constant 160 : index
    %c0_97 = arith.constant 0 : index
    %137 = vector.load %arg20[%c160_96, %c0_97] : memref<288x512xbf16, #tpu.memory_space<vmem>>, vector<32x512xbf16>
    %cst_98 = arith.constant dense<0.000000e+00> : vector<32x512xf32>
    %138 = tpu.matmul %136, %137, %cst_98 {dimension_numbers = #tpu.dot_dimension_numbers<[1], [0], [0], [1], [0, 0, 1, 1], [], []>} : vector<32x32xbf16>, vector<32x512xbf16>, vector<32x512xf32> -> vector<32x512xf32>
    %139 = vector.extract_strided_slice %104 {offsets = [160, 0], sizes = [32, 512], strides = [1, 1]} : vector<288x512xf32> to vector<32x512xf32>
    %140 = arith.mulf %139, %138 : vector<32x512xf32>
    %141 = arith.addf %135, %140 : vector<32x512xf32>
    %c0_99 = arith.constant 0 : index
    %c0_100 = arith.constant 0 : index
    %142 = vector.load %arg13[%c0_99, %c0_100] : memref<32x32xbf16, #tpu.memory_space<vmem>>, vector<32x32xbf16>
    %c192_101 = arith.constant 192 : index
    %c0_102 = arith.constant 0 : index
    %143 = vector.load %arg20[%c192_101, %c0_102] : memref<288x512xbf16, #tpu.memory_space<vmem>>, vector<32x512xbf16>
    %cst_103 = arith.constant dense<0.000000e+00> : vector<32x512xf32>
    %144 = tpu.matmul %142, %143, %cst_103 {dimension_numbers = #tpu.dot_dimension_numbers<[1], [0], [0], [1], [0, 0, 1, 1], [], []>} : vector<32x32xbf16>, vector<32x512xbf16>, vector<32x512xf32> -> vector<32x512xf32>
    %145 = vector.extract_strided_slice %104 {offsets = [192, 0], sizes = [32, 512], strides = [1, 1]} : vector<288x512xf32> to vector<32x512xf32>
    %146 = arith.mulf %145, %144 : vector<32x512xf32>
    %147 = arith.addf %141, %146 : vector<32x512xf32>
    %c0_104 = arith.constant 0 : index
    %c0_105 = arith.constant 0 : index
    %148 = vector.load %arg13[%c0_104, %c0_105] : memref<32x32xbf16, #tpu.memory_space<vmem>>, vector<32x32xbf16>
    %c224_106 = arith.constant 224 : index
    %c0_107 = arith.constant 0 : index
    %149 = vector.load %arg20[%c224_106, %c0_107] : memref<288x512xbf16, #tpu.memory_space<vmem>>, vector<32x512xbf16>
    %cst_108 = arith.constant dense<0.000000e+00> : vector<32x512xf32>
    %150 = tpu.matmul %148, %149, %cst_108 {dimension_numbers = #tpu.dot_dimension_numbers<[1], [0], [0], [1], [0, 0, 1, 1], [], []>} : vector<32x32xbf16>, vector<32x512xbf16>, vector<32x512xf32> -> vector<32x512xf32>
    %151 = vector.extract_strided_slice %104 {offsets = [224, 0], sizes = [32, 512], strides = [1, 1]} : vector<288x512xf32> to vector<32x512xf32>
    %152 = arith.mulf %151, %150 : vector<32x512xf32>
    %153 = arith.addf %147, %152 : vector<32x512xf32>
    %c0_109 = arith.constant 0 : index
    %c0_110 = arith.constant 0 : index
    %154 = vector.load %arg13[%c0_109, %c0_110] : memref<32x32xbf16, #tpu.memory_space<vmem>>, vector<32x32xbf16>
    %c256_111 = arith.constant 256 : index
    %c0_112 = arith.constant 0 : index
    %155 = vector.load %arg20[%c256_111, %c0_112] : memref<288x512xbf16, #tpu.memory_space<vmem>>, vector<32x512xbf16>
    %cst_113 = arith.constant dense<0.000000e+00> : vector<32x512xf32>
    %156 = tpu.matmul %154, %155, %cst_113 {dimension_numbers = #tpu.dot_dimension_numbers<[1], [0], [0], [1], [0, 0, 1, 1], [], []>} : vector<32x32xbf16>, vector<32x512xbf16>, vector<32x512xf32> -> vector<32x512xf32>
    %157 = vector.extract_strided_slice %104 {offsets = [256, 0], sizes = [32, 512], strides = [1, 1]} : vector<288x512xf32> to vector<32x512xf32>
    %158 = arith.mulf %157, %156 : vector<32x512xf32>
    %159 = arith.addf %153, %158 : vector<32x512xf32>
    %cst_114 = arith.constant 0.000000e+00 : f32
    %160 = vector.broadcast %cst_114 : f32 to vector<32x512xf32>
    %161 = arith.subf %160, %159 : vector<32x512xf32>
    %162 = math.exp %161 : vector<32x512xf32>
    %cst_115 = arith.constant 1.000000e+00 : f32
    %163 = vector.broadcast %cst_115 : f32 to vector<32x512xf32>
    %164 = arith.addf %163, %162 : vector<32x512xf32>
    %165 = tpu.reciprocal %164 {approx = true} : vector<32x512xf32> -> vector<32x512xf32>
    %166 = arith.mulf %159, %165 : vector<32x512xf32>
    %c0_116 = arith.constant 0 : index
    %c0_117 = arith.constant 0 : index
    %167 = vector.load %arg3[%c0_116, %c0_117] : memref<512x2xf32, #tpu.memory_space<vmem>>, vector<512x2xf32>
    %cst_118 = arith.constant dense<0.000000e+00> : vector<32x2xf32>
    %168 = tpu.matmul %166, %167, %cst_118 {dimension_numbers = #tpu.dot_dimension_numbers<[1], [0], [0], [1], [0, 0, 1, 1], [], []>} : vector<32x512xf32>, vector<512x2xf32>, vector<32x2xf32> -> vector<32x2xf32>
    %169 = arith.addf %168, %59 : vector<32x2xf32>
    %cst_119 = arith.constant 3.906250e-03 : f32
    %170 = vector.broadcast %cst_119 : f32 to vector<32x2xf32>
    %171 = arith.mulf %169, %170 : vector<32x2xf32>
    %c0_120 = arith.constant 0 : index
    %c0_121 = arith.constant 0 : index
    %172 = vector.load %arg15[%c0_120, %c0_121] : memref<32x32xf32, #tpu.memory_space<vmem>>, vector<32x32xf32>
    %cst_122 = arith.constant dense<0.000000e+00> : vector<32x2xf32>
    %173 = tpu.matmul %172, %171, %cst_122 {dimension_numbers = #tpu.dot_dimension_numbers<[1], [0], [0], [1], [0, 0, 1, 1], [], []>} : vector<32x32xf32>, vector<32x2xf32>, vector<32x2xf32> -> vector<32x2xf32>
    %c0_123 = arith.constant 0 : index
    %c0_124 = arith.constant 0 : index
    %174 = vector.load %arg16[%c0_123, %c0_124] : memref<32x1xf32, #tpu.memory_space<vmem>>, vector<32x1xf32>
    %175 = vector.broadcast %174 : vector<32x1xf32> to vector<32x2xf32>
    %176 = arith.addf %173, %175 : vector<32x2xf32>
    %cst_125 = arith.constant 0.000000e+00 : f32
    %177 = vector.broadcast %cst_125 : f32 to vector<32x2xf32>
    %178 = arith.maximumf %176, %177 : vector<32x2xf32>
    %c0_126 = arith.constant 0 : index
    %c0_127 = arith.constant 0 : index
    %179 = vector.load %arg17[%c0_126, %c0_127] : memref<64x32xf32, #tpu.memory_space<vmem>>, vector<64x32xf32>
    %cst_128 = arith.constant dense<0.000000e+00> : vector<64x2xf32>
    %180 = tpu.matmul %179, %178, %cst_128 {dimension_numbers = #tpu.dot_dimension_numbers<[1], [0], [0], [1], [0, 0, 1, 1], [], []>} : vector<64x32xf32>, vector<32x2xf32>, vector<64x2xf32> -> vector<64x2xf32>
    %c0_129 = arith.constant 0 : index
    %c0_130 = arith.constant 0 : index
    %181 = vector.load %arg18[%c0_129, %c0_130] : memref<64x1xf32, #tpu.memory_space<vmem>>, vector<64x1xf32>
    %182 = vector.broadcast %181 : vector<64x1xf32> to vector<64x2xf32>
    %183 = arith.addf %180, %182 : vector<64x2xf32>
    %184 = vector.extract_strided_slice %183 {offsets = [0, 0], sizes = [32, 2], strides = [1, 1]} : vector<64x2xf32> to vector<32x2xf32>
    %185 = vector.extract_strided_slice %183 {offsets = [32, 0], sizes = [32, 2], strides = [1, 1]} : vector<64x2xf32> to vector<32x2xf32>
    %186 = arith.maximumf %184, %185 : vector<32x2xf32>
    %187 = arith.subf %184, %186 : vector<32x2xf32>
    %188 = math.exp %187 : vector<32x2xf32>
    %189 = arith.subf %185, %186 : vector<32x2xf32>
    %190 = math.exp %189 : vector<32x2xf32>
    %191 = arith.addf %188, %190 : vector<32x2xf32>
    %192 = tpu.reciprocal %191 {approx = true} : vector<32x2xf32> -> vector<32x2xf32>
    %193 = arith.mulf %188, %192 : vector<32x2xf32>
    %c0_131 = arith.constant 0 : index
    %c0_132 = arith.constant 0 : index
    %194 = vector.load %arg4[%c0_131, %c0_132] : memref<2x512xf32, #tpu.memory_space<vmem>>, vector<2x512xf32>
    %cst_133 = arith.constant dense<0.000000e+00> : vector<32x512xf32>
    %195 = tpu.matmul %193, %194, %cst_133 {dimension_numbers = #tpu.dot_dimension_numbers<[1], [0], [0], [1], [0, 0, 1, 1], [], []>} : vector<32x2xf32>, vector<2x512xf32>, vector<32x512xf32> -> vector<32x512xf32>
    %196 = arith.mulf %190, %192 : vector<32x2xf32>
    %c0_134 = arith.constant 0 : index
    %c0_135 = arith.constant 0 : index
    %197 = vector.load %arg4[%c0_134, %c0_135] : memref<2x512xf32, #tpu.memory_space<vmem>>, vector<2x512xf32>
    %cst_136 = arith.constant dense<0.000000e+00> : vector<32x512xf32>
    %198 = tpu.matmul %196, %197, %cst_136 {dimension_numbers = #tpu.dot_dimension_numbers<[1], [0], [0], [1], [0, 0, 1, 1], [], []>} : vector<32x2xf32>, vector<2x512xf32>, vector<32x512xf32> -> vector<32x512xf32>
    %199 = arith.mulf %166, %195 : vector<32x512xf32>
    %200 = arith.mulf %56, %198 : vector<32x512xf32>
    %201 = arith.addf %199, %200 : vector<32x512xf32>
    %c0_137 = arith.constant 0 : index
    %c0_138 = arith.constant 0 : index
    %c0_139 = arith.constant 0 : index
    %202 = vector.load %arg19[%c0_137, %c0_138, %c0_139] : memref<1x32x512xf32, #tpu.memory_space<vmem>>, vector<1x32x512xf32>
    %203 = vector.shape_cast %202 : vector<1x32x512xf32> to vector<32x512xf32>
    %204 = vector.shape_cast %201 : vector<32x512xf32> to vector<1x32x512xf32>
    tpu.vector_store %arg19[%c0_137, %c0_138, %c0_139], %204 {strides = array<i32>} : memref<1x32x512xf32, #tpu.memory_space<vmem>>, vector<1x32x512xf32>,
    return
  }
  func.func @transform_0(%arg0: i32) -> (i32, i32, i32) {
    %c0_i32 = arith.constant 0 : i32
    %c0_i32_0 = arith.constant 0 : i32
    %c0_i32_1 = arith.constant 0 : i32
    return %arg0, %c0_i32, %c0_i32_0 : i32, i32, i32
  }
  func.func @transform_1(%arg0: i32) -> (i32, i32) {
    %c0_i32 = arith.constant 0 : i32
    %c0_i32_0 = arith.constant 0 : i32
    %c0_i32_1 = arith.constant 0 : i32
    return %c0_i32, %c0_i32_0 : i32, i32
  }
  func.func @transform_2(%arg0: i32) -> (i32, i32) {
    %c0_i32 = arith.constant 0 : i32
    %c0_i32_0 = arith.constant 0 : i32
    %c0_i32_1 = arith.constant 0 : i32
    return %c0_i32, %c0_i32_0 : i32, i32
  }
  func.func @transform_3(%arg0: i32) -> (i32, i32) {
    %c0_i32 = arith.constant 0 : i32
    %c0_i32_0 = arith.constant 0 : i32
    %c0_i32_1 = arith.constant 0 : i32
    return %c0_i32, %c0_i32_0 : i32, i32
  }
  func.func @transform_4(%arg0: i32) -> (i32, i32) {
    %c0_i32 = arith.constant 0 : i32
    %c0_i32_0 = arith.constant 0 : i32
    %c0_i32_1 = arith.constant 0 : i32
    return %c0_i32, %c0_i32_0 : i32, i32
  }
  func.func @transform_5(%arg0: i32) -> (i32, i32) {
    %c0_i32 = arith.constant 0 : i32
    %c0_i32_0 = arith.constant 0 : i32
    %c0_i32_1 = arith.constant 0 : i32
    return %c0_i32, %c0_i32_0 : i32, i32
  }
  func.func @transform_6(%arg0: i32) -> (i32, i32) {
    %c0_i32 = arith.constant 0 : i32
    %c0_i32_0 = arith.constant 0 : i32
    %c0_i32_1 = arith.constant 0 : i32
    return %c0_i32, %c0_i32_0 : i32, i32
  }
  func.func @transform_7(%arg0: i32) -> (i32, i32) {
    %c0_i32 = arith.constant 0 : i32
    %c0_i32_0 = arith.constant 0 : i32
    %c0_i32_1 = arith.constant 0 : i32
    return %c0_i32, %c0_i32_0 : i32, i32
  }
  func.func @transform_8(%arg0: i32) -> (i32, i32) {
    %c0_i32 = arith.constant 0 : i32
    %c0_i32_0 = arith.constant 0 : i32
    %c0_i32_1 = arith.constant 0 : i32
    return %c0_i32, %c0_i32_0 : i32, i32
  }
  func.func @transform_9(%arg0: i32) -> (i32, i32) {
    %c0_i32 = arith.constant 0 : i32
    %c0_i32_0 = arith.constant 0 : i32
    %c0_i32_1 = arith.constant 0 : i32
    return %c0_i32, %c0_i32_0 : i32, i32
  }
  func.func @transform_10(%arg0: i32) -> (i32, i32) {
    %c0_i32 = arith.constant 0 : i32
    %c0_i32_0 = arith.constant 0 : i32
    %c0_i32_1 = arith.constant 0 : i32
    return %c0_i32, %c0_i32_0 : i32, i32
  }
  func.func @transform_11(%arg0: i32) -> (i32, i32) {
    %c0_i32 = arith.constant 0 : i32
    %c0_i32_0 = arith.constant 0 : i32
    %c0_i32_1 = arith.constant 0 : i32
    return %c0_i32, %c0_i32_0 : i32, i32
  }
  func.func @transform_12(%arg0: i32) -> (i32, i32) {
    %c0_i32 = arith.constant 0 : i32
    %c0_i32_0 = arith.constant 0 : i32
    %c0_i32_1 = arith.constant 0 : i32
    return %c0_i32, %c0_i32_0 : i32, i32
  }
  func.func @transform_13(%arg0: i32) -> (i32, i32) {
    %c0_i32 = arith.constant 0 : i32
    %c0_i32_0 = arith.constant 0 : i32
    %c0_i32_1 = arith.constant 0 : i32
    return %c0_i32, %c0_i32_0 : i32, i32
  }
  func.func @transform_14(%arg0: i32) -> (i32, i32) {
    %c0_i32 = arith.constant 0 : i32
    %c0_i32_0 = arith.constant 0 : i32
    %c0_i32_1 = arith.constant 0 : i32
    return %c0_i32, %c0_i32_0 : i32, i32
  }
  func.func @transform_15(%arg0: i32) -> (i32, i32) {
    %c0_i32 = arith.constant 0 : i32
    %c0_i32_0 = arith.constant 0 : i32
    %c0_i32_1 = arith.constant 0 : i32
    return %c0_i32, %c0_i32_0 : i32, i32
  }
  func.func @transform_16(%arg0: i32) -> (i32, i32) {
    %c0_i32 = arith.constant 0 : i32
    %c0_i32_0 = arith.constant 0 : i32
    %c0_i32_1 = arith.constant 0 : i32
    return %c0_i32, %c0_i32_0 : i32, i32
  }
  func.func @transform_17(%arg0: i32) -> (i32, i32) {
    %c0_i32 = arith.constant 0 : i32
    %c0_i32_0 = arith.constant 0 : i32
    %c0_i32_1 = arith.constant 0 : i32
    return %c0_i32, %c0_i32_0 : i32, i32
  }
  func.func @transform_18(%arg0: i32) -> (i32, i32, i32) {
    %c0_i32 = arith.constant 0 : i32
    %c0_i32_0 = arith.constant 0 : i32
    %c0_i32_1 = arith.constant 0 : i32
    return %arg0, %c0_i32, %c0_i32_0 : i32, i32, i32
  }
}

</mosaic_0001>

<bundles_post_ra>
// kernel: tpu_custom_call.1
= control target key start
LH: loop header
LB: loop body
LE: loop exit
PB: predicated region body
PF: predicated region fallthrough
CT: control target
= control target key end

     0   :  { %s10926_s0 = inlined_call_operand.vmem [shape: f32[2,32,512], index: 0, kind: input, shape index: {}]   ;;  %s10927_s1 = inlined_call_operand.vmem [shape: f32[9,512], index: 1, kind: input, shape index: {}]   ;;  %s10928_s2 = inlined_call_operand.vmem [shape: f32[512,2], index: 2, kind: input, shape index: {}]   ;;  %s10929_s3 = inlined_call_operand.vmem [shape: f32[2,512], index: 3, kind: input, shape index: {}]   ;;  %s10930_s4 = inlined_call_operand.vmem [shape: bf16[32,288], index: 4, kind: input, shape index: {}]   ;;  %s10931_s5 = inlined_call_operand.vmem [shape: bf16[16,32], index: 5, kind: input, shape index: {}]   ;;  %s10932_s6 = inlined_call_operand.vmem [shape: bf16[16,32], index: 6, kind: input, shape index: {}]   ;;  %s10933_s7 = inlined_call_operand.vmem [shape: bf16[36,16], index: 7, kind: input, shape index: {}]   ;;  %s10934_s8 = inlined_call_operand.vmem [shape: f32[36,1], index: 8, kind: input, shape index: {}]   ;;  %s10935_s9 = inlined_call_operand.vmem [shape: f32[36,36], index: 9, kind: input, shape index: {}]   ;;  %s10936_s10 = inlined_call_operand.vmem [shape: f32[36,1], index: 10, kind: input, shape index: {}]   ;;  %s10937_s11 = inlined_call_operand.vmem [shape: f32[36,1], index: 11, kind: input, shape index: {}]   ;;  %s10938_s12 = inlined_call_operand.vmem [shape: bf16[32,32], index: 12, kind: input, shape index: {}]   ;;  %s10939_s13 = inlined_call_operand.vmem [shape: bf16[288,36], index: 13, kind: input, shape index: {}]   ;;  %s10940_s14 = inlined_call_operand.vmem [shape: f32[32,32], index: 14, kind: input, shape index: {}]   ;;  %s10941_s15 = inlined_call_operand.vmem [shape: f32[32,1], index: 15, kind: input, shape index: {}]   ;;  %s10942_s16 = inlined_call_operand.vmem [shape: f32[64,32], index: 16, kind: input, shape index: {}]   ;;  %s10943_s17 = inlined_call_operand.vmem [shape: f32[64,1], index: 17, kind: input, shape index: {}]   ;;  %s10944_s18 = inlined_call_operand.hbm [shape: f32[2,32,512], index: 18, kind: output, shape index: {}]  }
   0x1   :  { %11079 = sst [smem:[#allocation133_spill]] %s10926_s0 }
   0x2   :  { %11080 = sst [smem:[#allocation134_spill]] %s10927_s1 }
   0x3   :  { %11081 = sst [smem:[#allocation135_spill]] %s10928_s2 }
   0x4   :  { %23 = vsyncpa [#allocation4], 0 }
   0x5   :  { %25 = vsyncpa [#allocation4 + $0x1], 0  ;;  %s8071_s27 = smov 0   ;;  %s8073_s28 = smov 0  }
   0x6   :  { %s8075_s29 = smov 0   ;;  %s8077_s30 = smov 0  }
   0x7 LB: > { %11082 = sst [smem:[#allocation6_spill]] %s7946_s27  ;;  %s8092_s0 = sadd.s32 4294967295, %s7958_s30   ;;  %s7958_s30 = sphi %s8077_s30, %s11532_s30   ;;  %s7954_s29 = sphi %s8075_s29, %s11534_s29   ;;  %s7950_s28 = sphi %s8073_s28, %s11536_s28   ;;  %s7946_s27 = sphi %s8071_s27, %s11535_s27  }
   0x8   : > { %11083 = sst [smem:[#allocation7_spill]] %s7954_s29  ;;  %s6690_s19 = sadd.s32 4294967294, %s7958_s30  }
   0x9   : > { %s8096_s1 = sadd.s32 1, %s7958_s30   ;;  %s421_s20 = sadd.s32 1, %s7954_s29 }
   0xa   : > { %11084 = sst [smem:[#allocation8_spill]] %s8096_s1  ;;  %s418_s21 = ssub.s32 %s7958_s30, %s8096_s1 }
   0xb   : > { %p431_p0 = scmp.ne.s32.totalorder %s7954_s29, %s7950_s28  ;;  %p419_p1 = scmp.eq.s32.totalorder %s418_s21, 0 }
   0xc   : > { %p432_p2 = scmp.eq.s32.totalorder %s8092_s0, 1  ;;  %p437_p3 = scmp.ne.s32.totalorder %s7950_s28, %s7946_s27 }
   0xd   : > { %p438_p4 = scmp.eq.s32.totalorder %s6690_s19, 1  ;;  %p6693_p7 = scmp.ge.s32.totalorder %s7958_s30, 1 }
   0xe   : > { %s8107_s22 = scalar_select %p419_p1, %s7954_s29, %s421_s20  }
   0xf   : > { %p8109_p5 = por %p432_p2, %p431_p0  ;;  %p8113_p6 = por %p438_p4, %p437_p3 }
  0x10   : > { %11085 = sst [smem:[#allocation9_spill]] %s8107_s22  ;;  %p515_p8 = scmp.lt.s32.totalorder %s7958_s30, 3 }
  0x11   : > { %s11087_s23 = scalar_select %p8113_p6, 1, 0 }
  0x12   : > { %p516_p9 = pnand %p6693_p7, %p515_p8 }
  0x13   : > { %11088 = sst [smem:[#allocation10_spill]] %s11087_s23 }
  0x14   : > { %519 = sbr.rel (%p516_p9) target bundleno = 3368 (0xd28), region = 92 }
  0x1b   : > { %p569_p10 = scmp.lt.s32.totalorder %s8092_s0, 1  ;;  %s11089_s20 = sld [smem:[#allocation133_spill]]  ;;  %v623_v16 = vlaneseq  ;;  %vm1550_vm8 = vcmask 261120   ;;  %vm2279_vm9 = vcmask 130048   ;;  %vm7970_vm10 = vmmov 0  }
  0x1c   : > { %s7962_s26 = smov 15   ;;  %s7963_s19 = smov 1   ;;  %vm2812_vm11 = vcmask 1043456   ;;  %vm2796_vm12 = vcmask 293888   ;;  %vm3134_vm13 = vcmask 1041408   ;;  %vm3118_vm14 = vcmask 15360  }
  0x1d   : > { %s570_s24 = scalar_select %p569_p10, %s8092_s0, 1  ;;  %v8238_v17 = vshrl.u32 %v623_v16, 7  ;;  %v8240_v18 = vand.u32 127, %v623_v16 }
  0x1e   : > { %s7973_s23 = smov [#allocation3]  }
  0x1f   : > { %s6904_s25 = sshll.u32 %s570_s24, 7  ;;  %s7960_s24 = smov 17   ;;  %v8247_v19 = vsub.s32 1, %v8238_v17  ;;  %vm625_vm0 = vcmp.lt.s32.totalorder %v8240_v18, 17  ;;  %v8261_v27 = vsub.s32 2, %v8238_v17  ;;  %v8270_v31 = vsub.s32 0, %v8238_v17 }
  0x20   : > { %v8273_v32 = vsub.s32 3, %v8238_v17  ;;  %vm728_vm1 = vcmp.lt.s32.totalorder %v8240_v18, 16  ;;  %vm832_vm2 = vcmp.lt.s32.totalorder %v8240_v18, 15  ;;  %vm936_vm3 = vcmp.lt.s32.totalorder %v8240_v18, 1 }
  0x21   : > { %s8124_s21 = scalar_lea.vmem %s11089_s20, %s6904_s25  ;;  %s7961_s25 = smov 16   ;;  %vm1040_vm4 = vcmp.lt.s32.totalorder %v8240_v18, 127  ;;  %vm1144_vm5 = vcmp.lt.s32.totalorder %v8240_v18, 113  ;;  %vm1248_vm6 = vcmp.lt.s32.totalorder %v8240_v18, 112  ;;  %vm1352_vm7 = vcmp.lt.s32.totalorder %v8240_v18, 111 }
  0x22   : > { %v8127_v0 = vld [vmem:[%s8124_s21 + $0x8] sm:$0xff]  ;;  %v8130_v1 = vld [vmem:[%s8124_s21] sm:$0xff]  ;;  %v8143_v4 = vld [vmem:[%s8124_s21 + $0x30] sm:$0xff]  ;;  %s7965_s20 = smov 113  }
  0x23   : > { %599 = vrot.lane.b32.xlu1 %v8127_v0, %s7960_s24  ;;  %591 = vrot.lane.b32.xlu0 %v8130_v1, %s7960_s24  ;;  %v8135_v2 = vld [vmem:[%s8124_s21 + $0x28] sm:$0xff]  ;;  %v8138_v3 = vld [vmem:[%s8124_s21 + $0x20] sm:$0xff] }
  0x24   : > { %v8146_v5 = vld [vmem:[%s8124_s21 + $0x10] sm:$0xff]  ;;  %v8149_v6 = vld [vmem:[%s8124_s21 + $0x38] sm:$0xff]  ;;  %v8157_v8 = vld [vmem:[%s8124_s21 + $0x60] sm:$0xff] }
  0x25   : > { %v8152_v7 = vld [vmem:[%s8124_s21 + $0x18] sm:$0xff]  ;;  %v8160_v9 = vld [vmem:[%s8124_s21 + $0x40] sm:$0xff]  ;;  %v8165_v10 = vld [vmem:[%s8124_s21 + $0x68] sm:$0xff] }
  0x26   : > { %v8168_v11 = vld [vmem:[%s8124_s21 + $0x48] sm:$0xff]  ;;  %v8173_v12 = vld [vmem:[%s8124_s21 + $0x70] sm:$0xff]  ;;  %v8183_v14 = vld [vmem:[%s8124_s21 + $0x78] sm:$0xff] }
  0x27   : > { %601 = vrot.lane.b32.xlu1 %v8135_v2, %s7960_s24  ;;  %593 = vrot.lane.b32.xlu0 %v8138_v3, %s7960_s24  ;;  %v8176_v13 = vld [vmem:[%s8124_s21 + $0x50] sm:$0xff]  ;;  %v8186_v15 = vld [vmem:[%s8124_s21 + $0x58] sm:$0xff]  ;;  %s6905_s21 = sshll.u32 %s8092_s0, 11 }
  0x28   : > { %v7770_v18 = vld [vmem:[%s10930_s4 + $0x8] ss:$12 sps:$4 sm:$0xff]   ;;  %s10875_s29 = scalar_lea.hbm %s10944_s18, %s6905_s21 }
  0x2b   : > { %609 = vrot.lane.b32.xlu1 %v8143_v4, %s7960_s24  ;;  %607 = vrot.lane.b32.xlu0 %v8146_v5, %s7960_s24 }
  0x2f   : > { %617 = vrot.lane.b32.xlu1 %v8149_v6, %s7960_s24  ;;  %615 = vrot.lane.b32.xlu0 %v8152_v7, %s7960_s24 }
  0x33   : > { %597 = vrot.lane.b32.xlu1 %v8157_v8, %s7960_s24  ;;  %595 = vrot.lane.b32.xlu0 %v8160_v9, %s7960_s24 }
  0x37   : > { %605 = vrot.lane.b32.xlu1 %v8165_v10, %s7960_s24  ;;  %603 = vrot.lane.b32.xlu0 %v8168_v11, %s7960_s24 }
  0x3b   : > { %613 = vrot.lane.b32.xlu1 %v8173_v12, %s7960_s24  ;;  %611 = vrot.lane.b32.xlu0 %v8176_v13, %s7960_s24 }
  0x3f   : > { %621 = vrot.lane.b32.xlu1 %v8183_v14, %s7960_s24  ;;  %619 = vrot.lane.b32.xlu0 %v8186_v15, %s7960_s24  ;;  %s11090_s24 = sld [smem:[#allocation134_spill]] }
  0x43   : > { %698 = vrot.lane.b32.xlu1 %v8138_v3, %s7961_s25  ;;  %696 = vrot.lane.b32.xlu0 %v8130_v1, %s7961_s25 }
  0x45   : > { %v642_v20 = vld [vmem:[%s11090_s24] ss:$8 sm:$0xf] }
  0x46   : > { %v651_v23 = vrot.slane %v642_v20, %v8247_v19  ;;  %v655_v36 = vrot.slane %v642_v20, %v8261_v27  ;;  %v647_v39 = vrot.slane %v642_v20, %v8270_v31  ;;  %v659_v40 = vrot.slane %v642_v20, %v8273_v32 }
  0x47   : > { %706 = vrot.lane.b32.xlu1 %v8135_v2, %s7961_s25  ;;  %704 = vrot.lane.b32.xlu0 %v8127_v0, %s7961_s25 }
  0x4b   : > { %714 = vrot.lane.b32.xlu1 %v8143_v4, %s7961_s25  ;;  %712 = vrot.lane.b32.xlu0 %v8146_v5, %s7961_s25 }
  0x4f   : > { %722 = vrot.lane.b32.xlu1 %v8149_v6, %s7961_s25  ;;  %720 = vrot.lane.b32.xlu0 %v8152_v7, %s7961_s25 }
  0x53   : > { %702 = vrot.lane.b32.xlu1 %v8157_v8, %s7961_s25  ;;  %700 = vrot.lane.b32.xlu0 %v8160_v9, %s7961_s25 }
  0x57   : > { %710 = vrot.lane.b32.xlu1 %v8165_v10, %s7961_s25  ;;  %708 = vrot.lane.b32.xlu0 %v8168_v11, %s7961_s25 }
  0x5b   : > { %718 = vrot.lane.b32.xlu1 %v8173_v12, %s7961_s25  ;;  %716 = vrot.lane.b32.xlu0 %v8176_v13, %s7961_s25 }
  0x5f   : > { %726 = vrot.lane.b32.xlu1 %v8183_v14, %s7961_s25  ;;  %724 = vrot.lane.b32.xlu0 %v8186_v15, %s7961_s25  ;;  %s7964_s25 = smov 127  }
  0x63   : > { %802 = vrot.lane.b32.xlu1 %v8138_v3, %s7962_s26  ;;  %800 = vrot.lane.b32.xlu0 %v8130_v1, %s7962_s26 }
  0x67   : > { %810 = vrot.lane.b32.xlu1 %v8135_v2, %s7962_s26  ;;  %808 = vrot.lane.b32.xlu0 %v8127_v0, %s7962_s26 }
  0x6b   : > { %818 = vrot.lane.b32.xlu1 %v8143_v4, %s7962_s26  ;;  %816 = vrot.lane.b32.xlu0 %v8146_v5, %s7962_s26 }
  0x6f   : > { %826 = vrot.lane.b32.xlu1 %v8149_v6, %s7962_s26  ;;  %824 = vrot.lane.b32.xlu0 %v8152_v7, %s7962_s26 }
  0x73   : > { %806 = vrot.lane.b32.xlu1 %v8157_v8, %s7962_s26  ;;  %804 = vrot.lane.b32.xlu0 %v8160_v9, %s7962_s26 }
  0x77   : > { %814 = vrot.lane.b32.xlu1 %v8165_v10, %s7962_s26  ;;  %812 = vrot.lane.b32.xlu0 %v8168_v11, %s7962_s26 }
  0x7b   : > { %822 = vrot.lane.b32.xlu1 %v8173_v12, %s7962_s26  ;;  %820 = vrot.lane.b32.xlu0 %v8176_v13, %s7962_s26 }
  0x7f   : > { %830 = vrot.lane.b32.xlu1 %v8183_v14, %s7962_s26  ;;  %828 = vrot.lane.b32.xlu0 %v8186_v15, %s7962_s26  ;;  %s7966_s26 = smov 112  }
  0x83   : > { %906 = vrot.lane.b32.xlu1 %v8138_v3, %s7963_s19  ;;  %904 = vrot.lane.b32.xlu0 %v8130_v1, %s7963_s19 }
  0x87   : > { %914 = vrot.lane.b32.xlu1 %v8135_v2, %s7963_s19  ;;  %912 = vrot.lane.b32.xlu0 %v8127_v0, %s7963_s19 }
  0x8b   : > { %922 = vrot.lane.b32.xlu1 %v8143_v4, %s7963_s19  ;;  %920 = vrot.lane.b32.xlu0 %v8146_v5, %s7963_s19 }
  0x8f   : > { %930 = vrot.lane.b32.xlu1 %v8149_v6, %s7963_s19  ;;  %928 = vrot.lane.b32.xlu0 %v8152_v7, %s7963_s19 }
  0x93   : > { %910 = vrot.lane.b32.xlu1 %v8157_v8, %s7963_s19  ;;  %908 = vrot.lane.b32.xlu0 %v8160_v9, %s7963_s19 }
  0x95   : > { %v600_v21 = vpop.permute.xlu1 %599  ;;  %v592_v22 = vpop.permute.xlu0 %591 }
  0x96   : > { %v634_v24 = vsel %vm625_vm0, %v592_v22, %v600_v21 }
  0x97   : > { %918 = vrot.lane.b32.xlu1 %v8165_v10, %s7963_s19  ;;  %916 = vrot.lane.b32.xlu0 %v8168_v11, %s7963_s19  ;;  %v665_v29 = vmul.f32 %v651_v23, %v634_v24 }
  0x99   : > { %v602_v25 = vpop.permute.xlu1 %601  ;;  %v594_v26 = vpop.permute.xlu0 %593 }
  0x9a   : > { %v635_v28 = vsel %vm625_vm0, %v594_v26, %v602_v25 }
  0x9b   : > { %926 = vrot.lane.b32.xlu1 %v8173_v12, %s7963_s19  ;;  %924 = vrot.lane.b32.xlu0 %v8176_v13, %s7963_s19  ;;  %v669_v30 = vmul.f32 %v651_v23, %v635_v28 }
  0x9d   : > { %v610_v33 = vpop.permute.xlu1 %609  ;;  %v608_v34 = vpop.permute.xlu0 %607  ;;  %v8275_v35 = vpack.c.bf16 %v669_v30, %v665_v29 }
  0x9e   : > { %v631_v37 = vsel %vm625_vm0, %v602_v25, %v610_v33  ;;  %v630_v38 = vsel %vm625_vm0, %v600_v21, %v608_v34 }
  0x9f   : > { %934 = vrot.lane.b32.xlu1 %v8183_v14, %s7963_s19  ;;  %932 = vrot.lane.b32.xlu0 %v8186_v15, %s7963_s19  ;;  %v666_v43 = vmul.f32 %v655_v36, %v630_v38  ;;  %v670_v44 = vmul.f32 %v655_v36, %v631_v37 }
  0xa0   : > { %1557 = vmatprep.subr.bf16.mxu0 %v8275_v35 }
  0xa1   : > { %v618_v41 = vpop.permute.xlu1 %617  ;;  %v616_v42 = vpop.permute.xlu0 %615  ;;  %v8309_v57 = vpack.c.bf16 %v670_v44, %v666_v43 }
  0xa2   : > { %v627_v45 = vsel %vm625_vm0, %v610_v33, %v618_v41  ;;  %v639_v46 = vsel %vm625_vm0, %v618_v41, %v594_v26  ;;  %v626_v47 = vsel %vm625_vm0, %v608_v34, %v616_v42  ;;  %v638_v48 = vsel %vm625_vm0, %v616_v42, %v592_v22 }
  0xa3   : > { %1010 = vrot.lane.b32.xlu1 %v8138_v3, %s7964_s25  ;;  %1008 = vrot.lane.b32.xlu0 %v8130_v1, %s7964_s25  ;;  %v664_v49 = vmul.f32 %v647_v39, %v638_v48  ;;  %v668_v50 = vmul.f32 %v647_v39, %v639_v46  ;;  %v667_v51 = vmul.f32 %v659_v40, %v626_v47 }
  0xa4   : > { %v671_v52 = vmul.f32 %v659_v40, %v627_v45 }
  0xa5   : > { %v598_v53 = vpop.permute.xlu1 %597  ;;  %v596_v54 = vpop.permute.xlu0 %595  ;;  %v8301_v55 = vpack.c.bf16 %v668_v50, %v664_v49 }
  0xa6   : > { %v8303_v56 = vpack.c.bf16 %v671_v52, %v667_v51 }
  0xa7   : > { %1018 = vrot.lane.b32.xlu1 %v8135_v2, %s7964_s25  ;;  %1016 = vrot.lane.b32.xlu0 %v8127_v0, %s7964_s25 }
  0xa8   : > { %1558 = vmatpush1.bf16.msra.mxu0 %v8301_v55  ;;  %1663 = vmatprep.subr.bf16.mxu1 %v8303_v56 }
  0xa9   : > { %1664 = vmatpush1.bf16.msra.mxu1 %v8309_v57  ;;  %v606_v58 = vpop.permute.xlu1 %605  ;;  %v604_v59 = vpop.permute.xlu0 %603 }
  0xaa   : > { %v637_v60 = vsel %vm625_vm0, %v598_v53, %v606_v58  ;;  %v636_v61 = vsel %vm625_vm0, %v596_v54, %v604_v59 }
  0xab   : > { %v677_v62 = vmul.f32 %v651_v23, %v637_v60  ;;  %v673_v63 = vmul.f32 %v651_v23, %v636_v61  ;;  %1026 = vrot.lane.b32.xlu1 %v8143_v4, %s7964_s25  ;;  %1024 = vrot.lane.b32.xlu0 %v8146_v5, %s7964_s25 }
  0xad   : > { %v614_v16 = vpop.permute.xlu1 %613  ;;  %v612_v20 = vpop.permute.xlu0 %611  ;;  %v8322_v21 = vpack.c.bf16 %v677_v62, %v673_v63 }
  0xae   : > { %v633_v22 = vsel %vm625_vm0, %v606_v58, %v614_v16  ;;  %v632_v24 = vsel %vm625_vm0, %v604_v59, %v612_v20 }
  0xaf   : > { %1034 = vrot.lane.b32.xlu1 %v8149_v6, %s7964_s25  ;;  %1032 = vrot.lane.b32.xlu0 %v8152_v7, %s7964_s25  ;;  %v678_v23 = vmul.f32 %v655_v36, %v633_v22  ;;  %v674_v25 = vmul.f32 %v655_v36, %v632_v24  ;;  %v6697_v36 = vld [vmem:[%s11090_s24 + $0x1] ss:$8 sm:$0xf] }
  0xb0   : > { %1559 = vmatprep.subr.bf16.mxu0 %v8322_v21  ;;  %v751_v62 = vrot.slane %v6697_v36, %v8270_v31  ;;  %v763_v63 = vrot.slane %v6697_v36, %v8273_v32 }
  0xb1   : > { %v622_v26 = vpop.permute.xlu1 %621  ;;  %v620_v28 = vpop.permute.xlu0 %619 }
  0xb2   : > { %v629_v29 = vsel %vm625_vm0, %v614_v16, %v622_v26  ;;  %v641_v30 = vsel %vm625_vm0, %v622_v26, %v598_v53  ;;  %v628_v33 = vsel %vm625_vm0, %v612_v20, %v620_v28  ;;  %v640_v34 = vsel %vm625_vm0, %v620_v28, %v596_v54 }
  0xb3   : > { %v676_v37 = vmul.f32 %v647_v39, %v641_v30  ;;  %v679_v38 = vmul.f32 %v659_v40, %v629_v29  ;;  %v672_v41 = vmul.f32 %v647_v39, %v640_v34  ;;  %v675_v42 = vmul.f32 %v659_v40, %v628_v33  ;;  %1014 = vrot.lane.b32.xlu1 %v8157_v8, %s7964_s25 }
  0xb4   : > { %1012 = vrot.lane.b32.xlu0 %v8160_v9, %s7964_s25  ;;  %v8355_v39 = vpack.c.bf16 %v678_v23, %v674_v25  ;;  %v755_v40 = vrot.slane %v6697_v36, %v8247_v19  ;;  %v759_v53 = vrot.slane %v6697_v36, %v8261_v27 }
  0xb5   : > { %v699_v43 = vpop.permute.xlu1 %698  ;;  %v697_v44 = vpop.permute.xlu0 %696  ;;  %v8348_v45 = vpack.c.bf16 %v676_v37, %v672_v41  ;;  %v8350_v46 = vpack.c.bf16 %v679_v38, %v675_v42 }
  0xb6   : > { %11092 = vst [vmem:[#allocation12_spill] sm:$0xff] %v8355_v39 }
  0xb7   : > { %11091 = vst [vmem:[#allocation11_spill] sm:$0xff] %v8348_v45  ;;  %1022 = vrot.lane.b32.xlu1 %v8165_v10, %s7964_s25  ;;  %1560 = vmatpush1.bf16.msra.mxu0 %v8348_v45 }
  0xb8   : > { %1020 = vrot.lane.b32.xlu0 %v8168_v11, %s7964_s25  ;;  %1665 = vmatprep.subr.bf16.mxu1 %v8350_v46 }
  0xb9   : > { %1666 = vmatpush1.bf16.msra.mxu1 %v8355_v39  ;;  %v707_v47 = vpop.permute.xlu1 %706  ;;  %v705_v48 = vpop.permute.xlu0 %704 }
  0xba   : > { %v738_v49 = vsel %vm728_vm1, %v699_v43, %v707_v47  ;;  %v737_v50 = vsel %vm728_vm1, %v697_v44, %v705_v48 }
  0xbb   : > { %v773_v51 = vmul.f32 %v755_v40, %v738_v49  ;;  %v769_v52 = vmul.f32 %v755_v40, %v737_v50  ;;  %1030 = vrot.lane.b32.xlu1 %v8173_v12, %s7964_s25 }
  0xbc   : > { %1028 = vrot.lane.b32.xlu0 %v8176_v13, %s7964_s25 }
  0xbd   : > { %v715_v54 = vpop.permute.xlu1 %714  ;;  %v713_v58 = vpop.permute.xlu0 %712  ;;  %v8372_v59 = vpack.c.bf16 %v773_v51, %v769_v52 }
  0xbe   : > { %v734_v60 = vsel %vm728_vm1, %v707_v47, %v715_v54  ;;  %v733_v61 = vsel %vm728_vm1, %v705_v48, %v713_v58 }
  0xbf   : > { %11093 = vst [vmem:[#allocation13_spill] sm:$0xff] %v8372_v59  ;;  %1038 = vrot.lane.b32.xlu1 %v8183_v14, %s7964_s25  ;;  %1561 = vmatprep.subr.bf16.mxu0 %v8372_v59  ;;  %v774_v16 = vmul.f32 %v759_v53, %v734_v60  ;;  %v770_v20 = vmul.f32 %v759_v53, %v733_v61 }
  0xc0   : > { %1036 = vrot.lane.b32.xlu0 %v8186_v15, %s7964_s25 }
  0xc1   : > { %v723_v22 = vpop.permute.xlu1 %722  ;;  %v721_v24 = vpop.permute.xlu0 %720  ;;  %v8404_v36 = vpack.c.bf16 %v774_v16, %v770_v20 }
  0xc2   : > { %v730_v23 = vsel %vm728_vm1, %v715_v54, %v723_v22  ;;  %v742_v25 = vsel %vm728_vm1, %v723_v22, %v699_v43  ;;  %v729_v26 = vsel %vm728_vm1, %v713_v58, %v721_v24  ;;  %v741_v28 = vsel %vm728_vm1, %v721_v24, %v697_v44 }
  0xc3   : > { %v772_v29 = vmul.f32 %v751_v62, %v742_v25  ;;  %v775_v30 = vmul.f32 %v763_v63, %v730_v23  ;;  %v768_v33 = vmul.f32 %v751_v62, %v741_v28  ;;  %v771_v34 = vmul.f32 %v763_v63, %v729_v26  ;;  %1114 = vrot.lane.b32.xlu1 %v8138_v3, %s7965_s20 }
  0xc4   : > { %1112 = vrot.lane.b32.xlu0 %v8130_v1, %s7965_s20  ;;  %11096 = vst [vmem:[#allocation16_spill] sm:$0xff] %v8404_v36 }
  0xc5   : > { %v703_v37 = vpop.permute.xlu1 %702  ;;  %v701_v38 = vpop.permute.xlu0 %700  ;;  %v8397_v41 = vpack.c.bf16 %v772_v29, %v768_v33  ;;  %v8399_v42 = vpack.c.bf16 %v775_v30, %v771_v34 }
  0xc7   : > { %11094 = vst [vmem:[#allocation14_spill] sm:$0xff] %v8397_v41  ;;  %11095 = vst [vmem:[#allocation15_spill] sm:$0xff] %v8399_v42  ;;  %1122 = vrot.lane.b32.xlu1 %v8135_v2, %s7965_s20  ;;  %1562 = vmatpush1.bf16.msra.mxu0 %v8397_v41 }
  0xc8   : > { %1120 = vrot.lane.b32.xlu0 %v8127_v0, %s7965_s20  ;;  %1667 = vmatprep.subr.bf16.mxu1 %v8399_v42 }
  0xc9   : > { %1668 = vmatpush1.bf16.msra.mxu1 %v8404_v36  ;;  %v711_v43 = vpop.permute.xlu1 %710  ;;  %v709_v44 = vpop.permute.xlu0 %708 }
  0xca   : > { %v740_v47 = vsel %vm728_vm1, %v703_v37, %v711_v43  ;;  %v739_v48 = vsel %vm728_vm1, %v701_v38, %v709_v44 }
  0xcb   : > { %v781_v49 = vmul.f32 %v755_v40, %v740_v47  ;;  %v777_v50 = vmul.f32 %v755_v40, %v739_v48  ;;  %1130 = vrot.lane.b32.xlu1 %v8143_v4, %s7965_s20 }
  0xcc   : > { %1128 = vrot.lane.b32.xlu0 %v8146_v5, %s7965_s20 }
  0xcd   : > { %v719_v51 = vpop.permute.xlu1 %718  ;;  %v717_v52 = vpop.permute.xlu0 %716  ;;  %v8418_v54 = vpack.c.bf16 %v781_v49, %v777_v50 }
  0xce   : > { %v736_v58 = vsel %vm728_vm1, %v711_v43, %v719_v51  ;;  %v735_v60 = vsel %vm728_vm1, %v709_v44, %v717_v52 }
  0xcf   : > { %11097 = vst [vmem:[#allocation17_spill] sm:$0xff] %v8418_v54  ;;  %1138 = vrot.lane.b32.xlu1 %v8149_v6, %s7965_s20  ;;  %1563 = vmatprep.subr.bf16.mxu0 %v8418_v54  ;;  %v782_v40 = vmul.f32 %v759_v53, %v736_v58  ;;  %v778_v61 = vmul.f32 %v759_v53, %v735_v60  ;;  %v6698_v53 = vld [vmem:[%s11090_s24 + $0x2] ss:$8 sm:$0xf] }
  0xd0   : > { %1136 = vrot.lane.b32.xlu0 %v8152_v7, %s7965_s20 }
  0xd1   : > { %v727_v16 = vpop.permute.xlu1 %726  ;;  %v725_v20 = vpop.permute.xlu0 %724 }
  0xd2   : > { %v732_v22 = vsel %vm728_vm1, %v719_v51, %v727_v16  ;;  %v744_v24 = vsel %vm728_vm1, %v727_v16, %v703_v37  ;;  %v731_v23 = vsel %vm728_vm1, %v717_v52, %v725_v20  ;;  %v743_v25 = vsel %vm728_vm1, %v725_v20, %v701_v38 }
  0xd3   : > { %v780_v26 = vmul.f32 %v751_v62, %v744_v24  ;;  %v783_v28 = vmul.f32 %v763_v63, %v732_v22  ;;  %v776_v29 = vmul.f32 %v751_v62, %v743_v25  ;;  %v779_v30 = vmul.f32 %v763_v63, %v731_v23  ;;  %1118 = vrot.lane.b32.xlu1 %v8157_v8, %s7965_s20 }
  0xd4   : > { %1116 = vrot.lane.b32.xlu0 %v8160_v9, %s7965_s20  ;;  %v8451_v62 = vpack.c.bf16 %v782_v40, %v778_v61  ;;  %v859_v63 = vrot.slane %v6698_v53, %v8247_v19  ;;  %v863_v51 = vrot.slane %v6698_v53, %v8261_v27  ;;  %v855_v16 = vrot.slane %v6698_v53, %v8270_v31 }
  0xd5   : > { %v803_v33 = vpop.permute.xlu1 %802  ;;  %v801_v34 = vpop.permute.xlu0 %800  ;;  %v8444_v37 = vpack.c.bf16 %v780_v26, %v776_v29  ;;  %v8446_v43 = vpack.c.bf16 %v783_v28, %v779_v30  ;;  %v867_v20 = vrot.slane %v6698_v53, %v8273_v32 }
  0xd6   : > { %11100 = vst [vmem:[#allocation20_spill] sm:$0xff] %v8451_v62 }
  0xd7   : > { %11098 = vst [vmem:[#allocation18_spill] sm:$0xff] %v8444_v37  ;;  %11099 = vst [vmem:[#allocation19_spill] sm:$0xff] %v8446_v43  ;;  %1126 = vrot.lane.b32.xlu1 %v8165_v10, %s7965_s20  ;;  %1564 = vmatpush1.bf16.msra.mxu0 %v8444_v37 }
  0xd8   : > { %1124 = vrot.lane.b32.xlu0 %v8168_v11, %s7965_s20  ;;  %1669 = vmatprep.subr.bf16.mxu1 %v8446_v43 }
  0xd9   : > { %1670 = vmatpush1.bf16.msra.mxu1 %v8451_v62  ;;  %v811_v38 = vpop.permute.xlu1 %810  ;;  %v809_v44 = vpop.permute.xlu0 %808 }
  0xda   : > { %v842_v47 = vsel %vm832_vm2, %v803_v33, %v811_v38  ;;  %v841_v48 = vsel %vm832_vm2, %v801_v34, %v809_v44 }
  0xdb   : > { %v877_v49 = vmul.f32 %v859_v63, %v842_v47  ;;  %v873_v50 = vmul.f32 %v859_v63, %v841_v48  ;;  %1134 = vrot.lane.b32.xlu1 %v8173_v12, %s7965_s20 }
  0xdc   : > { %1132 = vrot.lane.b32.xlu0 %v8176_v13, %s7965_s20 }
  0xdd   : > { %v819_v52 = vpop.permute.xlu1 %818  ;;  %v817_v58 = vpop.permute.xlu0 %816  ;;  %v8468_v60 = vpack.c.bf16 %v877_v49, %v873_v50 }
  0xde   : > { %v838_v40 = vsel %vm832_vm2, %v811_v38, %v819_v52  ;;  %v837_v61 = vsel %vm832_vm2, %v809_v44, %v817_v58 }
  0xdf   : > { %11101 = vst [vmem:[#allocation21_spill] sm:$0xff] %v8468_v60  ;;  %1142 = vrot.lane.b32.xlu1 %v8183_v14, %s7965_s20  ;;  %1565 = vmatprep.subr.bf16.mxu0 %v8468_v60  ;;  %v878_v22 = vmul.f32 %v863_v51, %v838_v40  ;;  %v874_v24 = vmul.f32 %v863_v51, %v837_v61 }
  0xe0   : > { %1140 = vrot.lane.b32.xlu0 %v8186_v15, %s7965_s20 }
  0xe1   : > { %v827_v23 = vpop.permute.xlu1 %826  ;;  %v825_v25 = vpop.permute.xlu0 %824 }
  0xe2   : > { %v834_v26 = vsel %vm832_vm2, %v819_v52, %v827_v23  ;;  %v846_v28 = vsel %vm832_vm2, %v827_v23, %v803_v33  ;;  %v833_v29 = vsel %vm832_vm2, %v817_v58, %v825_v25  ;;  %v845_v30 = vsel %vm832_vm2, %v825_v25, %v801_v34 }
  0xe3   : > { %v876_v53 = vmul.f32 %v855_v16, %v846_v28  ;;  %v879_v38 = vmul.f32 %v867_v20, %v834_v26  ;;  %v872_v44 = vmul.f32 %v855_v16, %v845_v30  ;;  %v875_v47 = vmul.f32 %v867_v20, %v833_v29  ;;  %1218 = vrot.lane.b32.xlu1 %v8138_v3, %s7966_s26 }
  0xe4   : > { %1216 = vrot.lane.b32.xlu0 %v8130_v1, %s7966_s26  ;;  %v8500_v34 = vpack.c.bf16 %v878_v22, %v874_v24 }
  0xe5   : > { %v807_v48 = vpop.permute.xlu1 %806  ;;  %v805_v49 = vpop.permute.xlu0 %804  ;;  %v8493_v33 = vpack.c.bf16 %v876_v53, %v872_v44  ;;  %v8495_v50 = vpack.c.bf16 %v879_v38, %v875_v47 }
  0xe6   : > { %11104 = vst [vmem:[#allocation24_spill] sm:$0xff] %v8500_v34 }
  0xe7   : > { %11102 = vst [vmem:[#allocation22_spill] sm:$0xff] %v8493_v33  ;;  %11103 = vst [vmem:[#allocation23_spill] sm:$0xff] %v8495_v50  ;;  %1226 = vrot.lane.b32.xlu1 %v8135_v2, %s7966_s26  ;;  %1566 = vmatpush1.bf16.msra.mxu0 %v8493_v33 }
  0xe8   : > { %1224 = vrot.lane.b32.xlu0 %v8127_v0, %s7966_s26  ;;  %1671 = vmatprep.subr.bf16.mxu1 %v8495_v50 }
  0xe9   : > { %1672 = vmatpush1.bf16.msra.mxu1 %v8500_v34  ;;  %v815_v52 = vpop.permute.xlu1 %814  ;;  %v813_v58 = vpop.permute.xlu0 %812 }
  0xea   : > { %v844_v40 = vsel %vm832_vm2, %v807_v48, %v815_v52  ;;  %v843_v61 = vsel %vm832_vm2, %v805_v49, %v813_v58 }
  0xeb   : > { %v885_v23 = vmul.f32 %v859_v63, %v844_v40  ;;  %v881_v25 = vmul.f32 %v859_v63, %v843_v61  ;;  %1234 = vrot.lane.b32.xlu1 %v8143_v4, %s7966_s26 }
  0xec   : > { %1232 = vrot.lane.b32.xlu0 %v8146_v5, %s7966_s26 }
  0xed   : > { %v823_v22 = vpop.permute.xlu1 %822  ;;  %v821_v24 = vpop.permute.xlu0 %820  ;;  %v8514_v26 = vpack.c.bf16 %v885_v23, %v881_v25 }
  0xee   : > { %v840_v28 = vsel %vm832_vm2, %v815_v52, %v823_v22  ;;  %v839_v29 = vsel %vm832_vm2, %v813_v58, %v821_v24 }
  0xef   : > { %11105 = vst [vmem:[#allocation25_spill] sm:$0xff] %v8514_v26  ;;  %1242 = vrot.lane.b32.xlu1 %v8149_v6, %s7966_s26  ;;  %1567 = vmatprep.subr.bf16.mxu0 %v8514_v26  ;;  %v886_v63 = vmul.f32 %v863_v51, %v840_v28  ;;  %v882_v30 = vmul.f32 %v863_v51, %v839_v29  ;;  %v6699_v51 = vld [vmem:[%s11090_s24 + $0x3] ss:$8 sm:$0xf] }
  0xf0   : > { %1240 = vrot.lane.b32.xlu0 %v8152_v7, %s7966_s26 }
  0xf1   : > { %v831_v53 = vpop.permute.xlu1 %830  ;;  %v829_v38 = vpop.permute.xlu0 %828 }
  0xf2   : > { %v836_v44 = vsel %vm832_vm2, %v823_v22, %v831_v53  ;;  %v848_v47 = vsel %vm832_vm2, %v831_v53, %v807_v48  ;;  %v835_v52 = vsel %vm832_vm2, %v821_v24, %v829_v38  ;;  %v847_v58 = vsel %vm832_vm2, %v829_v38, %v805_v49 }
  0xf3   : > { %v884_v40 = vmul.f32 %v855_v16, %v848_v47  ;;  %v887_v61 = vmul.f32 %v867_v20, %v836_v44  ;;  %v880_v23 = vmul.f32 %v855_v16, %v847_v58  ;;  %v883_v25 = vmul.f32 %v867_v20, %v835_v52  ;;  %1222 = vrot.lane.b32.xlu1 %v8157_v8, %s7966_s26 }
  0xf4   : > { %1220 = vrot.lane.b32.xlu0 %v8160_v9, %s7966_s26  ;;  %v8547_v16 = vpack.c.bf16 %v886_v63, %v882_v30  ;;  %v963_v20 = vrot.slane %v6699_v51, %v8247_v19  ;;  %v967_v44 = vrot.slane %v6699_v51, %v8261_v27 }
  0xf5   : > { %v907_v48 = vpop.permute.xlu1 %906  ;;  %v905_v22 = vpop.permute.xlu0 %904  ;;  %v8540_v24 = vpack.c.bf16 %v884_v40, %v880_v23  ;;  %v8542_v28 = vpack.c.bf16 %v887_v61, %v883_v25  ;;  %v959_v23 = vrot.slane %v6699_v51, %v8270_v31  ;;  %v971_v25 = vrot.slane %v6699_v51, %v8273_v32  ;;  %v7766_v51 = vld [vmem:[%s10930_s4 + $0x4] ss:$12 sps:$4 sm:$0xff]  }
  0xf6   : > { %11108 = vst [vmem:[#allocation28_spill] sm:$0xff] %v8547_v16  ;;  %1589 = vmatprep.mubr.bf16.mxu0 %v7766_v51  ;;  %1695 = vmatprep.mubr.bf16.mxu1 %v7766_v51 }
  0xf7   : > { %11106 = vst [vmem:[#allocation26_spill] sm:$0xff] %v8540_v24  ;;  %11107 = vst [vmem:[#allocation27_spill] sm:$0xff] %v8542_v28  ;;  %1230 = vrot.lane.b32.xlu1 %v8165_v10, %s7966_s26  ;;  %1568 = vmatpush1.bf16.msra.mxu0 %v8540_v24 }
  0xf8   : > { %1228 = vrot.lane.b32.xlu0 %v8168_v11, %s7966_s26  ;;  %1673 = vmatprep.subr.bf16.mxu1 %v8542_v28 }
  0xf9   : > { %1674 = vmatpush1.bf16.msra.mxu1 %v8547_v16  ;;  %v915_v49 = vpop.permute.xlu1 %914  ;;  %v913_v29 = vpop.permute.xlu0 %912 }
  0xfa   : > { %v946_v53 = vsel %vm936_vm3, %v907_v48, %v915_v49  ;;  %v945_v63 = vsel %vm936_vm3, %v905_v22, %v913_v29 }
  0xfb   : > { %v981_v30 = vmul.f32 %v963_v20, %v946_v53  ;;  %v977_v38 = vmul.f32 %v963_v20, %v945_v63  ;;  %1238 = vrot.lane.b32.xlu1 %v8173_v12, %s7966_s26 }
  0xfc   : > { %1236 = vrot.lane.b32.xlu0 %v8176_v13, %s7966_s26 }
  0xfd   : > { %v923_v47 = vpop.permute.xlu1 %922  ;;  %v921_v52 = vpop.permute.xlu0 %920  ;;  %v8564_v58 = vpack.c.bf16 %v981_v30, %v977_v38 }
  0xfe   : > { %v942_v40 = vsel %vm936_vm3, %v915_v49, %v923_v47  ;;  %v941_v61 = vsel %vm936_vm3, %v913_v29, %v921_v52 }
  0xff   : > { %11109 = vst [vmem:[#allocation29_spill] sm:$0xff] %v8564_v58  ;;  %1246 = vrot.lane.b32.xlu1 %v8183_v14, %s7966_s26  ;;  %1569 = vmatprep.subr.bf16.mxu0 %v8564_v58  ;;  %v982_v53 = vmul.f32 %v967_v44, %v942_v40  ;;  %v978_v63 = vmul.f32 %v967_v44, %v941_v61 }
 0x100   : > { %1244 = vrot.lane.b32.xlu0 %v8186_v15, %s7966_s26  ;;  %s7967_s26 = smov 111  }
 0x101   : > { %v931_v30 = vpop.permute.xlu1 %930  ;;  %v929_v38 = vpop.permute.xlu0 %928 }
 0x102   : > { %v938_v49 = vsel %vm936_vm3, %v923_v47, %v931_v30  ;;  %v950_v29 = vsel %vm936_vm3, %v931_v30, %v907_v48  ;;  %v937_v58 = vsel %vm936_vm3, %v921_v52, %v929_v38  ;;  %v949_v16 = vsel %vm936_vm3, %v929_v38, %v905_v22 }
 0x103   : > { %v980_v40 = vmul.f32 %v959_v23, %v950_v29  ;;  %v983_v61 = vmul.f32 %v971_v25, %v938_v49  ;;  %v976_v24 = vmul.f32 %v959_v23, %v949_v16  ;;  %v979_v28 = vmul.f32 %v971_v25, %v937_v58  ;;  %1322 = vrot.lane.b32.xlu1 %v8138_v3, %s7967_s26 }
 0x104   : > { %1320 = vrot.lane.b32.xlu0 %v8130_v1, %s7967_s26  ;;  %v8599_v16 = vpack.c.bf16 %v982_v53, %v978_v63 }
 0x105   : > { %v911_v48 = vpop.permute.xlu1 %910  ;;  %v909_v47 = vpop.permute.xlu0 %908  ;;  %v8592_v52 = vpack.c.bf16 %v980_v40, %v976_v24  ;;  %v8594_v22 = vpack.c.bf16 %v983_v61, %v979_v28 }
 0x106   : > { %11112 = vst [vmem:[#allocation32_spill] sm:$0xff] %v8599_v16 }
 0x107   : > { %11110 = vst [vmem:[#allocation30_spill] sm:$0xff] %v8592_v52  ;;  %11111 = vst [vmem:[#allocation31_spill] sm:$0xff] %v8594_v22  ;;  %1330 = vrot.lane.b32.xlu1 %v8135_v2, %s7967_s26  ;;  %1570 = vmatpush1.bf16.msra.mxu0 %v8592_v52 }
 0x108   : > { %1328 = vrot.lane.b32.xlu0 %v8127_v0, %s7967_s26  ;;  %1675 = vmatprep.subr.bf16.mxu1 %v8594_v22 }
 0x109   : > { %1676 = vmatpush1.bf16.msra.mxu1 %v8599_v16  ;;  %v919_v58 = vpop.permute.xlu1 %918  ;;  %v917_v24 = vpop.permute.xlu0 %916 }
 0x10a   : > { %v948_v28 = vsel %vm936_vm3, %v911_v48, %v919_v58  ;;  %v947_v30 = vsel %vm936_vm3, %v909_v47, %v917_v24 }
 0x10b   : > { %v989_v38 = vmul.f32 %v963_v20, %v948_v28  ;;  %v985_v49 = vmul.f32 %v963_v20, %v947_v30  ;;  %1338 = vrot.lane.b32.xlu1 %v8143_v4, %s7967_s26 }
 0x10c   : > { %1336 = vrot.lane.b32.xlu0 %v8146_v5, %s7967_s26 }
 0x10d   : > { %v927_v53 = vpop.permute.xlu1 %926  ;;  %v925_v63 = vpop.permute.xlu0 %924  ;;  %v8613_v29 = vpack.c.bf16 %v989_v38, %v985_v49 }
 0x10e   : > { %v944_v51 = vsel %vm936_vm3, %v919_v58, %v927_v53  ;;  %v943_v40 = vsel %vm936_vm3, %v917_v24, %v925_v63 }
 0x10f   : > { %11113 = vst [vmem:[#allocation33_spill] sm:$0xff] %v8613_v29  ;;  %1346 = vrot.lane.b32.xlu1 %v8149_v6, %s7967_s26  ;;  %1571 = vmatprep.subr.bf16.mxu0 %v8613_v29  ;;  %v990_v20 = vmul.f32 %v967_v44, %v944_v51  ;;  %v986_v61 = vmul.f32 %v967_v44, %v943_v40 }
 0x110   : > { %1344 = vrot.lane.b32.xlu0 %v8152_v7, %s7967_s26 }
 0x111   : > { %v935_v28 = vpop.permute.xlu1 %934  ;;  %v933_v30 = vpop.permute.xlu0 %932 }
 0x112   : > { %v940_v38 = vsel %vm936_vm3, %v927_v53, %v935_v28  ;;  %v952_v58 = vsel %vm936_vm3, %v935_v28, %v911_v48  ;;  %v939_v24 = vsel %vm936_vm3, %v925_v63, %v933_v30  ;;  %v951_v49 = vsel %vm936_vm3, %v933_v30, %v909_v47 }
 0x113   : > { %v988_v29 = vmul.f32 %v959_v23, %v952_v58  ;;  %v991_v16 = vmul.f32 %v971_v25, %v940_v38  ;;  %v984_v52 = vmul.f32 %v959_v23, %v951_v49  ;;  %v987_v22 = vmul.f32 %v971_v25, %v939_v24  ;;  %1326 = vrot.lane.b32.xlu1 %v8157_v8, %s7967_s26  ;;  %v6700_v23 = vld [vmem:[%s11090_s24 + $0x5] ss:$8 sm:$0xf] }
 0x114   : > { %1324 = vrot.lane.b32.xlu0 %v8160_v9, %s7967_s26  ;;  %v8642_v63 = vpack.c.bf16 %v8135_v2, %v8127_v0  ;;  %v8649_v25 = vpack.c.bf16 %v8149_v6, %v8152_v7  ;;  %v8654_v47 = vpack.c.bf16 %v990_v20, %v986_v61  ;;  %v8659_v0 = vpack.c.bf16 %v8138_v3, %v8130_v1 }
 0x115   : > { %v1011_v44 = vpop.permute.xlu1 %1010  ;;  %v1009_v53 = vpop.permute.xlu0 %1008  ;;  %v8636_v51 = vpack.c.bf16 %v988_v29, %v984_v52  ;;  %v8638_v48 = vpack.c.bf16 %v991_v16, %v987_v22  ;;  %v8666_v2 = vpack.c.bf16 %v8165_v10, %v8168_v11  ;;  %v1063_v6 = vrot.slane %v6700_v23, %v8270_v31 }
 0x116   : > { %11116 = vst [vmem:[#allocation36_spill] sm:$0xff] %v8649_v25  ;;  %11117 = vst [vmem:[#allocation37_spill] sm:$0xff] %v8654_v47  ;;  %v8673_v1 = vpack.c.bf16 %v8143_v4, %v8146_v5  ;;  %v1067_v4 = vrot.slane %v6700_v23, %v8247_v19  ;;  %v8691_v5 = vpack.c.bf16 %v8157_v8, %v8160_v9 }
 0x117   : > { %11114 = vst [vmem:[#allocation34_spill] sm:$0xff] %v8636_v51  ;;  %11115 = vst [vmem:[#allocation35_spill] sm:$0xff] %v8638_v48  ;;  %1334 = vrot.lane.b32.xlu1 %v8165_v10, %s7967_s26  ;;  %1572 = vmatpush1.bf16.msra.mxu0 %v8636_v51  ;;  %v8682_v10 = vpack.c.bf16 %v8183_v14, %v8186_v15  ;;  %v8699_v61 = vpack.c.bf16 %v8173_v12, %v8176_v13 }
 0x118   : > { %11118 = vst [vmem:[#allocation38_spill] sm:$0xff] %v8659_v0  ;;  %1332 = vrot.lane.b32.xlu0 %v8168_v11, %s7967_s26  ;;  %1677 = vmatprep.subr.bf16.mxu1 %v8638_v48  ;;  %11119 = vst [vmem:[#allocation39_spill] sm:$0xff] %v8666_v2  ;;  %v10955_v11 = vmov 0   ;;  %v1071_v28 = vrot.slane %v6700_v23, %v8261_v27 }
 0x119   : > { %1678 = vmatpush1.bf16.msra.mxu1 %v8654_v47  ;;  %v1019_v7 = vpop.permute.xlu1 %1018  ;;  %v1017_v52 = vpop.permute.xlu0 %1016  ;;  %1573 = vmatprep.subr.bf16.mxu0 %v8642_v63  ;;  %11120 = vst [vmem:[#allocation40_spill] sm:$0xff] %v8673_v1  ;;  %11121 = vst [vmem:[#allocation41_spill] sm:$0xff] %v8682_v10 }
 0x11a   : > { %v1050_v3 = vsel %vm1040_vm4, %v1011_v44, %v1019_v7  ;;  %v1049_v22 = vsel %vm1040_vm4, %v1009_v53, %v1017_v52  ;;  %1679 = vmatprep.subr.bf16.mxu1 %v8649_v25  ;;  %7762 = vset.pattern.permute.xlu0 %v10955_v11  ;;  %11122 = vst [vmem:[#allocation42_spill] sm:$0xff] %v8691_v5  ;;  %11123 = vst [vmem:[#allocation43_spill] sm:$0xff] %v8699_v61 }
 0x11b   : > { %1342 = vrot.lane.b32.xlu1 %v8173_v12, %s7967_s26  ;;  %1574 = vmatpush1.bf16.msra.mxu0 %v8659_v0  ;;  %v1084_v16 = vmul.f32 %v1063_v6, %v1050_v3  ;;  %v1080_v29 = vmul.f32 %v1063_v6, %v1049_v22  ;;  %v1075_v12 = vrot.slane %v6700_v23, %v8273_v32 }
 0x11c   : > { %1340 = vrot.lane.b32.xlu0 %v8176_v13, %s7967_s26  ;;  %1575 = vmatprep.subr.bf16.mxu0 %v8666_v2 }
 0x11d   : > { %v1027_v40 = vpop.permute.xlu1 %1026  ;;  %v1025_v20 = vpop.permute.xlu0 %1024  ;;  %1680 = vmatpush1.bf16.msra.mxu1 %v8673_v1  ;;  %7763 = vset.pattern.permute.xlu1 %v10955_v11  ;;  %v8716_v49 = vpack.c.bf16 %v1084_v16, %v1080_v29 }
 0x11e   : > { %v1046_v8 = vsel %vm1040_vm4, %v1019_v7, %v1027_v40  ;;  %v1045_v9 = vsel %vm1040_vm4, %v1017_v52, %v1025_v20  ;;  %1681 = vmatprep.subr.bf16.mxu1 %v8682_v10 }
 0x11f   : > { %v1085_v30 = vmul.f32 %v1067_v4, %v1046_v8  ;;  %v1081_v38 = vmul.f32 %v1067_v4, %v1045_v9  ;;  %1350 = vrot.lane.b32.xlu1 %v8183_v14, %s7967_s26  ;;  %1576 = vmatpush1.bf16.msra.mxu0 %v8691_v5  ;;  %11125 = vst [vmem:[#allocation45_spill] sm:$0xff] %v8716_v49 }
 0x120   : > { %1348 = vrot.lane.b32.xlu0 %v8186_v15, %s7967_s26  ;;  %s11153_s26 = sld [smem:[#allocation135_spill]] }
 0x121   : > { %v1035_v13 = vpop.permute.xlu1 %1034  ;;  %v1033_v58 = vpop.permute.xlu0 %1032  ;;  %v8714_v24 = vpack.c.bf16 %v1085_v30, %v1081_v38  ;;  %1682 = vmatpush1.bf16.msra.mxu1 %v8699_v61 }
 0x122   : > { %v1042_v7 = vsel %vm1040_vm4, %v1027_v40, %v1035_v13  ;;  %v1054_v14 = vsel %vm1040_vm4, %v1035_v13, %v1011_v44  ;;  %v1041_v23 = vsel %vm1040_vm4, %v1025_v20, %v1033_v58  ;;  %v1053_v15 = vsel %vm1040_vm4, %v1033_v58, %v1009_v53 }
 0x123   : > { %11124 = vst [vmem:[#allocation44_spill] sm:$0xff] %v8714_v24  ;;  %v1086_v52 = vmul.f32 %v1071_v28, %v1042_v7  ;;  %v1087_v3 = vmul.f32 %v1075_v12, %v1054_v14  ;;  %v1082_v22 = vmul.f32 %v1071_v28, %v1041_v23  ;;  %v1083_v8 = vmul.f32 %v1075_v12, %v1053_v15 }
 0x124   : > { %1577 = vmatprep.subr.bf16.mxu0 %v8714_v24 }
 0x125   : > { %1578 = vmatpush1.bf16.msra.mxu0 %v8716_v49  ;;  %v1015_v16 = vpop.permute.xlu1 %1014  ;;  %v8729_v29 = vpack.c.bf16 %v1087_v3, %v1083_v8  ;;  %v8731_v40 = vpack.c.bf16 %v1086_v52, %v1082_v22 }
 0x126   : > { %v1013_v44 = vpop.permute.xlu0 %1012  ;;  %v1835_v51 = vld [vmem:[%s11153_s26 + $0x150] sm:$0xff]  ;;  %v1836_v48 = vld [vmem:[%s11153_s26 + $0x158] sm:$0xff] }
 0x127   : > { %11126 = vst [vmem:[#allocation46_spill] sm:$0xff] %v8729_v29  ;;  %11127 = vst [vmem:[#allocation47_spill] sm:$0xff] %v8731_v40  ;;  %1683 = vmatprep.subr.bf16.mxu1 %v8729_v29  ;;  %v1833_v29 = vld [vmem:[%s11153_s26 + $0x140] sm:$0xff] }
 0x128   : > { %1684 = vmatpush1.bf16.msra.mxu1 %v8731_v40 }
 0x129   : > { %v1023_v20 = vpop.permute.xlu1 %1022 }
 0x12a   : > { %v1021_v53 = vpop.permute.xlu0 %1020  ;;  %v1052_v9 = vsel %vm1040_vm4, %v1015_v16, %v1023_v20 }
 0x12b   : > { %v1051_v30 = vsel %vm1040_vm4, %v1013_v44, %v1021_v53  ;;  %v1092_v13 = vmul.f32 %v1063_v6, %v1052_v9 }
 0x12c   : > { %v1088_v58 = vmul.f32 %v1063_v6, %v1051_v30 }
 0x12d   : > { %v1031_v38 = vpop.permute.xlu1 %1030 }
 0x12e   : > { %v1048_v7 = vsel %vm1040_vm4, %v1023_v20, %v1031_v38  ;;  %v1029_v14 = vpop.permute.xlu0 %1028  ;;  %v8749_v6 = vpack.c.bf16 %v1092_v13, %v1088_v58  ;;  %v6701_v58 = vld [vmem:[%s11090_s24 + $0x6] ss:$8 sm:$0xf] }
 0x12f   : > { %v1093_v23 = vmul.f32 %v1067_v4, %v1048_v7  ;;  %v1047_v15 = vsel %vm1040_vm4, %v1021_v53, %v1029_v14 }
 0x130   : > { %v1089_v52 = vmul.f32 %v1067_v4, %v1047_v15  ;;  %11129 = vst [vmem:[#allocation49_spill] sm:$0xff] %v8749_v6  ;;  %v1171_v15 = vrot.slane %v6701_v58, %v8247_v19 }
 0x131   : > { %v1039_v3 = vpop.permute.xlu1 %1038 }
 0x132   : > { %v1044_v22 = vsel %vm1040_vm4, %v1031_v38, %v1039_v3  ;;  %v1056_v8 = vsel %vm1040_vm4, %v1039_v3, %v1015_v16  ;;  %v1037_v11 = vpop.permute.xlu0 %1036  ;;  %v8747_v40 = vpack.c.bf16 %v1093_v23, %v1089_v52 }
 0x133   : > { %v1094_v9 = vmul.f32 %v1071_v28, %v1044_v22  ;;  %v1095_v20 = vmul.f32 %v1075_v12, %v1056_v8  ;;  %v1043_v30 = vsel %vm1040_vm4, %v1029_v14, %v1037_v11  ;;  %v1055_v4 = vsel %vm1040_vm4, %v1037_v11, %v1013_v44 }
 0x134   : > { %11128 = vst [vmem:[#allocation48_spill] sm:$0xff] %v8747_v40  ;;  %v1090_v53 = vmul.f32 %v1071_v28, %v1043_v30  ;;  %v1091_v7 = vmul.f32 %v1075_v12, %v1055_v4  ;;  %1579 = vmatprep.subr.bf16.mxu0 %v8747_v40  ;;  %v1167_v28 = vrot.slane %v6701_v58, %v8270_v31 }
 0x135   : > { %1580 = vmatpush1.bf16.msra.mxu0 %v8749_v6  ;;  %v1115_v16 = vpop.permute.xlu1 %1114  ;;  %v1175_v4 = vrot.slane %v6701_v58, %v8261_v27 }
 0x136   : > { %v1113_v38 = vpop.permute.xlu0 %1112  ;;  %v8757_v23 = vpack.c.bf16 %v1095_v20, %v1091_v7  ;;  %v8759_v13 = vpack.c.bf16 %v1094_v9, %v1090_v53  ;;  %v1179_v53 = vrot.slane %v6701_v58, %v8273_v32 }
 0x138   : > { %11130 = vst [vmem:[#allocation50_spill] sm:$0xff] %v8757_v23  ;;  %11131 = vst [vmem:[#allocation51_spill] sm:$0xff] %v8759_v13  ;;  %1685 = vmatprep.subr.bf16.mxu1 %v8757_v23 }
 0x139   : > { %1686 = vmatpush1.bf16.msra.mxu1 %v8759_v13  ;;  %v1123_v11 = vpop.permute.xlu1 %1122 }
 0x13a   : > { %v1121_v12 = vpop.permute.xlu0 %1120  ;;  %v1154_v44 = vsel %vm1144_vm5, %v1115_v16, %v1123_v11 }
 0x13b   : > { %v1153_v14 = vsel %vm1144_vm5, %v1113_v38, %v1121_v12  ;;  %v1188_v3 = vmul.f32 %v1167_v28, %v1154_v44 }
 0x13c   : > { %v1184_v22 = vmul.f32 %v1167_v28, %v1153_v14 }
 0x13d   : > { %v1131_v52 = vpop.permute.xlu1 %1130 }
 0x13e   : > { %v1150_v8 = vsel %vm1144_vm5, %v1123_v11, %v1131_v52  ;;  %v1129_v9 = vpop.permute.xlu0 %1128  ;;  %v8785_v11 = vpack.c.bf16 %v1188_v3, %v1184_v22 }
 0x13f   : > { %v1189_v20 = vmul.f32 %v1171_v15, %v1150_v8  ;;  %v1149_v30 = vsel %vm1144_vm5, %v1121_v12, %v1129_v9 }
 0x140   : > { %v1185_v7 = vmul.f32 %v1171_v15, %v1149_v30  ;;  %11133 = vst [vmem:[#allocation53_spill] sm:$0xff] %v8785_v11 }
 0x141   : > { %v1139_v13 = vpop.permute.xlu1 %1138 }
 0x142   : > { %v1146_v6 = vsel %vm1144_vm5, %v1131_v52, %v1139_v13  ;;  %v1158_v44 = vsel %vm1144_vm5, %v1139_v13, %v1115_v16  ;;  %v1137_v14 = vpop.permute.xlu0 %1136  ;;  %v8783_v23 = vpack.c.bf16 %v1189_v20, %v1185_v7 }
 0x143   : > { %v1190_v8 = vmul.f32 %v1175_v4, %v1146_v6  ;;  %v1191_v40 = vmul.f32 %v1179_v53, %v1158_v44  ;;  %v1145_v12 = vsel %vm1144_vm5, %v1129_v9, %v1137_v14  ;;  %v1157_v58 = vsel %vm1144_vm5, %v1137_v14, %v1113_v38 }
 0x144   : > { %11132 = vst [vmem:[#allocation52_spill] sm:$0xff] %v8783_v23  ;;  %v1186_v30 = vmul.f32 %v1175_v4, %v1145_v12  ;;  %v1187_v49 = vmul.f32 %v1179_v53, %v1157_v58  ;;  %1581 = vmatprep.subr.bf16.mxu0 %v8783_v23 }
 0x145   : > { %1582 = vmatpush1.bf16.msra.mxu0 %v8785_v11  ;;  %v1119_v16 = vpop.permute.xlu1 %1118 }
 0x146   : > { %v1117_v13 = vpop.permute.xlu0 %1116  ;;  %v8793_v52 = vpack.c.bf16 %v1191_v40, %v1187_v49  ;;  %v8795_v3 = vpack.c.bf16 %v1190_v8, %v1186_v30 }
 0x148   : > { %11134 = vst [vmem:[#allocation54_spill] sm:$0xff] %v8793_v52  ;;  %11135 = vst [vmem:[#allocation55_spill] sm:$0xff] %v8795_v3  ;;  %1687 = vmatprep.subr.bf16.mxu1 %v8793_v52 }
 0x149   : > { %1688 = vmatpush1.bf16.msra.mxu1 %v8795_v3  ;;  %v1127_v6 = vpop.permute.xlu1 %1126 }
 0x14a   : > { %v1125_v22 = vpop.permute.xlu0 %1124  ;;  %v1156_v38 = vsel %vm1144_vm5, %v1119_v16, %v1127_v6 }
 0x14b   : > { %v1155_v9 = vsel %vm1144_vm5, %v1117_v13, %v1125_v22  ;;  %v1196_v7 = vmul.f32 %v1167_v28, %v1156_v38 }
 0x14c   : > { %v1192_v44 = vmul.f32 %v1167_v28, %v1155_v9 }
 0x14d   : > { %v1135_v20 = vpop.permute.xlu1 %1134 }
 0x14e   : > { %v1152_v49 = vsel %vm1144_vm5, %v1127_v6, %v1135_v20  ;;  %v1133_v40 = vpop.permute.xlu0 %1132  ;;  %v8813_v28 = vpack.c.bf16 %v1196_v7, %v1192_v44 }
 0x14f   : > { %v1197_v14 = vmul.f32 %v1171_v15, %v1152_v49  ;;  %v1151_v8 = vsel %vm1144_vm5, %v1125_v22, %v1133_v40 }
 0x150   : > { %v1193_v12 = vmul.f32 %v1171_v15, %v1151_v8  ;;  %11137 = vst [vmem:[#allocation57_spill] sm:$0xff] %v8813_v28 }
 0x151   : > { %v1143_v58 = vpop.permute.xlu1 %1142 }
 0x152   : > { %v1148_v30 = vsel %vm1144_vm5, %v1135_v20, %v1143_v58  ;;  %v1160_v3 = vsel %vm1144_vm5, %v1143_v58, %v1119_v16  ;;  %v1141_v11 = vpop.permute.xlu0 %1140  ;;  %v8811_v52 = vpack.c.bf16 %v1197_v14, %v1193_v12 }
 0x153   : > { %v1198_v38 = vmul.f32 %v1175_v4, %v1148_v30  ;;  %v1199_v6 = vmul.f32 %v1179_v53, %v1160_v3  ;;  %v1147_v9 = vsel %vm1144_vm5, %v1133_v40, %v1141_v11  ;;  %v1159_v15 = vsel %vm1144_vm5, %v1141_v11, %v1117_v13  ;;  %v6702_v3 = vld [vmem:[%s11090_s24 + $0x7] ss:$8 sm:$0xf] }
 0x154   : > { %11136 = vst [vmem:[#allocation56_spill] sm:$0xff] %v8811_v52  ;;  %v1194_v22 = vmul.f32 %v1175_v4, %v1147_v9  ;;  %v1195_v49 = vmul.f32 %v1179_v53, %v1159_v15  ;;  %1583 = vmatprep.subr.bf16.mxu0 %v8811_v52  ;;  %v1271_v53 = vrot.slane %v6702_v3, %v8270_v31 }
 0x155   : > { %1584 = vmatpush1.bf16.msra.mxu0 %v8813_v28  ;;  %v1219_v16 = vpop.permute.xlu1 %1218  ;;  %v1275_v40 = vrot.slane %v6702_v3, %v8247_v19  ;;  %v1279_v15 = vrot.slane %v6702_v3, %v8261_v27 }
 0x156   : > { %v1217_v20 = vpop.permute.xlu0 %1216  ;;  %v8821_v14 = vpack.c.bf16 %v1199_v6, %v1195_v49  ;;  %v8823_v7 = vpack.c.bf16 %v1198_v38, %v1194_v22  ;;  %v1283_v22 = vrot.slane %v6702_v3, %v8273_v32 }
 0x158   : > { %11138 = vst [vmem:[#allocation58_spill] sm:$0xff] %v8821_v14  ;;  %11139 = vst [vmem:[#allocation59_spill] sm:$0xff] %v8823_v7  ;;  %1689 = vmatprep.subr.bf16.mxu1 %v8821_v14 }
 0x159   : > { %1690 = vmatpush1.bf16.msra.mxu1 %v8823_v7  ;;  %v1227_v4 = vpop.permute.xlu1 %1226 }
 0x15a   : > { %v1225_v11 = vpop.permute.xlu0 %1224  ;;  %v1258_v13 = vsel %vm1248_vm6, %v1219_v16, %v1227_v4 }
 0x15b   : > { %v1257_v44 = vsel %vm1248_vm6, %v1217_v20, %v1225_v11  ;;  %v1292_v12 = vmul.f32 %v1271_v53, %v1258_v13 }
 0x15c   : > { %v1288_v58 = vmul.f32 %v1271_v53, %v1257_v44 }
 0x15d   : > { %v1235_v8 = vpop.permute.xlu1 %1234 }
 0x15e   : > { %v1254_v30 = vsel %vm1248_vm6, %v1227_v4, %v1235_v8  ;;  %v1233_v38 = vpop.permute.xlu0 %1232  ;;  %v8849_v4 = vpack.c.bf16 %v1292_v12, %v1288_v58 }
 0x15f   : > { %v1293_v6 = vmul.f32 %v1275_v40, %v1254_v30  ;;  %v1253_v9 = vsel %vm1248_vm6, %v1225_v11, %v1233_v38 }
 0x160   : > { %v1289_v49 = vmul.f32 %v1275_v40, %v1253_v9  ;;  %11141 = vst [vmem:[#allocation61_spill] sm:$0xff] %v8849_v4 }
 0x161   : > { %v1243_v7 = vpop.permute.xlu1 %1242 }
 0x162   : > { %v1250_v28 = vsel %vm1248_vm6, %v1235_v8, %v1243_v7  ;;  %v1262_v13 = vsel %vm1248_vm6, %v1243_v7, %v1219_v16  ;;  %v1241_v44 = vpop.permute.xlu0 %1240  ;;  %v8847_v14 = vpack.c.bf16 %v1293_v6, %v1289_v49 }
 0x163   : > { %v1294_v30 = vmul.f32 %v1279_v15, %v1250_v28  ;;  %v1295_v52 = vmul.f32 %v1283_v22, %v1262_v13  ;;  %v1249_v11 = vsel %vm1248_vm6, %v1233_v38, %v1241_v44  ;;  %v1261_v3 = vsel %vm1248_vm6, %v1241_v44, %v1217_v20 }
 0x164   : > { %11140 = vst [vmem:[#allocation60_spill] sm:$0xff] %v8847_v14  ;;  %v1290_v9 = vmul.f32 %v1279_v15, %v1249_v11  ;;  %v1291_v23 = vmul.f32 %v1283_v22, %v1261_v3  ;;  %1585 = vmatprep.subr.bf16.mxu0 %v8847_v14 }
 0x165   : > { %1586 = vmatpush1.bf16.msra.mxu0 %v8849_v4  ;;  %v1223_v16 = vpop.permute.xlu1 %1222 }
 0x166   : > { %v1221_v7 = vpop.permute.xlu0 %1220  ;;  %v8857_v8 = vpack.c.bf16 %v1295_v52, %v1291_v23  ;;  %v8859_v12 = vpack.c.bf16 %v1294_v30, %v1290_v9 }
 0x168   : > { %11142 = vst [vmem:[#allocation62_spill] sm:$0xff] %v8857_v8  ;;  %11143 = vst [vmem:[#allocation63_spill] sm:$0xff] %v8859_v12  ;;  %1691 = vmatprep.subr.bf16.mxu1 %v8857_v8 }
 0x169   : > { %1692 = vmatpush1.bf16.msra.mxu1 %v8859_v12  ;;  %v1231_v28 = vpop.permute.xlu1 %1230 }
 0x16a   : > { %v1229_v58 = vpop.permute.xlu0 %1228  ;;  %v1260_v20 = vsel %vm1248_vm6, %v1223_v16, %v1231_v28 }
 0x16b   : > { %v1259_v38 = vsel %vm1248_vm6, %v1221_v7, %v1229_v58  ;;  %v1300_v49 = vmul.f32 %v1271_v53, %v1260_v20 }
 0x16c   : > { %v1296_v13 = vmul.f32 %v1271_v53, %v1259_v38 }
 0x16d   : > { %v1239_v6 = vpop.permute.xlu1 %1238 }
 0x16e   : > { %v1256_v23 = vsel %vm1248_vm6, %v1231_v28, %v1239_v6  ;;  %v1237_v52 = vpop.permute.xlu0 %1236  ;;  %v8877_v53 = vpack.c.bf16 %v1300_v49, %v1296_v13 }
 0x16f   : > { %v1301_v44 = vmul.f32 %v1275_v40, %v1256_v23  ;;  %v1255_v30 = vsel %vm1248_vm6, %v1229_v58, %v1237_v52 }
 0x170   : > { %v1297_v11 = vmul.f32 %v1275_v40, %v1255_v30  ;;  %11145 = vst [vmem:[#allocation65_spill] sm:$0xff] %v8877_v53 }
 0x171   : > { %v1247_v3 = vpop.permute.xlu1 %1246 }
 0x172   : > { %v1252_v9 = vsel %vm1248_vm6, %v1239_v6, %v1247_v3  ;;  %v1264_v12 = vsel %vm1248_vm6, %v1247_v3, %v1223_v16  ;;  %v1245_v4 = vpop.permute.xlu0 %1244  ;;  %v8875_v8 = vpack.c.bf16 %v1301_v44, %v1297_v11  ;;  %v7764_v16 = vld [vmem:[%s10930_s4] ss:$12 sps:$4 sm:$0xff]   ;;  %v7769_v3 = vld [vmem:[%s10930_s4 + $0x18] ss:$12 sps:$4 sm:$0xff]  }
 0x173   : > { %v1302_v20 = vmul.f32 %v1279_v15, %v1252_v9  ;;  %v1303_v28 = vmul.f32 %v1283_v22, %v1264_v12  ;;  %v1251_v38 = vsel %vm1248_vm6, %v1237_v52, %v1245_v4  ;;  %v1263_v40 = vsel %vm1248_vm6, %v1245_v4, %v1221_v7  ;;  %v7767_v12 = vld [vmem:[%s10930_s4 + $0x1c] ss:$12 sps:$4 sm:$0xff]  }
 0x174   : > { %11144 = vst [vmem:[#allocation64_spill] sm:$0xff] %v8875_v8  ;;  %v1298_v58 = vmul.f32 %v1279_v15, %v1251_v38  ;;  %v1299_v23 = vmul.f32 %v1283_v22, %v1263_v40  ;;  %1587 = vmatprep.subr.bf16.mxu0 %v8875_v8  ;;  %v6703_v15 = vld [vmem:[%s11090_s24 + $0x20] ss:$8 sm:$0xf]  ;;  %s566_s24 = sand.u32 1, %s7950_s28  }
 0x175   : > { %1588 = vmatpush1.bf16.msra.mxu0 %v8877_v53  ;;  %v1323_v6 = vpop.permute.xlu1 %1322  ;;  %v1375_v4 = vrot.slane %v6703_v15, %v8270_v31  ;;  %v1379_v11 = vrot.slane %v6703_v15, %v8247_v19  ;;  %v1387_v19 = vrot.slane %v6703_v15, %v8273_v32  ;;  %v11148_v53 = vmov 0   ;;  %s6694_s22 = sshll.u32 %s566_s24, 7  ;;  %s10885_s27 = scalar_lea.sflag [#allocation4], %s566_s24 }
 0x176   : > { %v1321_v49 = vpop.permute.xlu0 %1320  ;;  %v8891_v13 = vpack.c.bf16 %v1303_v28, %v1299_v23  ;;  %v8893_v52 = vpack.c.bf16 %v1302_v20, %v1298_v58  ;;  %v1383_v23 = vrot.slane %v6703_v15, %v8261_v27  ;;  %s10830_s20 = scalar_lea.vmem [#allocation3], %s6694_s22  ;;  %s7900_s22 = sshll.u32 %s7973_s23, 4  ;;  %s7901_s22 = int_to_ptr.vmem [resolvable:$false] %s7900_s22 }
 0x177   : > { %s6628_s25 = sshll.u32 %s10830_s20, 4  ;;  %s7902_s21 = scalar_lea.vmem %s7901_s22, 4096  ;;  %s10877_s25 = int_to_ptr.vmem [resolvable:$true] %s6628_s25 }
 0x178   : > { %11146 = vst [vmem:[#allocation66_spill] sm:$0xff] %v8891_v13  ;;  %11147 = vst [vmem:[#allocation67_spill] sm:$0xff] %v8893_v52  ;;  %1693 = vmatprep.subr.bf16.mxu1 %v8891_v13  ;;  %1590 = vmatmul.mubr.bf16.vlgmr.msra.gmra.mrb[0].mxu0 %v7764_v16  ;;  %v1831_v13 = vld [vmem:[%s11153_s26 + $0x130] sm:$0xff]  ;;  %s7896_s1 = scalar_lea.vmem %s10877_s25, 2048  ;;  %p7903_p0 = scmp.lt.s32.totalorder %s10877_s25, %s7901_s22 }
 0x179   : > { %1694 = vmatpush1.bf16.msra.mxu1 %v8893_v52  ;;  %v1331_v22 = vpop.permute.xlu1 %1330  ;;  %1599 = vmatprep.mubr.bf16.mxu0 %v7767_v12  ;;  %p7897_p11 = scmp.ne.s32.totalorder %s10877_s25, %s7896_s1  ;;  %p7904_p1 = scmp.lt.s32.totalorder %s7902_s21, %s7896_s1 }
 0x17a   : > { %v1329_v7 = vpop.permute.xlu0 %1328  ;;  %v1362_v44 = vsel %vm1352_vm7, %v1323_v6, %v1331_v22 }
 0x17b   : > { %v1361_v30 = vsel %vm1352_vm7, %v1321_v49, %v1329_v7  ;;  %v1396_v20 = vmul.f32 %v1375_v4, %v1362_v44  ;;  %p7898_p12 = pnand %p7897_p11, %p8109_p5  ;;  %p7905_p2 = por %p7904_p1, %p7903_p0 }
 0x17c   : > { %1696 = vmatmul.mubr.bf16.vlgmr.msra.gmra.mrb[0].mxu1 %v7764_v16  ;;  %v1392_v28 = vmul.f32 %v1375_v4, %v1361_v30 }
 0x17d   : > { %v1339_v9 = vpop.permute.xlu1 %1338  ;;  %1705 = vmatprep.mubr.bf16.mxu1 %v7767_v12  ;;  %p7899_p13 = pneg %p7898_p12 }
 0x17e   : > { %v1358_v31 = vsel %vm1352_vm7, %v1331_v22, %v1339_v9  ;;  %v1337_v38 = vpop.permute.xlu0 %1336  ;;  %v8917_v12 = vpack.c.bf16 %v1396_v20, %v1392_v28 }
 0x17f   : > { %v1397_v40 = vmul.f32 %v1379_v11, %v1358_v31  ;;  %v1357_v58 = vsel %vm1352_vm7, %v1329_v7, %v1337_v38  ;;  %p7906_p3 = pnand %p7905_p2, %p7899_p13 }
 0x180   : > { %v1393_v16 = vmul.f32 %v1379_v11, %v1357_v58  ;;  %1600 = vmatmul.mubr.bf16.gmra.mrb[4].mxu0 %v7769_v3  ;;  %11149 = vst [vmem:[#allocation68_spill] sm:$0xff] %v8917_v12 }
 0x181   : > { %v1347_v52 = vpop.permute.xlu1 %1346  ;;  %1642 = vmatprep.mubr.bf16.mxu0 %v11148_v53 }
 0x182   : > { %v1354_v44 = vsel %vm1352_vm7, %v1339_v9, %v1347_v52  ;;  %v1366_v22 = vsel %vm1352_vm7, %v1347_v52, %v1323_v6  ;;  %v1345_v30 = vpop.permute.xlu0 %1344  ;;  %v8923_v31 = vpack.c.bf16 %v1397_v40, %v1393_v16 }
 0x183   : > { %v1398_v7 = vmul.f32 %v1383_v23, %v1354_v44  ;;  %v1399_v27 = vmul.f32 %v1387_v19, %v1366_v22  ;;  %v1353_v32 = vsel %vm1352_vm7, %v1337_v38, %v1345_v30  ;;  %v1365_v15 = vsel %vm1352_vm7, %v1345_v30, %v1321_v49 }
 0x184   : > { %11150 = vst [vmem:[#allocation69_spill] sm:$0xff] %v8923_v31  ;;  %v1394_v58 = vmul.f32 %v1383_v23, %v1353_v32  ;;  %v1395_v20 = vmul.f32 %v1387_v19, %v1365_v15  ;;  %1610 = vmatprep.subr.bf16.mxu0 %v8923_v31  ;;  %1706 = vmatmul.mubr.bf16.gmra.mrb[4].mxu1 %v7769_v3  ;;  %v1810_v32 = vld [vmem:[%s11153_s26 + $0x88] sm:$0xff]  ;;  %v1801_v31 = vld [vmem:[%s11153_s26 + $0x40] sm:$0xff] }
 0x185   : > { %1611 = vmatpush1.bf16.msra.mxu0 %v8917_v12  ;;  %v1327_v9 = vpop.permute.xlu1 %1326  ;;  %1748 = vmatprep.mubr.bf16.mxu1 %v11148_v53 }
 0x186   : > { %v8932_v6 = vpack.c.bf16 %v1398_v7, %v1394_v58  ;;  %v1325_v52 = vpop.permute.xlu0 %1324  ;;  %v8934_v28 = vpack.c.bf16 %v1399_v27, %v1395_v20  ;;  %v1809_v27 = vld [vmem:[%s11153_s26 + $0x80] sm:$0xff] }
 0x188   : > { %11151 = vst [vmem:[#allocation70_spill] sm:$0xff] %v8932_v6  ;;  %11152 = vst [vmem:[#allocation71_spill] sm:$0xff] %v8934_v28  ;;  %1716 = vmatprep.subr.bf16.mxu1 %v8934_v28 }
 0x189   : > { %1717 = vmatpush1.bf16.msra.mxu1 %v8932_v6  ;;  %v1335_v49 = vpop.permute.xlu1 %1334 }
 0x18a   : > { %v1333_v38 = vpop.permute.xlu0 %1332  ;;  %v1364_v40 = vsel %vm1352_vm7, %v1327_v9, %v1335_v49 }
 0x18b   : > { %v1363_v3 = vsel %vm1352_vm7, %v1325_v52, %v1333_v38  ;;  %v1404_v44 = vmul.f32 %v1375_v4, %v1364_v40  ;;  %v8952_v40 = vpack.c.bf16 %v1810_v32, %v1809_v27 }
 0x18c   : > { %v1400_v22 = vmul.f32 %v1375_v4, %v1363_v3 }
 0x18d   : > { %v1343_v16 = vpop.permute.xlu1 %1342 }
 0x18e   : > { %v1360_v30 = vsel %vm1352_vm7, %v1335_v49, %v1343_v16  ;;  %v1341_v7 = vpop.permute.xlu0 %1340  ;;  %v8954_v4 = vpack.c.bf16 %v1404_v44, %v1400_v22 }
 0x18f   : > { %v1405_v15 = vmul.f32 %v1379_v11, %v1360_v30  ;;  %v1359_v58 = vsel %vm1352_vm7, %v1333_v38, %v1341_v7  ;;  %v1793_v30 = vld [vmem:[%s11153_s26] sm:$0xff] }
 0x190   : > { %v1401_v20 = vmul.f32 %v1379_v11, %v1359_v58  ;;  %11154 = vst [vmem:[#allocation72_spill] sm:$0xff] %v8954_v4  ;;  %v1795_v58 = vld [vmem:[%s11153_s26 + $0x10] sm:$0xff] }
 0x191   : > { %v1351_v6 = vpop.permute.xlu1 %1350 }
 0x192   : > { %v1356_v49 = vsel %vm1352_vm7, %v1343_v16, %v1351_v6  ;;  %v1368_v3 = vsel %vm1352_vm7, %v1351_v6, %v1327_v9  ;;  %v1349_v12 = vpop.permute.xlu0 %1348  ;;  %v8960_v28 = vpack.c.bf16 %v1405_v15, %v1401_v20  ;;  %v1794_v16 = vld [vmem:[%s11153_s26 + $0x8] sm:$0xff]  ;;  %v1841_v9 = vld [vmem:[%s11153_s26 + $0x180] sm:$0xff] }
 0x193   : > { %v1406_v38 = vmul.f32 %v1383_v23, %v1356_v49  ;;  %v1407_v11 = vmul.f32 %v1387_v19, %v1368_v3  ;;  %v1355_v27 = vsel %vm1352_vm7, %v1341_v7, %v1349_v12  ;;  %v1367_v44 = vsel %vm1352_vm7, %v1349_v12, %v1325_v52  ;;  %v1842_v6 = vld [vmem:[%s11153_s26 + $0x188] sm:$0xff]  ;;  %v1811_v12 = vld [vmem:[%s11153_s26 + $0x90] sm:$0xff]  ;;  %v1812_v52 = vld [vmem:[%s11153_s26 + $0x98] sm:$0xff] }
 0x194   : > { %11155 = vst [vmem:[#allocation73_spill] sm:$0xff] %v8960_v28  ;;  %v1402_v22 = vmul.f32 %v1383_v23, %v1355_v27  ;;  %v1403_v32 = vmul.f32 %v1387_v19, %v1367_v44  ;;  %1612 = vmatprep.subr.bf16.mxu0 %v8960_v28  ;;  %v8994_v19 = vpack.c.bf16 %v1794_v16, %v1793_v30  ;;  %v1825_v20 = vld [vmem:[%s11153_s26 + $0x100] sm:$0xff]  ;;  %v1826_v49 = vld [vmem:[%s11153_s26 + $0x108] sm:$0xff]  ;;  %v1796_v30 = vld [vmem:[%s11153_s26 + $0x18] sm:$0xff] }
 0x195   : > { %1613 = vmatpush1.bf16.msra.mxu0 %v8954_v4  ;;  %v8996_v15 = vpack.c.bf16 %v1842_v6, %v1841_v9  ;;  %v9007_v3 = vpack.c.bf16 %v1812_v52, %v1811_v12  ;;  %v1813_v27 = vld [vmem:[%s11153_s26 + $0xa0] sm:$0xff]  ;;  %v1814_v44 = vld [vmem:[%s11153_s26 + $0xa8] sm:$0xff]  ;;  %v9028_v16 = vpack.c.bf16 %v1826_v49, %v1825_v20  ;;  %v9032_v9 = vpack.c.bf16 %v1796_v30, %v1795_v58  ;;  %v1828_v12 = vld [vmem:[%s11153_s26 + $0x118] sm:$0xff] }
 0x196   : > { %v8989_v7 = vpack.c.bf16 %v1406_v38, %v1402_v22  ;;  %v8991_v23 = vpack.c.bf16 %v1407_v11, %v1403_v32  ;;  %7395 = vmatprep.subr.bf16.mxu0 %v8952_v40  ;;  %11158 = vst [vmem:[#allocation76_spill] sm:$0xff] %v8994_v19  ;;  %v1843_v38 = vld [vmem:[%s11153_s26 + $0x190] sm:$0xff]  ;;  %v1844_v11 = vld [vmem:[%s11153_s26 + $0x198] sm:$0xff]  ;;  %v1797_v22 = vld [vmem:[%s11153_s26 + $0x20] sm:$0xff]  ;;  %v9046_v52 = vpack.c.bf16 %v1814_v44, %v1813_v27 }
 0x197   : > { %11159 = vst [vmem:[#allocation77_spill] sm:$0xff] %v9007_v3  ;;  %11160 = vst [vmem:[#allocation78_spill] sm:$0xff] %v9028_v16  ;;  %v9034_v6 = vpack.c.bf16 %v1844_v11, %v1843_v38  ;;  %v1827_v32 = vld [vmem:[%s11153_s26 + $0x110] sm:$0xff]  ;;  %v1798_v58 = vld [vmem:[%s11153_s26 + $0x28] sm:$0xff] }
 0x198   : > { %11156 = vst [vmem:[#allocation74_spill] sm:$0xff] %v8989_v7  ;;  %11157 = vst [vmem:[#allocation75_spill] sm:$0xff] %v8991_v23  ;;  %6710 = vmatmul.mubr.msk.bf16.vlgmr.msra.gmra.mrb[0].mxu0 %vm1550_vm8, %v7770_v18  ;;  %1718 = vmatprep.subr.bf16.mxu1 %v8991_v23  ;;  %v1845_v20 = vld [vmem:[%s11153_s26 + $0x1a0] sm:$0xff]  ;;  %v1846_v49 = vld [vmem:[%s11153_s26 + $0x1a8] sm:$0xff]  ;;  %v9069_v27 = vpack.c.bf16 %v1828_v12, %v1827_v32 }
 0x199   : > { %1719 = vmatpush1.bf16.msra.mxu1 %v8989_v7  ;;  %1652 = vmatprep.mubr.bf16.mxu0 %v11148_v53  ;;  %11161 = vst [vmem:[#allocation79_spill] sm:$0xff] %v9032_v9  ;;  %11162 = vst [vmem:[#allocation80_spill] sm:$0xff] %v9034_v6  ;;  %v7771_v30 = vld [vmem:[%s10930_s4 + $0x20] ss:$12 sps:$4 sm:$0xff]   ;;  %v1815_v38 = vld [vmem:[%s11153_s26 + $0xb0] sm:$0xff]  ;;  %v9075_v44 = vpack.c.bf16 %v1846_v49, %v1845_v20 }
 0x19a   : > { %7397 = vmatpush3.bf16.msra.mxu0 %v8994_v19  ;;  %7427 = vmatprep.subr.bf16.mxu1 %v8996_v15  ;;  %11163 = vst [vmem:[#allocation81_spill] sm:$0xff] %v9046_v52  ;;  %v1816_v11 = vld [vmem:[%s11153_s26 + $0xb8] sm:$0xff]  ;;  %11164 = vst [vmem:[#allocation82_spill] sm:$0xff] %v9069_v27  ;;  %v1799_v7 = vld [vmem:[%s11153_s26 + $0x30] sm:$0xff] }
 0x19b   : > { %7399 = vmatprep.subr.bf16.mxu0 %v9007_v3  ;;  %11166 = vst [vmem:[#allocation84_spill] sm:$0xff] %v9075_v44  ;;  %v1829_v4 = vld [vmem:[%s11153_s26 + $0x120] sm:$0xff]  ;;  %v1830_v32 = vld [vmem:[%s11153_s26 + $0x128] sm:$0xff]  ;;  %v9087_v12 = vpack.c.bf16 %v1816_v11, %v1815_v38  ;;  %v1848_v20 = vld [vmem:[%s11153_s26 + $0x1b8] sm:$0xff] }
 0x19c   : > { %6712 = vmatmul.mubr.msk.bf16.vlgmr.msra.gmra.mrb[0].mxu1 %vm1550_vm8, %v7770_v18  ;;  %v9073_v18 = vpack.c.bf16 %v1798_v58, %v1797_v22  ;;  %v1800_v22 = vld [vmem:[%s11153_s26 + $0x38] sm:$0xff]  ;;  %v1847_v58 = vld [vmem:[%s11153_s26 + $0x1b0] sm:$0xff]  ;;  %v1817_v49 = vld [vmem:[%s11153_s26 + $0xc0] sm:$0xff]  ;;  %v9106_v11 = vpack.c.bf16 %v1830_v32, %v1829_v4 }
 0x19d   : > { %1758 = vmatprep.mubr.bf16.mxu1 %v11148_v53  ;;  %7429 = vmatpush3.bf16.msra.mxu1 %v9028_v16  ;;  %11167 = vst [vmem:[#allocation85_spill] sm:$0xff] %v9087_v12  ;;  %v1818_v38 = vld [vmem:[%s11153_s26 + $0xc8] sm:$0xff]  ;;  %v9110_v23 = vpack.c.bf16 %v1800_v22, %v1799_v7  ;;  %v9112_v28 = vpack.c.bf16 %v1848_v20, %v1847_v58  ;;  %v1832_v4 = vld [vmem:[%s11153_s26 + $0x138] sm:$0xff]  ;;  %v1849_v22 = vld [vmem:[%s11153_s26 + $0x1c0] sm:$0xff] }
 0x19e   : > { %7401 = vmatpush3.bf16.msra.mxu0 %v9032_v9  ;;  %7431 = vmatprep.subr.bf16.mxu1 %v9034_v6  ;;  %11165 = vst [vmem:[#allocation83_spill] sm:$0xff] %v9073_v18  ;;  %11168 = vst [vmem:[#allocation86_spill] sm:$0xff] %v9106_v11  ;;  %v9124_v32 = vpack.c.bf16 %v1818_v38, %v1817_v49  ;;  %v1802_v7 = vld [vmem:[%s11153_s26 + $0x48] sm:$0xff]  ;;  %v1819_v20 = vld [vmem:[%s11153_s26 + $0xd0] sm:$0xff]  ;;  %v9143_v38 = vpack.c.bf16 %v1832_v4, %v1831_v13 }
 0x19f   : > { %7403 = vmatprep.subr.bf16.mxu0 %v9046_v52  ;;  %11169 = vst [vmem:[#allocation87_spill] sm:$0xff] %v9110_v23  ;;  %11170 = vst [vmem:[#allocation88_spill] sm:$0xff] %v9112_v28  ;;  %v1850_v58 = vld [vmem:[%s11153_s26 + $0x1c8] sm:$0xff]  ;;  %v1820_v49 = vld [vmem:[%s11153_s26 + $0xd8] sm:$0xff]  ;;  %v9147_v8 = vpack.c.bf16 %v1802_v7, %v1801_v31 }
 0x1a0   : > { %6711 = vmatmul.mubr.msk.bf16.gmra.mrb[4].mxu0 %vm1550_vm8, %v7771_v30  ;;  %11171 = vst [vmem:[#allocation89_spill] sm:$0xff] %v9124_v32  ;;  %11172 = vst [vmem:[#allocation90_spill] sm:$0xff] %v9143_v38  ;;  %v9149_v14 = vpack.c.bf16 %v1850_v58, %v1849_v22  ;;  %v1834_v13 = vld [vmem:[%s11153_s26 + $0x148] sm:$0xff]  ;;  %v9161_v4 = vpack.c.bf16 %v1820_v49, %v1819_v20  ;;  %v1804_v31 = vld [vmem:[%s11153_s26 + $0x58] sm:$0xff] }
 0x1a1   : > { %7433 = vmatpush3.bf16.msra.mxu1 %v9069_v27  ;;  %11173 = vst [vmem:[#allocation91_spill] sm:$0xff] %v9147_v8  ;;  %v1851_v7 = vld [vmem:[%s11153_s26 + $0x1d0] sm:$0xff]  ;;  %v1852_v22 = vld [vmem:[%s11153_s26 + $0x1d8] sm:$0xff]  ;;  %v1821_v58 = vld [vmem:[%s11153_s26 + $0xe0] sm:$0xff]  ;;  %v9179_v49 = vpack.c.bf16 %v1834_v13, %v1833_v29 }
 0x1a2   : > { %7405 = vmatpush3.bf16.msra.mxu0 %v9073_v18  ;;  %7435 = vmatprep.subr.bf16.mxu1 %v9075_v44  ;;  %11174 = vst [vmem:[#allocation92_spill] sm:$0xff] %v9149_v14  ;;  %11175 = vst [vmem:[#allocation93_spill] sm:$0xff] %v9161_v4  ;;  %v1822_v20 = vld [vmem:[%s11153_s26 + $0xe8] sm:$0xff]  ;;  %v9185_v47 = vpack.c.bf16 %v1852_v22, %v1851_v7  ;;  %v1805_v13 = vld [vmem:[%s11153_s26 + $0x60] sm:$0xff] }
 0x1a3   : > { %7407 = vmatprep.subr.bf16.mxu0 %v9087_v12  ;;  %11176 = vst [vmem:[#allocation94_spill] sm:$0xff] %v9179_v49  ;;  %v9194_v29 = vpack.c.bf16 %v1822_v20, %v1821_v58  ;;  %v1823_v22 = vld [vmem:[%s11153_s26 + $0xf0] sm:$0xff]  ;;  %v1854_v20 = vld [vmem:[%s11153_s26 + $0x1e8] sm:$0xff] }
 0x1a4   : > { %6713 = vmatmul.mubr.msk.bf16.gmra.mrb[4].mxu1 %vm1550_vm8, %v7771_v30  ;;  %v1803_v30 = vld [vmem:[%s11153_s26 + $0x50] sm:$0xff]  ;;  %11178 = vst [vmem:[#allocation96_spill] sm:$0xff] %v9185_v47 }
 0x1a5   : > { %7437 = vmatpush3.bf16.msra.mxu1 %v9106_v11  ;;  %v9183_v24 = vpack.c.bf16 %v1804_v31, %v1803_v30  ;;  %11179 = vst [vmem:[#allocation97_spill] sm:$0xff] %v9194_v29  ;;  %v1806_v30 = vld [vmem:[%s11153_s26 + $0x68] sm:$0xff]  ;;  %v9203_v31 = vpack.c.bf16 %v1836_v48, %v1835_v51  ;;  %v1824_v51 = vld [vmem:[%s11153_s26 + $0xf8] sm:$0xff]  ;;  %v1853_v48 = vld [vmem:[%s11153_s26 + $0x1e0] sm:$0xff] }
 0x1a6   : > { %7409 = vmatpush3.bf16.msra.mxu0 %v9110_v23  ;;  %7439 = vmatprep.subr.bf16.mxu1 %v9112_v28  ;;  %v9207_v7 = vpack.c.bf16 %v1806_v30, %v1805_v13  ;;  %v9221_v58 = vpack.c.bf16 %v1824_v51, %v1823_v22  ;;  %v1807_v13 = vld [vmem:[%s11153_s26 + $0x70] sm:$0xff]  ;;  %v1808_v30 = vld [vmem:[%s11153_s26 + $0x78] sm:$0xff]  ;;  %v9232_v26 = vpack.c.bf16 %v1854_v20, %v1853_v48  ;;  %v1837_v22 = vld [vmem:[%s11153_s26 + $0x160] sm:$0xff] }
 0x1a7   : > { %7411 = vmatprep.subr.bf16.mxu0 %v9124_v32  ;;  %11177 = vst [vmem:[#allocation95_spill] sm:$0xff] %v9183_v24  ;;  %11180 = vst [vmem:[#allocation98_spill] sm:$0xff] %v9203_v31  ;;  %v9234_v34 = vpack.c.bf16 %v1808_v30, %v1807_v13  ;;  %v1838_v51 = vld [vmem:[%s11153_s26 + $0x168] sm:$0xff]  ;;  %v1855_v48 = vld [vmem:[%s11153_s26 + $0x1f0] sm:$0xff] }
 0x1a8   : > { %11181 = vst [vmem:[#allocation99_spill] sm:$0xff] %v9207_v7  ;;  %11182 = vst [vmem:[#allocation100_spill] sm:$0xff] %v9221_v58  ;;  %v9243_v33 = vpack.c.bf16 %v1838_v51, %v1837_v22  ;;  %v1856_v20 = vld [vmem:[%s11153_s26 + $0x1f8] sm:$0xff]  ;;  %v1839_v30 = vld [vmem:[%s11153_s26 + $0x170] sm:$0xff] }
 0x1a9   : > { %7441 = vmatpush3.bf16.msra.mxu1 %v9143_v38  ;;  %11183 = vst [vmem:[#allocation101_spill] sm:$0xff] %v9232_v26  ;;  %11184 = vst [vmem:[#allocation102_spill] sm:$0xff] %v9234_v34  ;;  %v9254_v13 = vpack.c.bf16 %v1856_v20, %v1855_v48  ;;  %v1840_v22 = vld [vmem:[%s11153_s26 + $0x178] sm:$0xff] }
 0x1aa   : > { %7413 = vmatpush3.bf16.msra.mxu0 %v9147_v8  ;;  %7443 = vmatprep.subr.bf16.mxu1 %v9149_v14  ;;  %11185 = vst [vmem:[#allocation103_spill] sm:$0xff] %v9243_v33  ;;  %v9262_v51 = vpack.c.bf16 %v1840_v22, %v1839_v30 }
 0x1ab   : > { %7415 = vmatprep.subr.bf16.mxu0 %v9161_v4  ;;  %11186 = vst [vmem:[#allocation104_spill] sm:$0xff] %v9254_v13 }
 0x1ac   : > { %11187 = vst [vmem:[#allocation105_spill] sm:$0xff] %v9262_v51 }
 0x1ad   : > { %7445 = vmatpush3.bf16.msra.mxu1 %v9179_v49 }
 0x1ae   : > { %7417 = vmatpush3.bf16.msra.mxu0 %v9183_v24  ;;  %7447 = vmatprep.subr.bf16.mxu1 %v9185_v47 }
 0x1af   : > { %7419 = vmatprep.subr.bf16.mxu0 %v9194_v29 }
 0x1b1   : > { %7449 = vmatpush3.bf16.msra.mxu1 %v9203_v31 }
 0x1b2   : > { %7421 = vmatpush3.bf16.msra.mxu0 %v9207_v7  ;;  %7451 = vmatprep.subr.bf16.mxu1 %v9232_v26 }
 0x1b3   : > { %7423 = vmatprep.subr.bf16.mxu0 %v9221_v58 }
 0x1b5   : > { %7453 = vmatpush3.bf16.msra.mxu1 %v9243_v33 }
 0x1b6   : > { %7425 = vmatpush3.bf16.msra.mxu0 %v9234_v34  ;;  %7455 = vmatprep.subr.bf16.mxu1 %v9254_v13 }
 0x1b9   : > { %7457 = vmatpush3.bf16.msra.mxu1 %v9262_v51 }
 0x26b   : > { %v1644_v50 = vpop.f32.mrb[0].mxu0 }
 0x26c   : > { %v1646_v60 = vpop.f32.mrb[1].mxu0  ;;  %v9268_v20 = vmax.f32 %v1644_v50, 0.0 }
 0x26d   : > { %v9266_v62 = vmax.f32 %v1646_v60, 0.0  ;;  %v1648_v48 = vpop.f32.mrb[2].mxu0 }
 0x26e   : > { %11189 = vst [vmem:[#allocation107_spill] sm:$0xff] %v9268_v20  ;;  %v1650_v37 = vpop.f32.mrb[3].mxu0  ;;  %v9270_v43 = vmax.f32 %v1648_v48, 0.0 }
 0x26f   : > { %11188 = vst [vmem:[#allocation106_spill] sm:$0xff] %v9266_v62  ;;  %v9272_v54 = vmax.f32 %v1650_v37, 0.0  ;;  %v1750_v36 = vpop.f32.mrb[0].mxu1  ;;  %1921 = vmatprep.mubr.f32.mxu0 %v9266_v62 }
 0x270   : > { %11190 = vst [vmem:[#allocation108_spill] sm:$0xff] %v9270_v43  ;;  %v1752_v30 = vpop.f32.mrb[1].mxu1  ;;  %1922 = vmatmul.mubr.f32.vlgmr.msra.gmra.mrb[8].mxu0 %v9268_v20  ;;  %v9281_v50 = vmax.f32 %v1750_v36, 0.0  ;;  %v1785_v37 = vpack.c.bf16 %v9270_v43, %v9268_v20 }
 0x271   : > { %11191 = vst [vmem:[#allocation109_spill] sm:$0xff] %v9272_v54  ;;  %v9276_v22 = vmax.f32 %v1752_v30, 0.0  ;;  %v1754_v41 = vpop.f32.mrb[2].mxu1  ;;  %1926 = vmatprep.mubr.f32.mxu0 %v9272_v54  ;;  %v1786_v60 = vpack.c.bf16 %v9272_v54, %v9266_v62 }
 0x272   : > { %11193 = vst [vmem:[#allocation111_spill] sm:$0xff] %v9281_v50  ;;  %v1756_v48 = vpop.f32.mrb[3].mxu1  ;;  %v9285_v42 = vmax.f32 %v1754_v41, 0.0 }
 0x273   : > { %11192 = vst [vmem:[#allocation110_spill] sm:$0xff] %v9276_v22  ;;  %v9287_v59 = vmax.f32 %v1756_v48, 0.0  ;;  %v1654_v39 = vpop.f32.mrb[4].mxu0  ;;  %2006 = vmatprep.mubr.f32.mxu1 %v9276_v22  ;;  %2039 = vmatprep.subr.bf16.mxu0 %v1786_v60 }
 0x274   : > { %11194 = vst [vmem:[#allocation112_spill] sm:$0xff] %v9285_v42  ;;  %v1656_v30 = vpop.f32.mrb[5].mxu0  ;;  %1927 = vmatmul.mubr.f32.gmra.mrb[10].mxu0 %v9270_v43  ;;  %2007 = vmatmul.mubr.f32.vlgmr.msra.gmra.mrb[8].mxu1 %v9281_v50  ;;  %v9297_v48 = vmax.f32 %v1654_v39, 0.0  ;;  %v1787_v60 = vpack.c.bf16 %v9285_v42, %v9281_v50 }
 0x275   : > { %11195 = vst [vmem:[#allocation113_spill] sm:$0xff] %v9287_v59  ;;  %v9292_v54 = vmax.f32 %v1656_v30, 0.0  ;;  %2040 = vmatpush1.bf16.msra.mxu0 %v1785_v37  ;;  %v1658_v36 = vpop.f32.mrb[6].mxu0  ;;  %2011 = vmatprep.mubr.f32.mxu1 %v9287_v59  ;;  %v1788_v41 = vpack.c.bf16 %v9287_v59, %v9276_v22 }
 0x276   : > { %11197 = vst [vmem:[#allocation115_spill] sm:$0xff] %v9297_v48  ;;  %v1660_v62 = vpop.f32.mrb[7].mxu0  ;;  %v9301_v20 = vmax.f32 %v1658_v36, 0.0 }
 0x277   : > { %11196 = vst [vmem:[#allocation114_spill] sm:$0xff] %v9292_v54  ;;  %v9303_v43 = vmax.f32 %v1660_v62, 0.0  ;;  %v1760_v45 = vpop.f32.mrb[4].mxu1  ;;  %1931 = vmatprep.mubr.f32.mxu0 %v9292_v54  ;;  %2082 = vmatprep.subr.bf16.mxu1 %v1788_v41 }
 0x278   : > { %11198 = vst [vmem:[#allocation116_spill] sm:$0xff] %v9301_v20  ;;  %v1762_v37 = vpop.f32.mrb[5].mxu1  ;;  %1932 = vmatmul.mubr.f32.gmra.mrb[12].mxu0 %v9297_v48  ;;  %2012 = vmatmul.mubr.f32.gmra.mrb[10].mxu1 %v9285_v42  ;;  %v9313_v62 = vmax.f32 %v1760_v45, 0.0  ;;  %v1789_v41 = vpack.c.bf16 %v9301_v20, %v9297_v48  ;;  %v7772_v45 = vld [vmem:[%s10932_s6] sm:$0xff]  }
 0x279   : > { %11199 = vst [vmem:[#allocation117_spill] sm:$0xff] %v9303_v43  ;;  %v9308_v30 = vmax.f32 %v1762_v37, 0.0  ;;  %2083 = vmatpush1.bf16.msra.mxu1 %v1787_v60  ;;  %v1764_v39 = vpop.f32.mrb[6].mxu1  ;;  %1936 = vmatprep.mubr.f32.mxu0 %v9303_v43  ;;  %v1790_v36 = vpack.c.bf16 %v9303_v43, %v9292_v54  ;;  %v7773_v37 = vld [vmem:[%s10931_s5] sm:$0xff]  }
 0x27a   : > { %11201 = vst [vmem:[#allocation119_spill] sm:$0xff] %v9313_v62  ;;  %v1766_v59 = vpop.f32.mrb[7].mxu1  ;;  %v9317_v22 = vmax.f32 %v1764_v39, 0.0  ;;  %v2236_v39 = vld [vmem:[%s10934_s8] sm:$0xff] }
 0x27b   : > { %11200 = vst [vmem:[#allocation118_spill] sm:$0xff] %v9308_v30  ;;  %v9319_v50 = vmax.f32 %v1766_v59, 0.0  ;;  %2016 = vmatprep.mubr.f32.mxu1 %v9308_v30  ;;  %2041 = vmatprep.subr.bf16.mxu0 %v1790_v36  ;;  %v2237_v36 = vld [vmem:[%s10934_s8 + $0x8] sm:$0xff] }
 0x27c   : > { %11202 = vst [vmem:[#allocation120_spill] sm:$0xff] %v9317_v22  ;;  %1937 = vmatmul.mubr.f32.gmra.mrb[14].mxu0 %v9301_v20  ;;  %2017 = vmatmul.mubr.f32.gmra.mrb[12].mxu1 %v9313_v62  ;;  %v1791_v59 = vpack.c.bf16 %v9317_v22, %v9313_v62 }
 0x27d   : > { %11203 = vst [vmem:[#allocation121_spill] sm:$0xff] %v9319_v50  ;;  %2042 = vmatpush1.bf16.msra.mxu0 %v1789_v41  ;;  %2021 = vmatprep.mubr.f32.mxu1 %v9319_v50  ;;  %v1792_v60 = vpack.c.bf16 %v9319_v50, %v9308_v30  ;;  %v2239_v41 = vld [vmem:[%s10934_s8 + $0x18] sm:$0xff] }
 0x27e   : > { %2071 = vmatprep.mubr.bf16.mxu0 %v11148_v53  ;;  %2133 = vmatprep.subr.bf16.mxu0 %v8642_v63 }
 0x27f   : > { %2084 = vmatprep.subr.bf16.mxu1 %v1792_v60  ;;  %2243 = vperm.xlu0 %7762, %v2236_v39   ;;  %v3024_v60 = vld [vmem:[%s10936_s10] sm:$0xff]  ;;  %v3025_v39 = vld [vmem:[%s10936_s10 + $0x8] sm:$0xff] }
 0x280   : > { %2022 = vmatmul.mubr.f32.gmra.mrb[14].mxu1 %v9317_v22  ;;  %6715 = vmatmul.mubr.msk.bf16.vlgmr.msra.gmra.mrb[16].mxu0 %vm1550_vm8, %v7772_v45 }
 0x281   : > { %2085 = vmatpush1.bf16.msra.mxu1 %v1791_v59  ;;  %2114 = vmatprep.mubr.bf16.mxu1 %v11148_v53  ;;  %v2240_v59 = vld [vmem:[%s10934_s8 + $0x20] sm:$0xf] }
 0x282   : > { %2134 = vmatpush1.bf16.msra.mxu0 %v8659_v0  ;;  %2176 = vmatprep.subr.bf16.mxu1 %v8649_v25 }
 0x283   : > { %2135 = vmatprep.subr.bf16.mxu0 %v8666_v2  ;;  %2165 = vmatprep.mubr.bf16.mxu0 %v11148_v53 }
 0x284   : > { %6716 = vmatmul.mubr.msk.bf16.vlgmr.msra.gmra.mrb[16].mxu1 %vm1550_vm8, %v7772_v45  ;;  %2248 = vperm.xlu1 %7763, %v2237_v36   ;;  %v2238_v45 = vld [vmem:[%s10934_s8 + $0x10] sm:$0xff]  ;;  %v3028_v36 = vld [vmem:[%s10936_s10 + $0x20] sm:$0xf] }
 0x285   : > { %2177 = vmatpush1.bf16.msra.mxu1 %v8673_v1  ;;  %2208 = vmatprep.mubr.bf16.mxu1 %v11148_v53 }
 0x286   : > { %2136 = vmatpush1.bf16.msra.mxu0 %v8691_v5  ;;  %2178 = vmatprep.subr.bf16.mxu1 %v8682_v10 }
 0x287   : > { %2258 = vperm.xlu0 %7762, %v2239_v41   ;;  %v3027_v41 = vld [vmem:[%s10936_s10 + $0x18] sm:$0xff] }
 0x288   : > { %2253 = vperm.xlu1 %7763, %v2238_v45   ;;  %v3060_v45 = vld [vmem:[%s10937_s11 + $0x8] sm:$0xff] }
 0x289   : > { %2179 = vmatpush1.bf16.msra.mxu1 %v8699_v61 }
 0x28b   : > { %3031 = vperm.xlu0 %7762, %v3024_v60   ;;  %v3059_v60 = vld [vmem:[%s10937_s11] sm:$0xff] }
 0x28c   : > { %6718 = vmatmul.mubr.msk.bf16.vlgmr.msra.gmra.mrb[16].mxu0 %vm1550_vm8, %v7773_v37  ;;  %2263 = vperm.xlu1 %7763, %v2240_v59   ;;  %v3062_v59 = vld [vmem:[%s10937_s11 + $0x18] sm:$0xff] }
 0x28d   : > { %2321 = vmatprep.mubr.bf16.mxu0 %v11148_v53 }
 0x290   : > { %6719 = vmatmul.mubr.msk.bf16.vlgmr.msra.gmra.mrb[16].mxu1 %vm1550_vm8, %v7773_v37  ;;  %v3026_v37 = vld [vmem:[%s10936_s10 + $0x10] sm:$0xff]  ;;  %3036 = vperm.xlu1 %7763, %v3025_v39   ;;  %v5816_v39 = vld [vmem:[%s10941_s15] sm:$0xff] }
 0x291   : > { %2382 = vmatprep.mubr.bf16.mxu1 %v11148_v53  ;;  %3041 = vperm.xlu0 %7762, %v3026_v37   ;;  %v3061_v37 = vld [vmem:[%s10937_s11 + $0x10] sm:$0xff] }
 0x294   : > { %3046 = vperm.xlu1 %7763, %v3027_v41   ;;  %v5818_v41 = vld [vmem:[%s10941_s15 + $0x10] sm:$0xff] }
 0x295   : > { %3051 = vperm.xlu0 %7762, %v3028_v36   ;;  %v3063_v36 = vld [vmem:[%s10937_s11 + $0x20] sm:$0xf] }
 0x298   : > { %3071 = vperm.xlu1 %7763, %v3059_v60   ;;  %v5949_v60 = vld [vmem:[%s10943_s17] sm:$0xff] }
 0x299   : > { %3076 = vperm.xlu0 %7762, %v3060_v45   ;;  %v5817_v45 = vld [vmem:[%s10941_s15 + $0x8] sm:$0xff] }
 0x29c   : > { %3081 = vperm.xlu1 %7763, %v3061_v37   ;;  %v5950_v37 = vld [vmem:[%s10943_s17 + $0x8] sm:$0xff] }
 0x29d   : > { %3086 = vperm.xlu0 %7762, %v3062_v59   ;;  %v5819_v59 = vld [vmem:[%s10941_s15 + $0x18] sm:$0xff] }
 0x2a0   : > { %3091 = vperm.xlu1 %7763, %v3063_v36   ;;  %v5951_v36 = vld [vmem:[%s10943_s17 + $0x10] sm:$0xff] }
 0x2a1   : > { %5822 = vperm.xlu0 %7762, %v5816_v39   ;;  %v5953_v39 = vld [vmem:[%s10943_s17 + $0x20] sm:$0xff] }
 0x2a4   : > { %5827 = vperm.xlu1 %7763, %v5817_v45   ;;  %v5952_v45 = vld [vmem:[%s10943_s17 + $0x18] sm:$0xff] }
 0x2a5   : > { %5832 = vperm.xlu0 %7762, %v5818_v41   ;;  %v5954_v41 = vld [vmem:[%s10943_s17 + $0x28] sm:$0xff] }
 0x2a8   : > { %5837 = vperm.xlu1 %7763, %v5819_v59   ;;  %v5956_v59 = vld [vmem:[%s10943_s17 + $0x38] sm:$0xff] }
 0x2a9   : > { %5959 = vperm.xlu0 %7762, %v5949_v60   ;;  %v5955_v60 = vld [vmem:[%s10943_s17 + $0x30] sm:$0xff] }
 0x2ac   : > { %5979 = vperm.xlu1 %7763, %v5953_v39  }
 0x2ad   : > { %5964 = vperm.xlu0 %7762, %v5950_v37  }
 0x2b0   : > { %5984 = vperm.xlu1 %7763, %v5954_v41  }
 0x2b1   : > { %5969 = vperm.xlu0 %7762, %v5951_v36  }
 0x2b4   : > { %5989 = vperm.xlu1 %7763, %v5955_v60  }
 0x2b5   : > { %5974 = vperm.xlu0 %7762, %v5952_v45  }
 0x2b8   : > { %5994 = vperm.xlu1 %7763, %v5956_v59  }
 0x343   : > { %v6938_v37 = vpop.f32.mrb[8].mxu0 }
 0x344   : > { %v6939_v39 = vpop.f32.mrb[9].mxu0 }
 0x345   : > { %v6940_v50 = vadd.f32 %v6939_v39, %v6938_v37 }
 0x347   : > { %v6941_v36 = vpop.f32.mrb[10].mxu0  ;;  %v6982_v43 = vpop.f32.mrb[8].mxu1 }
 0x348   : > { %v6942_v22 = vpop.f32.mrb[11].mxu0  ;;  %v6983_v20 = vpop.f32.mrb[9].mxu1 }
 0x349   : > { %v6943_v30 = vadd.f32 %v6942_v22, %v6941_v36  ;;  %v6984_v41 = vadd.f32 %v6983_v20, %v6982_v43 }
 0x34b   : > { %v9435_v54 = vadd.f32 %v6984_v41, %v6940_v50  ;;  %v6944_v62 = vpop.f32.mrb[12].mxu0  ;;  %v6985_v48 = vpop.f32.mrb[10].mxu1 }
 0x34c   : > { %v6945_v45 = vpop.f32.mrb[13].mxu0  ;;  %v6986_v60 = vpop.f32.mrb[11].mxu1 }
 0x34d   : > { %11204 = vst [vmem:[#allocation122_spill] sm:$0xff] %v9435_v54  ;;  %v6946_v42 = vadd.f32 %v6945_v45, %v6944_v62  ;;  %v6987_v61 = vadd.f32 %v6986_v60, %v6985_v48 }
 0x34f   : > { %v9437_v5 = vadd.f32 %v6987_v61, %v6943_v30  ;;  %v6947_v59 = vpop.f32.mrb[14].mxu0  ;;  %v6988_v10 = vpop.f32.mrb[12].mxu1 }
 0x350   : > { %v6948_v2 = vpop.f32.mrb[15].mxu0  ;;  %v6989_v37 = vpop.f32.mrb[13].mxu1 }
 0x351   : > { %11205 = vst [vmem:[#allocation123_spill] sm:$0xff] %v9437_v5  ;;  %v6949_v39 = vadd.f32 %v6948_v2, %v6947_v59  ;;  %v6990_v1 = vadd.f32 %v6989_v37, %v6988_v10 }
 0x353   : > { %v9439_v0 = vadd.f32 %v6990_v1, %v6946_v42  ;;  %v6991_v22 = vpop.f32.mrb[14].mxu1 }
 0x354   : > { %v6992_v43 = vpop.f32.mrb[15].mxu1 }
 0x355   : > { %11206 = vst [vmem:[#allocation124_spill] sm:$0xff] %v9439_v0  ;;  %v6993_v20 = vadd.f32 %v6992_v43, %v6991_v22 }
 0x357   : > { %v9441_v50 = vadd.f32 %v6993_v20, %v6949_v39  ;;  %v7774_v39 = vld [vmem:[%s10933_s7] sm:$0xff]   ;;  %v2244_v20 = vpop.permute.xlu0 %2243 }
 0x359   : > { %11207 = vst [vmem:[#allocation125_spill] sm:$0xff] %v9441_v50 }
 0x35f   : > { %v2167_v36 = vpop.f32.mrb[16].mxu0 }
 0x360   : > { %v2169_v41 = vpop.f32.mrb[17].mxu0  ;;  %v2219_v62 = vmax.f32 %v2167_v36, 0.0 }
 0x361   : > { %v2171_v54 = vpop.f32.mrb[18].mxu0  ;;  %v2220_v30 = vmax.f32 %v2169_v41, 0.0 }
 0x362   : > { %v2223_v48 = vmax.f32 %v2171_v54, 0.0  ;;  %v2173_v61 = vpop.f32.mrb[19].mxu0 }
 0x363   : > { %v2224_v45 = vmax.f32 %v2173_v61, 0.0  ;;  %v2210_v60 = vpop.f32.mrb[16].mxu1 }
 0x364   : > { %v2232_v5 = vpack.c.bf16 %v2223_v48, %v2219_v62  ;;  %v2212_v25 = vpop.f32.mrb[17].mxu1  ;;  %v2221_v42 = vmax.f32 %v2210_v60, 0.0  ;;  %v2249_v48 = vpop.permute.xlu1 %2248 }
 0x365   : > { %v2233_v2 = vpack.c.bf16 %v2224_v45, %v2220_v30  ;;  %v2214_v10 = vpop.f32.mrb[18].mxu1  ;;  %v2222_v37 = vmax.f32 %v2212_v25, 0.0  ;;  %v7775_v25 = vld [vmem:[%s10933_s7 + $0x8] sm:$0xff]  }
 0x366   : > { %v2225_v1 = vmax.f32 %v2214_v10, 0.0  ;;  %v2216_v59 = vpop.f32.mrb[19].mxu1 }
 0x367   : > { %v2226_v22 = vmax.f32 %v2216_v59, 0.0  ;;  %2289 = vmatprep.subr.bf16.mxu0 %v2233_v2 }
 0x368   : > { %v2234_v43 = vpack.c.bf16 %v2225_v1, %v2221_v42  ;;  %2290 = vmatpush1.bf16.msra.mxu0 %v2232_v5  ;;  %v7776_v5 = vld [vmem:[%s10933_s7 + $0x10] ss:$0 sps:$4 sm:$0x33]  }
 0x369   : > { %v2235_v54 = vpack.c.bf16 %v2226_v22, %v2222_v37  ;;  %7459 = vmatprep.subr.bf16.mxu0 %v8952_v40 }
 0x36b   : > { %6723 = vmatmul.mubr.msk.bf16.vlgmr.msra.gmra.mrb[20].mxu0 %vm2279_vm9, %v7774_v39  ;;  %2350 = vmatprep.subr.bf16.mxu1 %v2235_v54 }
 0x36c   : > { %2351 = vmatpush1.bf16.msra.mxu1 %v2234_v43  ;;  %2331 = vmatprep.mubr.bf16.mxu0 %v11148_v53 }
 0x36d   : > { %7461 = vmatpush3.bf16.msra.mxu0 %v8994_v19  ;;  %7491 = vmatprep.subr.bf16.mxu1 %v8996_v15 }
 0x36e   : > { %7463 = vmatprep.subr.bf16.mxu0 %v9007_v3 }
 0x36f   : > { %6726 = vmatmul.mubr.msk.bf16.vlgmr.msra.gmra.mrb[20].mxu1 %vm2279_vm9, %v7774_v39  ;;  %v2254_v39 = vpop.permute.xlu1 %2253 }
 0x370   : > { %2392 = vmatprep.mubr.bf16.mxu1 %v11148_v53  ;;  %7493 = vmatpush3.bf16.msra.mxu1 %v9028_v16 }
 0x371   : > { %7465 = vmatpush3.bf16.msra.mxu0 %v9032_v9  ;;  %7495 = vmatprep.subr.bf16.mxu1 %v9034_v6 }
 0x372   : > { %7467 = vmatprep.subr.bf16.mxu0 %v9046_v52 }
 0x373   : > { %6724 = vmatmul.mubr.msk.bf16.gmra.mrb[24].mxu0 %vm2279_vm9, %v7775_v25 }
 0x374   : > { %2341 = vmatprep.mubr.bf16.mxu0 %v11148_v53  ;;  %7497 = vmatpush3.bf16.msra.mxu1 %v9069_v27 }
 0x375   : > { %7469 = vmatpush3.bf16.msra.mxu0 %v9073_v18  ;;  %7499 = vmatprep.subr.bf16.mxu1 %v9075_v44 }
 0x376   : > { %7471 = vmatprep.subr.bf16.mxu0 %v9087_v12 }
 0x377   : > { %6727 = vmatmul.mubr.msk.bf16.gmra.mrb[24].mxu1 %vm2279_vm9, %v7775_v25 }
 0x378   : > { %2402 = vmatprep.mubr.bf16.mxu1 %v11148_v53  ;;  %7501 = vmatpush3.bf16.msra.mxu1 %v9106_v11 }
 0x379   : > { %7473 = vmatpush3.bf16.msra.mxu0 %v9110_v23  ;;  %7503 = vmatprep.subr.bf16.mxu1 %v9112_v28 }
 0x37a   : > { %7475 = vmatprep.subr.bf16.mxu0 %v9124_v32 }
 0x37b   : > { %6725 = vmatmul.mubr.msk.bf16.gmra.mrb[28].mxu0 %vm2279_vm9, %v7776_v5 }
 0x37c   : > { %7505 = vmatpush3.bf16.msra.mxu1 %v9143_v38 }
 0x37d   : > { %7477 = vmatpush3.bf16.msra.mxu0 %v9147_v8  ;;  %7507 = vmatprep.subr.bf16.mxu1 %v9149_v14 }
 0x37e   : > { %7479 = vmatprep.subr.bf16.mxu0 %v9161_v4 }
 0x37f   : > { %6728 = vmatmul.mubr.msk.bf16.gmra.mrb[28].mxu1 %vm2279_vm9, %v7776_v5 }
 0x380   : > { %7509 = vmatpush3.bf16.msra.mxu1 %v9179_v49 }
 0x381   : > { %7481 = vmatpush3.bf16.msra.mxu0 %v9183_v24  ;;  %7511 = vmatprep.subr.bf16.mxu1 %v9185_v47 }
 0x382   : > { %7483 = vmatprep.subr.bf16.mxu0 %v9194_v29 }
 0x384   : > { %7513 = vmatpush3.bf16.msra.mxu1 %v9203_v31 }
 0x385   : > { %7485 = vmatpush3.bf16.msra.mxu0 %v9207_v7  ;;  %7515 = vmatprep.subr.bf16.mxu1 %v9232_v26 }
 0x386   : > { %7487 = vmatprep.subr.bf16.mxu0 %v9221_v58 }
 0x388   : > { %7517 = vmatpush3.bf16.msra.mxu1 %v9243_v33 }
 0x389   : > { %7489 = vmatpush3.bf16.msra.mxu0 %v9234_v34  ;;  %7519 = vmatprep.subr.bf16.mxu1 %v9254_v13 }
 0x38a   : > { %7523 = vmatprep.subr.bf16.mxu0 %v8952_v40 }
 0x38c   : > { %7521 = vmatpush3.bf16.msra.mxu1 %v9262_v51 }
 0x38d   : > { %7555 = vmatprep.subr.bf16.mxu1 %v8996_v15 }
 0x43e   : > { %v2323_v36 = vpop.f32.mrb[20].mxu0 }
 0x43f   : > { %v9496_v41 = vadd.f32 %v2323_v36, %v2244_v20  ;;  %v2325_v62 = vpop.f32.mrb[21].mxu0 }
 0x440   : > { %v9498_v61 = vadd.f32 %v2325_v62, %v2244_v20  ;;  %v2327_v30 = vpop.f32.mrb[22].mxu0  ;;  %v2259_v62 = vpop.permute.xlu0 %2258 }
 0x441   : > { %v2329_v45 = vpop.f32.mrb[23].mxu0  ;;  %v9508_v59 = vadd.f32 %v2327_v30, %v2249_v48 }
 0x442   : > { %v9500_v60 = vadd.f32 %v2329_v45, %v2249_v48  ;;  %v2384_v2 = vpop.f32.mrb[20].mxu1  ;;  %2475 = vmatprep.mubr.f32.mxu0 %v9498_v61 }
 0x443   : > { %v2386_v10 = vpop.f32.mrb[21].mxu1  ;;  %2476 = vmatmul.mubr.f32.vlgmr.msra.gmra.mrb[32].mxu0 %v9496_v41  ;;  %v9510_v37 = vadd.f32 %v2384_v2, %v2244_v20 }
 0x444   : > { %v9504_v42 = vadd.f32 %v2386_v10, %v2244_v20  ;;  %7525 = vmatpush3.bf16.msra.mxu0 %v8994_v19  ;;  %v2388_v1 = vpop.f32.mrb[22].mxu1  ;;  %2480 = vmatprep.mubr.f32.mxu0 %v9500_v60 }
 0x445   : > { %v2390_v22 = vpop.f32.mrb[23].mxu1  ;;  %7527 = vmatprep.subr.bf16.mxu0 %v9007_v3  ;;  %v9524_v30 = vadd.f32 %v2388_v1, %v2249_v48 }
 0x446   : > { %v9513_v43 = vadd.f32 %v2390_v22, %v2249_v48  ;;  %v2333_v54 = vpop.f32.mrb[24].mxu0  ;;  %2565 = vmatprep.mubr.f32.mxu1 %v9504_v42 }
 0x447   : > { %v9516_v25 = vadd.f32 %v2333_v54, %v2254_v39  ;;  %v2335_v5 = vpop.f32.mrb[25].mxu0  ;;  %2481 = vmatmul.mubr.f32.gmra.mrb[34].mxu0 %v9508_v59  ;;  %2566 = vmatmul.mubr.f32.vlgmr.msra.gmra.mrb[32].mxu1 %v9510_v37 }
 0x448   : > { %v9520_v36 = vadd.f32 %v2335_v5, %v2254_v39  ;;  %7529 = vmatpush3.bf16.msra.mxu0 %v9032_v9  ;;  %7557 = vmatpush3.bf16.msra.mxu1 %v9028_v16  ;;  %v2337_v20 = vpop.f32.mrb[26].mxu0 }
 0x449   : > { %2570 = vmatprep.mubr.f32.mxu1 %v9513_v43  ;;  %v2339_v45 = vpop.f32.mrb[27].mxu0  ;;  %7531 = vmatprep.subr.bf16.mxu0 %v9046_v52  ;;  %v9540_v5 = vadd.f32 %v2337_v20, %v2259_v62 }
 0x44a   : > { %v9528_v2 = vadd.f32 %v2339_v45, %v2259_v62  ;;  %v2394_v10 = vpop.f32.mrb[24].mxu1  ;;  %2485 = vmatprep.mubr.f32.mxu0 %v9520_v36  ;;  %7559 = vmatprep.subr.bf16.mxu1 %v9034_v6 }
 0x44b   : > { %v9532_v22 = vadd.f32 %v2394_v10, %v2254_v39  ;;  %v2396_v54 = vpop.f32.mrb[25].mxu1  ;;  %2486 = vmatmul.mubr.f32.gmra.mrb[36].mxu0 %v9516_v25  ;;  %2571 = vmatmul.mubr.f32.gmra.mrb[34].mxu1 %v9524_v30  ;;  %v2264_v10 = vpop.permute.xlu1 %2263 }
 0x44c   : > { %v9536_v48 = vadd.f32 %v2396_v54, %v2254_v39  ;;  %7533 = vmatpush3.bf16.msra.mxu0 %v9073_v18  ;;  %7561 = vmatpush3.bf16.msra.mxu1 %v9069_v27  ;;  %v2398_v1 = vpop.f32.mrb[26].mxu1 }
 0x44d   : > { %2490 = vmatprep.mubr.f32.mxu0 %v9528_v2  ;;  %v2400_v45 = vpop.f32.mrb[27].mxu1  ;;  %7535 = vmatprep.subr.bf16.mxu0 %v9087_v12  ;;  %v9556_v12 = vadd.f32 %v2398_v1, %v2259_v62 }
 0x44e   : > { %v9544_v50 = vadd.f32 %v2400_v45, %v2259_v62  ;;  %v2343_v0 = vpop.f32.mrb[28].mxu0  ;;  %2575 = vmatprep.mubr.f32.mxu1 %v9536_v48  ;;  %7563 = vmatprep.subr.bf16.mxu1 %v9075_v44 }
 0x44f   : > { %v9548_v39 = vadd.f32 %v2343_v0, %v2264_v10  ;;  %v2345_v54 = vpop.f32.mrb[29].mxu0  ;;  %2491 = vmatmul.mubr.f32.gmra.mrb[38].mxu0 %v9540_v5  ;;  %2576 = vmatmul.mubr.f32.gmra.mrb[36].mxu1 %v9532_v22 }
 0x450   : > { %v9552_v20 = vadd.f32 %v2345_v54, %v2264_v10  ;;  %7537 = vmatpush3.bf16.msra.mxu0 %v9110_v23  ;;  %7565 = vmatpush3.bf16.msra.mxu1 %v9106_v11  ;;  %v2347_v45 = vpop.f32.mrb[30].mxu0  ;;  %v2592_v54 = vmul.f32 %v9498_v61, %v9498_v61 }
 0x451   : > { %2580 = vmatprep.mubr.f32.mxu1 %v9544_v50  ;;  %7539 = vmatprep.subr.bf16.mxu0 %v9124_v32  ;;  %v2348_v0 = vpop.f32.mrb[31].mxu0 }
 0x452   : > { %v2404_v18 = vpop.f32.mrb[28].mxu1  ;;  %2495 = vmatprep.mubr.f32.mxu0 %v9552_v20  ;;  %7567 = vmatprep.subr.bf16.mxu1 %v9112_v28 }
 0x453   : > { %v2406_v44 = vpop.f32.mrb[29].mxu1  ;;  %2496 = vmatmul.mubr.f32.gmra.mrb[40].mxu0 %v9548_v39  ;;  %2581 = vmatmul.mubr.f32.gmra.mrb[38].mxu1 %v9556_v12  ;;  %v9570_v45 = vadd.f32 %v2404_v18, %v2264_v10  ;;  %v2591_v18 = vmul.f32 %v9496_v41, %v9496_v41 }
 0x454   : > { %v9566_v62 = vadd.f32 %v2406_v44, %v2264_v10  ;;  %7541 = vmatpush3.bf16.msra.mxu0 %v9147_v8  ;;  %7569 = vmatpush3.bf16.msra.mxu1 %v9143_v38  ;;  %v2408_v1 = vpop.f32.mrb[30].mxu1  ;;  %v2594_v44 = vmul.f32 %v9504_v42, %v9504_v42  ;;  %v2596_v10 = vmul.f32 %v9500_v60, %v9500_v60 }
 0x455   : > { %2675 = vmatprep.mubr.f32.mxu0 %v2592_v54  ;;  %7543 = vmatprep.subr.bf16.mxu0 %v9161_v4  ;;  %v2409_v0 = vpop.f32.mrb[31].mxu1  ;;  %v2593_v54 = vmul.f32 %v9510_v37, %v9510_v37  ;;  %v2595_v1 = vmul.f32 %v9508_v59, %v9508_v59 }
 0x456   : > { %2585 = vmatprep.mubr.f32.mxu1 %v9566_v62  ;;  %7571 = vmatprep.subr.bf16.mxu1 %v9149_v14  ;;  %v2600_v0 = vmul.f32 %v9520_v36, %v9520_v36 }
 0x457   : > { %2586 = vmatmul.mubr.f32.gmra.mrb[40].mxu1 %v9570_v45 }
 0x458   : > { %7545 = vmatpush3.bf16.msra.mxu0 %v9183_v24  ;;  %7573 = vmatpush3.bf16.msra.mxu1 %v9179_v49 }
 0x459   : > { %2765 = vmatprep.mubr.f32.mxu1 %v2594_v44  ;;  %7547 = vmatprep.subr.bf16.mxu0 %v9194_v29  ;;  %v2598_v44 = vmul.f32 %v9513_v43, %v9513_v43 }
 0x45a   : > { %7575 = vmatprep.subr.bf16.mxu1 %v9185_v47 }
 0x45c   : > { %7549 = vmatpush3.bf16.msra.mxu0 %v9207_v7  ;;  %7577 = vmatpush3.bf16.msra.mxu1 %v9203_v31 }
 0x45d   : > { %7551 = vmatprep.subr.bf16.mxu0 %v9221_v58  ;;  %7579 = vmatprep.subr.bf16.mxu1 %v9232_v26 }
 0x460   : > { %7553 = vmatpush3.bf16.msra.mxu0 %v9234_v34  ;;  %7581 = vmatpush3.bf16.msra.mxu1 %v9243_v33  ;;  %v2602_v34 = vmul.f32 %v9536_v48, %v9536_v48 }
 0x461   : > { %7583 = vmatprep.subr.bf16.mxu1 %v9254_v13 }
 0x463   : > { %2676 = vmatmul.mubr.f32.vlgmr.msra.gmra.mrb[42].mxu0 %v2591_v18  ;;  %v2599_v18 = vmul.f32 %v9516_v25, %v9516_v25 }
 0x464   : > { %2680 = vmatprep.mubr.f32.mxu0 %v2596_v10  ;;  %7585 = vmatpush3.bf16.msra.mxu1 %v9262_v51  ;;  %v2597_v10 = vmul.f32 %v9524_v30, %v9524_v30  ;;  %v2604_v51 = vmul.f32 %v9528_v2, %v9528_v2 }
 0x467   : > { %2681 = vmatmul.mubr.f32.gmra.mrb[44].mxu0 %v2595_v1  ;;  %2766 = vmatmul.mubr.f32.vlgmr.msra.gmra.mrb[42].mxu1 %v2593_v54  ;;  %v2603_v54 = vmul.f32 %v9540_v5, %v9540_v5  ;;  %v2601_v1 = vmul.f32 %v9532_v22, %v9532_v22 }
 0x468   : > { %2685 = vmatprep.mubr.f32.mxu0 %v2600_v0  ;;  %2770 = vmatprep.mubr.f32.mxu1 %v2598_v44  ;;  %v2608_v0 = vmul.f32 %v9552_v20, %v9552_v20  ;;  %v2606_v44 = vmul.f32 %v9544_v50, %v9544_v50 }
 0x46b   : > { %2686 = vmatmul.mubr.f32.gmra.mrb[46].mxu0 %v2599_v18  ;;  %2771 = vmatmul.mubr.f32.gmra.mrb[44].mxu1 %v2597_v10  ;;  %v2610_v18 = vmul.f32 %v9566_v62, %v9566_v62  ;;  %v2609_v10 = vmul.f32 %v9570_v45, %v9570_v45 }
 0x46c   : > { %2690 = vmatprep.mubr.f32.mxu0 %v2604_v51  ;;  %2775 = vmatprep.mubr.f32.mxu1 %v2602_v34  ;;  %v2607_v51 = vmul.f32 %v9548_v39, %v9548_v39  ;;  %v2605_v34 = vmul.f32 %v9556_v12, %v9556_v12 }
 0x46f   : > { %2691 = vmatmul.mubr.f32.gmra.mrb[48].mxu0 %v2603_v54  ;;  %2776 = vmatmul.mubr.f32.gmra.mrb[46].mxu1 %v2601_v1  ;;  %v11046_v54 = vmov 0.0|0.0   ;;  %v11055_v1 = vmov 0.0  }
 0x470   : > { %2695 = vmatprep.mubr.f32.mxu0 %v2608_v0  ;;  %2780 = vmatprep.mubr.f32.mxu1 %v2606_v44 }
 0x471   : > { %7586 = vmatprep.subr.bf16.mxu0 %v11046_v54  ;;  %7678 = vmatprep.subr.bf16.mxu1 %v11046_v54 }
 0x473   : > { %2696 = vmatmul.mubr.f32.gmra.mrb[50].mxu0 %v2607_v51  ;;  %2781 = vmatmul.mubr.f32.gmra.mrb[48].mxu1 %v2605_v34 }
 0x474   : > { %2785 = vmatprep.mubr.f32.mxu1 %v2610_v18  ;;  %7320 = vmatprep.mubr.msk.f32.mxu0 %vm7970_vm10, %v11055_v1 }
 0x477   : > { %2786 = vmatmul.mubr.f32.gmra.mrb[50].mxu1 %v2609_v10 }
 0x478   : > { %7348 = vmatprep.mubr.msk.f32.mxu1 %vm7970_vm10, %v11055_v1 }
 0x516   : > { %v7026_v0 = vpop.f32.mrb[32].mxu0 }
 0x517   : > { %v7027_v44 = vpop.f32.mrb[33].mxu0 }
 0x518   : > { %v7028_v51 = vadd.f32 %v7027_v44, %v7026_v0 }
 0x51a   : > { %v7029_v34 = vpop.f32.mrb[34].mxu0  ;;  %v7073_v18 = vpop.f32.mrb[32].mxu1 }
 0x51b   : > { %v7030_v13 = vpop.f32.mrb[35].mxu0  ;;  %v7074_v10 = vpop.f32.mrb[33].mxu1 }
 0x51c   : > { %v7031_v58 = vadd.f32 %v7030_v13, %v7029_v34  ;;  %v7075_v33 = vadd.f32 %v7074_v10, %v7073_v18 }
 0x51e   : > { %v2568_v7 = vadd.f32 %v7075_v33, %v7028_v51  ;;  %v7076_v26 = vpop.f32.mrb[34].mxu1  ;;  %v7032_v54 = vpop.f32.mrb[36].mxu0  ;;  %v11208_v51 = vmov 0.0|0.0  }
 0x51f   : > { %v7077_v29 = vpop.f32.mrb[35].mxu1  ;;  %v7033_v31 = vpop.f32.mrb[37].mxu0 }
 0x520   : > { %v7078_v24 = vadd.f32 %v7077_v29, %v7076_v26  ;;  %v7034_v47 = vadd.f32 %v7033_v31, %v7032_v54 }
 0x522   : > { %v2573_v4 = vadd.f32 %v7078_v24, %v7031_v58  ;;  %v7035_v49 = vpop.f32.mrb[38].mxu0  ;;  %v7079_v8 = vpop.f32.mrb[36].mxu1 }
 0x523   : > { %v7036_v1 = vpop.f32.mrb[39].mxu0  ;;  %v7080_v14 = vpop.f32.mrb[37].mxu1 }
 0x524   : > { %v7587_v32 = vpack.c.bf16 %v2573_v4, %v2568_v7  ;;  %v7037_v0 = vadd.f32 %v7036_v1, %v7035_v49  ;;  %v7081_v44 = vadd.f32 %v7080_v14, %v7079_v8  ;;  %v11209_v4 = vmov 0.0   ;;  %v2792_v14 = vld [vmem:[%s10935_s9 + $0x8] sm:$0xff] }
 0x526   : > { %v2578_v38 = vadd.f32 %v7081_v44, %v7034_v47  ;;  %v7082_v23 = vpop.f32.mrb[38].mxu1  ;;  %7588 = vmatpush3.bf16.msra.mxu0 %v7587_v32  ;;  %v7038_v13 = vpop.f32.mrb[40].mxu0  ;;  %v9637_v47 = vld [vmem:[%s10935_s9] sm:$0xff] }
 0x527   : > { %v7083_v34 = vpop.f32.mrb[39].mxu1  ;;  %v7039_v33 = vpop.f32.mrb[41].mxu0  ;;  %7589 = vmatprep.subr.bf16.mxu0 %v11208_v51 }
 0x528   : > { %v7084_v18 = vadd.f32 %v7083_v34, %v7082_v23  ;;  %v7040_v10 = vadd.f32 %v7039_v33, %v7038_v13  ;;  %v2794_v34 = vld [vmem:[%s10935_s9 + $0x18] sm:$0xff] }
 0x52a   : > { %v2583_v26 = vadd.f32 %v7084_v18, %v7037_v0  ;;  %v7085_v29 = vpop.f32.mrb[40].mxu1 }
 0x52b   : > { %v7086_v24 = vpop.f32.mrb[41].mxu1 }
 0x52c   : > { %v7590_v31 = vpack.c.bf16 %v2583_v26, %v2578_v38  ;;  %v7087_v58 = vadd.f32 %v7086_v24, %v7085_v29  ;;  %v2793_v38 = vld [vmem:[%s10935_s9 + $0x10] sm:$0xff] }
 0x52e   : > { %v2588_v54 = vadd.f32 %v7087_v58, %v7040_v10  ;;  %7591 = vmatpush3.bf16.msra.mxu0 %v7590_v31  ;;  %v2795_v58 = vld [vmem:[%s10935_s9 + $0x20] sm:$0xf] }
 0x52f   : > { %7318 = vmatprep.subr.mxu0 %v11209_v4 }
 0x532   : > { %7319 = vmatpush3.msk.msra.mxu0 %vm2812_vm11, %v2588_v54 }
 0x533   : > { %7321 = vmatmul.mubr.msk.f32.vlgmr.msra.gmra.mrb[52].mxu0 %vm2796_vm12, %v9637_v47  ;;  %7592 = vmatprep.subr.bf16.mxu0 %v11208_v51 }
 0x534   : > { %7323 = vmatprep.mubr.msk.f32.mxu0 %vm7970_vm10, %v11209_v4 }
 0x536   : > { %v7120_v8 = vpop.f32.mrb[42].mxu0 }
 0x537   : > { %v7121_v23 = vpop.f32.mrb[43].mxu0  ;;  %7324 = vmatmul.mubr.msk.f32.gmra.mrb[54].mxu0 %vm2796_vm12, %v2792_v14 }
 0x538   : > { %v7122_v32 = vadd.f32 %v7121_v23, %v7120_v8  ;;  %7326 = vmatprep.mubr.msk.f32.mxu0 %vm7970_vm10, %v11209_v4 }
 0x53a   : > { %v7123_v49 = vpop.f32.mrb[44].mxu0  ;;  %v7167_v7 = vpop.f32.mrb[42].mxu1 }
 0x53b   : > { %v7124_v1 = vpop.f32.mrb[45].mxu0  ;;  %v7168_v0 = vpop.f32.mrb[43].mxu1  ;;  %7327 = vmatmul.mubr.msk.f32.gmra.mrb[56].mxu0 %vm2796_vm12, %v2793_v38 }
 0x53c   : > { %v7125_v44 = vadd.f32 %v7124_v1, %v7123_v49  ;;  %v7169_v13 = vadd.f32 %v7168_v0, %v7167_v7  ;;  %7329 = vmatprep.mubr.msk.f32.mxu0 %vm7970_vm10, %v11209_v4 }
 0x53e   : > { %v2768_v33 = vadd.f32 %v7169_v13, %v7122_v32  ;;  %v7126_v18 = vpop.f32.mrb[46].mxu0  ;;  %v7170_v10 = vpop.f32.mrb[44].mxu1 }
 0x53f   : > { %v7127_v26 = vpop.f32.mrb[47].mxu0  ;;  %v7171_v29 = vpop.f32.mrb[45].mxu1  ;;  %7330 = vmatmul.mubr.msk.f32.gmra.mrb[58].mxu0 %vm2796_vm12, %v2794_v34 }
 0x540   : > { %v7128_v24 = vadd.f32 %v7127_v26, %v7126_v18  ;;  %v7172_v31 = vadd.f32 %v7171_v29, %v7170_v10  ;;  %7332 = vmatprep.mubr.msk.f32.mxu0 %vm7970_vm10, %v11209_v4 }
 0x542   : > { %v2773_v54 = vadd.f32 %v7172_v31, %v7125_v44  ;;  %v7129_v8 = vpop.f32.mrb[48].mxu0  ;;  %v7173_v23 = vpop.f32.mrb[46].mxu1 }
 0x543   : > { %v7130_v49 = vpop.f32.mrb[49].mxu0  ;;  %v7174_v32 = vpop.f32.mrb[47].mxu1  ;;  %7333 = vmatmul.mubr.msk.f32.gmra.mrb[60].mxu0 %vm2796_vm12, %v2795_v58 }
 0x544   : > { %v7593_v7 = vpack.c.bf16 %v2773_v54, %v2768_v33  ;;  %v7131_v1 = vadd.f32 %v7130_v49, %v7129_v8  ;;  %v7175_v0 = vadd.f32 %v7174_v32, %v7173_v23  ;;  %7345 = vmatprep.mubr.msk.f32.mxu0 %vm7970_vm10, %v11209_v4 }
 0x546   : > { %v2778_v13 = vadd.f32 %v7175_v0, %v7128_v24  ;;  %v7132_v18 = vpop.f32.mrb[50].mxu0  ;;  %v7176_v10 = vpop.f32.mrb[48].mxu1  ;;  %7594 = vmatpush3.bf16.msra.mxu0 %v7593_v7  ;;  %7681 = vmatpush3.bf16.msra.mxu1 %v7593_v7 }
 0x547   : > { %v7133_v26 = vpop.f32.mrb[51].mxu0  ;;  %v7177_v29 = vpop.f32.mrb[49].mxu1  ;;  %7595 = vmatprep.subr.bf16.mxu0 %v11208_v51  ;;  %7679 = vmatprep.subr.bf16.mxu1 %v11208_v51 }
 0x548   : > { %v7134_v44 = vadd.f32 %v7133_v26, %v7132_v18  ;;  %v7178_v31 = vadd.f32 %v7177_v29, %v7176_v10 }
 0x54a   : > { %v2783_v28 = vadd.f32 %v7178_v31, %v7131_v1  ;;  %v7179_v33 = vpop.f32.mrb[50].mxu1 }
 0x54b   : > { %v7180_v54 = vpop.f32.mrb[51].mxu1 }
 0x54c   : > { %v7596_v8 = vpack.c.bf16 %v2783_v28, %v2778_v13  ;;  %v7181_v23 = vadd.f32 %v7180_v54, %v7179_v33  ;;  %v7972_v28 = vmov 1983009808  }
 0x54d   : > { %v3103_v51 = vunpack.c.l.s4 %v7972_v28 }
 0x54e   : > { %v2788_v49 = vadd.f32 %v7181_v23, %v7134_v44  ;;  %7597 = vmatpush3.bf16.msra.mxu0 %v7596_v8  ;;  %7682 = vmatpush3.bf16.msra.mxu1 %v7596_v8 }
 0x54f   : > { %7343 = vmatprep.subr.mxu0 %v11209_v4  ;;  %7680 = vmatprep.subr.mxu1 %v11209_v4 }
 0x552   : > { %7344 = vmatpush3.msk.msra.mxu0 %vm2812_vm11, %v2788_v49  ;;  %7683 = vmatpush3.msk.msra.mxu1 %vm2812_vm11, %v2788_v49 }
 0x553   : > { %7346 = vmatmul.mubr.msk.f32.vlgmr.msra.gmra.mrb[62].mxu0 %vm2796_vm12, %v9637_v47  ;;  %7349 = vmatmul.mubr.msk.f32.vlgmr.msra.gmra.mrb[52].mxu1 %vm2796_vm12, %v2792_v14  ;;  %v3104_v47 = vunpack.c.0.s8 %v3103_v51  ;;  %v3099_v14 = vld [vmem:[%s10929_s3] sm:$0xff] }
 0x554   : > { %7351 = vmatprep.mubr.msk.f32.mxu1 %vm7970_vm10, %v11209_v4  ;;  %3207 = vmatprep.mubr.f32.mxu0 %v11209_v4 }
 0x555   : > { %v3107_v24 = vsub.s32 %v3104_v47, %v8238_v17 }
 0x557   : > { %7352 = vmatmul.mubr.msk.f32.gmra.mrb[54].mxu1 %vm2796_vm12, %v2793_v38  ;;  %v3101_v38 = vcombine.high %v3099_v14, %v3099_v14 }
 0x558   : > { %7354 = vmatprep.mubr.msk.f32.mxu1 %vm7970_vm10, %v11209_v4 }
 0x559   : > { %v9693_v32 = vrot.slane %v3101_v38, %v3107_v24 }
 0x55b   : > { %7355 = vmatmul.mubr.msk.f32.gmra.mrb[56].mxu1 %vm2796_vm12, %v2794_v34  ;;  %11210 = vst [vmem:[#allocation126_spill] sm:$0xff] %v9693_v32  ;;  %v9695_v34 = vrot.slane %v3099_v14, %v3107_v24  ;;  %v9699_v7 = vcombine.high %v9693_v32, %v9693_v32 }
 0x55c   : > { %7357 = vmatprep.mubr.msk.f32.mxu1 %vm7970_vm10, %v11209_v4 }
 0x55d   : > { %11211 = vst [vmem:[#allocation127_spill] sm:$0xff] %v9695_v34  ;;  %11212 = vst [vmem:[#allocation128_spill] sm:$0xff] %v9699_v7  ;;  %6748 = vmatprep.subr.msk.mxu1 %vm3134_vm13, %v9699_v7 }
 0x55e   : > { %6749 = vmatpush1.msk.msra.mxu1 %vm3134_vm13, %v9693_v32 }
 0x55f   : > { %7358 = vmatmul.mubr.msk.f32.gmra.mrb[58].mxu1 %vm2796_vm12, %v2795_v58  ;;  %v9703_v58 = vcombine.high %v9695_v34, %v9695_v34  ;;  %6762 = vmatprep.subr.msk.mxu1 %vm3134_vm13, %v9699_v7 }
 0x560   : > { %3302 = vmatprep.mubr.f32.mxu1 %v11209_v4 }
 0x561   : > { %11213 = vst [vmem:[#allocation129_spill] sm:$0xff] %v9703_v58  ;;  %6741 = vmatprep.subr.msk.mxu0 %vm3134_vm13, %v9703_v58 }
 0x562   : > { %6742 = vmatpush1.msk.msra.mxu0 %vm3134_vm13, %v9695_v34 }
 0x563   : > { %6755 = vmatprep.subr.msk.mxu0 %vm3134_vm13, %v9703_v58 }
 0x606   : > { %v2882_v17 = vpop.f32.mrb[52].mxu0 }
 0x607   : > { %v7322_v1 = vpop.f32.mrb[53].mxu0  ;;  %v2999_v33 = vmul.f32 %v2882_v17, %v2882_v17 }
 0x60a   : > { %v2887_v0 = vpop.f32.mrb[54].mxu0 }
 0x60b   : > { %v7325_v13 = vpop.f32.mrb[55].mxu0  ;;  %v3000_v54 = vmul.f32 %v2887_v0, %v2887_v0 }
 0x60e   : > { %v2892_v18 = vpop.f32.mrb[56].mxu0 }
 0x60f   : > { %v7328_v10 = vpop.f32.mrb[57].mxu0  ;;  %v3001_v14 = vmul.f32 %v2892_v18, %v2892_v18 }
 0x612   : > { %v9717_v26 = vpop.f32.mrb[58].mxu0 }
 0x613   : > { %v7331_v29 = vpop.f32.mrb[59].mxu0 }
 0x614   : > { %v3002_v29 = vmul.f32 %v9717_v26, %v9717_v26 }
 0x616   : > { %v9719_v44 = vpop.f32.mrb[60].mxu0 }
 0x617   : > { %v7334_v31 = vpop.f32.mrb[61].mxu0 }
 0x626   : > { %v2975_v8 = vpop.f32.mrb[62].mxu0  ;;  %v2980_v23 = vpop.f32.mrb[52].mxu1 }
 0x627   : > { %v3004_v49 = vsub.f32 %v2975_v8, %v2999_v33  ;;  %v3005_v28 = vsub.f32 %v2980_v23, %v3000_v54  ;;  %v7347_v51 = vpop.f32.mrb[63].mxu0  ;;  %v7350_v47 = vpop.f32.mrb[53].mxu1  ;;  %v3003_v8 = vmul.f32 %v9719_v44, %v9719_v44 }
 0x629   : > { %v3009_v38 = vmax.f32 %v3004_v49, 0.0  ;;  %v3010_v24 = vmax.f32 %v3005_v28, 0.0 }
 0x62a   : > { %v2985_v1 = vpop.f32.mrb[54].mxu1 }
 0x62b   : > { %v3014_v13 = vadd.f32 1e-05, %v3009_v38  ;;  %v3015_v10 = vadd.f32 1e-05, %v3010_v24  ;;  %v3006_v7 = vsub.f32 %v2985_v1, %v3001_v14  ;;  %v7353_v58 = vpop.f32.mrb[55].mxu1  ;;  %v3037_v1 = vpop.permute.xlu1 %3036 }
 0x62c   : > { %v3032_v58 = vpop.permute.xlu0 %3031 }
 0x62d   : > { %7798 = vrsqrt.f32 %v3014_v13  ;;  %v3011_v31 = vmax.f32 %v3006_v7, 0.0 }
 0x62e   : > { %7800 = vrsqrt.f32 %v3015_v10  ;;  %v2990_v11 = vpop.f32.mrb[56].mxu1 }
 0x62f   : > { %v3016_v52 = vadd.f32 1e-05, %v3011_v31  ;;  %v3007_v33 = vsub.f32 %v2990_v11, %v3002_v29  ;;  %v7356_v54 = vpop.f32.mrb[57].mxu1 }
 0x630   : > { %v3042_v29 = vpop.permute.xlu0 %3041 }
 0x631   : > { %7802 = vrsqrt.f32 %v3016_v52  ;;  %v3012_v23 = vmax.f32 %v3007_v33, 0.0 }
 0x632   : > { %v2995_v49 = vpop.f32.mrb[58].mxu1 }
 0x633   : > { %v3017_v28 = vadd.f32 1e-05, %v3012_v23  ;;  %v3008_v51 = vsub.f32 %v2995_v49, %v3003_v8  ;;  %v7359_v47 = vpop.f32.mrb[59].mxu1  ;;  %v3047_v8 = vpop.permute.xlu1 %3046 }
 0x635   : > { %7804 = vrsqrt.f32 %v3017_v28  ;;  %v3013_v14 = vmax.f32 %v3008_v51, 0.0  ;;  %v3052_v28 = vpop.permute.xlu0 %3051 }
 0x637   : > { %v7799_v38 = vpop.eup %7798  ;;  %v3018_v24 = vadd.f32 1e-05, %v3013_v14 }
 0x638   : > { %v7801_v7 = vpop.eup %7800  ;;  %v3054_v13 = vmul.f32 %v7799_v38, %v3032_v58 }
 0x639   : > { %7806 = vrsqrt.f32 %v3018_v24  ;;  %v3055_v11 = vmul.f32 %v7801_v7, %v3037_v1  ;;  %v3077_v58 = vpop.permute.xlu0 %3076 }
 0x63a   : > { %v3064_v10 = vmul.f32 %v3054_v13, %v2882_v17  ;;  %6743 = vmatmul.mubr.msk.f32.vlgmr.msra.gmra.mrb[64].mxu0 %vm3118_vm14, %v3054_v13  ;;  %6750 = vmatmul.mubr.msk.f32.vlgmr.msra.gmra.mrb[60].mxu1 %vm3118_vm14, %v3054_v13 }
 0x63b   : > { %v7803_v52 = vpop.eup %7802  ;;  %3213 = vmatprep.mubr.f32.mxu0 %v11209_v4  ;;  %3308 = vmatprep.mubr.f32.mxu1 %v11209_v4  ;;  %v3065_v31 = vmul.f32 %v3055_v11, %v2887_v0 }
 0x63c   : > { %v3056_v33 = vmul.f32 %v7803_v52, %v3042_v29  ;;  %6756 = vmatpush1.msk.msra.mxu0 %vm3134_vm13, %v9695_v34  ;;  %6763 = vmatpush1.msk.msra.mxu1 %vm3134_vm13, %v9693_v32 }
 0x63d   : > { %v3087_v24 = vpop.permute.xlu0 %3086 }
 0x63e   : > { %6744 = vmatmul.mubr.msk.f32.gmra.mrb[66].mxu0 %vm3118_vm14, %v3055_v11  ;;  %6751 = vmatmul.mubr.msk.f32.gmra.mrb[62].mxu1 %vm3118_vm14, %v3055_v11  ;;  %v3066_v17 = vmul.f32 %v3056_v33, %v2892_v18 }
 0x63f   : > { %v7805_v54 = vpop.eup %7804  ;;  %3219 = vmatprep.mubr.f32.mxu0 %v11209_v4  ;;  %3314 = vmatprep.mubr.f32.mxu1 %v11209_v4 }
 0x640   : > { %v3057_v23 = vmul.f32 %v7805_v54, %v3047_v8 }
 0x642   : > { %6745 = vmatmul.mubr.msk.f32.gmra.mrb[68].mxu0 %vm3118_vm14, %v3056_v33  ;;  %6752 = vmatmul.mubr.msk.f32.gmra.mrb[64].mxu1 %vm3118_vm14, %v3056_v33  ;;  %v3067_v0 = vmul.f32 %v3057_v23, %v9717_v26  ;;  %v3072_v26 = vpop.permute.xlu1 %3071 }
 0x643   : > { %v7807_v49 = vpop.eup %7806  ;;  %3225 = vmatprep.mubr.f32.mxu0 %v11209_v4  ;;  %3320 = vmatprep.mubr.f32.mxu1 %v11209_v4  ;;  %v3094_v47 = vsub.f32 %v3072_v26, %v3064_v10 }
 0x644   : > { %v3058_v18 = vmul.f32 %v7807_v49, %v3052_v28  ;;  %v3097_v7 = vsub.f32 %v3087_v24, %v3067_v0 }
 0x646   : > { %6746 = vmatmul.mubr.msk.f32.gmra.mrb[70].mxu0 %vm3118_vm14, %v3057_v23  ;;  %6753 = vmatmul.mubr.msk.f32.gmra.mrb[66].mxu1 %vm3118_vm14, %v3057_v23  ;;  %v3068_v51 = vmul.f32 %v3058_v18, %v9719_v44  ;;  %v3095_v44 = vsub.f32 %v3077_v58, %v3065_v31  ;;  %v3082_v14 = vpop.permute.xlu1 %3081 }
 0x647   : > { %3231 = vmatprep.mubr.f32.mxu0 %v11209_v4  ;;  %3326 = vmatprep.mubr.f32.mxu1 %v11209_v4  ;;  %v3096_v38 = vsub.f32 %v3082_v14, %v3066_v17 }
 0x64a   : > { %6747 = vmatmul.mubr.msk.f32.gmra.mrb[72].mxu0 %vm3118_vm14, %v3058_v18  ;;  %6754 = vmatmul.mubr.msk.f32.gmra.mrb[68].mxu1 %vm3118_vm14, %v3058_v18  ;;  %v3092_v1 = vpop.permute.xlu1 %3091 }
 0x64b   : > { %3412 = vmatprep.mubr.f32.mxu0 %v11209_v4  ;;  %3507 = vmatprep.mubr.f32.mxu1 %v11209_v4  ;;  %v3098_v13 = vsub.f32 %v3092_v1, %v3068_v51 }
 0x64e   : > { %6757 = vmatmul.mubr.msk.f32.vlgmr.msra.gmra.mrb[74].mxu0 %vm3118_vm14, %v3094_v47  ;;  %6764 = vmatmul.mubr.msk.f32.vlgmr.msra.gmra.mrb[70].mxu1 %vm3118_vm14, %v3094_v47 }
 0x64f   : > { %3418 = vmatprep.mubr.f32.mxu0 %v11209_v4  ;;  %3513 = vmatprep.mubr.f32.mxu1 %v11209_v4 }
 0x652   : > { %6758 = vmatmul.mubr.msk.f32.gmra.mrb[76].mxu0 %vm3118_vm14, %v3095_v44  ;;  %6765 = vmatmul.mubr.msk.f32.gmra.mrb[72].mxu1 %vm3118_vm14, %v3095_v44 }
 0x653   : > { %3424 = vmatprep.mubr.f32.mxu0 %v11209_v4  ;;  %3519 = vmatprep.mubr.f32.mxu1 %v11209_v4 }
 0x656   : > { %6759 = vmatmul.mubr.msk.f32.gmra.mrb[78].mxu0 %vm3118_vm14, %v3096_v38  ;;  %6766 = vmatmul.mubr.msk.f32.gmra.mrb[74].mxu1 %vm3118_vm14, %v3096_v38 }
 0x657   : > { %3430 = vmatprep.mubr.f32.mxu0 %v11209_v4  ;;  %3525 = vmatprep.mubr.f32.mxu1 %v11209_v4 }
 0x65a   : > { %6760 = vmatmul.mubr.msk.f32.gmra.mrb[80].mxu0 %vm3118_vm14, %v3097_v7  ;;  %6767 = vmatmul.mubr.msk.f32.gmra.mrb[76].mxu1 %vm3118_vm14, %v3097_v7 }
 0x65b   : > { %3436 = vmatprep.mubr.f32.mxu0 %v11209_v4  ;;  %3531 = vmatprep.mubr.f32.mxu1 %v11209_v4 }
 0x65e   : > { %6761 = vmatmul.mubr.msk.f32.gmra.mrb[82].mxu0 %vm3118_vm14, %v3098_v13  ;;  %6768 = vmatmul.mubr.msk.f32.gmra.mrb[78].mxu1 %vm3118_vm14, %v3098_v13 }
 0x65f   : > { %3814 = vmatprep.mubr.bf16.mxu0 %v11148_v53  ;;  %4027 = vmatprep.mubr.bf16.mxu1 %v11148_v53 }
 0x70d   : > { %v3209_v11 = vpop.f32.mrb[64].mxu0  ;;  %v3304_v10 = vpop.f32.mrb[60].mxu1 }
 0x70e   : > { %v3211_v52 = vpop.f32.mrb[65].mxu0  ;;  %v3306_v29 = vpop.f32.mrb[61].mxu1  ;;  %v3538_v38 = vmul.f32 %v3209_v11, %v9496_v41  ;;  %v3540_v24 = vmul.f32 %v3304_v10, %v9510_v37 }
 0x70f   : > { %v3539_v7 = vmul.f32 %v3211_v52, %v9498_v61  ;;  %v3541_v1 = vmul.f32 %v3306_v29, %v9504_v42 }
 0x711   : > { %v3215_v31 = vpop.f32.mrb[66].mxu0  ;;  %v3310_v33 = vpop.f32.mrb[62].mxu1 }
 0x712   : > { %v3217_v17 = vpop.f32.mrb[67].mxu0  ;;  %v3312_v54 = vpop.f32.mrb[63].mxu1  ;;  %v3542_v16 = vmul.f32 %v3215_v31, %v9508_v59  ;;  %v3544_v19 = vmul.f32 %v3310_v33, %v9524_v30 }
 0x713   : > { %v3543_v41 = vmul.f32 %v3217_v17, %v9500_v60  ;;  %v3545_v37 = vmul.f32 %v3312_v54, %v9513_v43 }
 0x715   : > { %v3221_v8 = vpop.f32.mrb[68].mxu0  ;;  %v3316_v23 = vpop.f32.mrb[64].mxu1 }
 0x716   : > { %v3223_v0 = vpop.f32.mrb[69].mxu0  ;;  %v3318_v49 = vpop.f32.mrb[65].mxu1 }
 0x717   : > { %v3547_v30 = vmul.f32 %v3223_v0, %v9520_v36  ;;  %v3549_v60 = vmul.f32 %v3318_v49, %v9536_v48 }
 0x719   : > { %v3227_v28 = vpop.f32.mrb[70].mxu0  ;;  %v3322_v18 = vpop.f32.mrb[66].mxu1 }
 0x71a   : > { %v3229_v51 = vpop.f32.mrb[71].mxu0  ;;  %v3324_v26 = vpop.f32.mrb[67].mxu1 }
 0x71b   : > { %v3551_v36 = vmul.f32 %v3229_v51, %v9528_v2 }
 0x71d   : > { %v3233_v47 = vpop.f32.mrb[72].mxu0  ;;  %v3328_v58 = vpop.f32.mrb[68].mxu1 }
 0x71e   : > { %v3235_v44 = vpop.f32.mrb[73].mxu0  ;;  %v3330_v14 = vpop.f32.mrb[69].mxu1 }
 0x71f   : > { %v3557_v2 = vmul.f32 %v3330_v14, %v9566_v62  ;;  %v11215_v14 = vld [vmem:[#allocation12_spill] sm:$0xff] }
 0x721   : > { %v3414_v13 = vpop.f32.mrb[74].mxu0  ;;  %v3509_v32 = vpop.f32.mrb[70].mxu1 }
 0x722   : > { %v3558_v4 = vadd.f32 %v3538_v38, %v3414_v13  ;;  %v3560_v34 = vadd.f32 %v3540_v24, %v3509_v32  ;;  %v3416_v27 = vpop.f32.mrb[75].mxu0  ;;  %v3511_v9 = vpop.f32.mrb[71].mxu1  ;;  %v3546_v24 = vmul.f32 %v3221_v8, %v9516_v25  ;;  %v3550_v25 = vmul.f32 %v3227_v28, %v9540_v5 }
 0x723   : > { %v3559_v6 = vadd.f32 %v3539_v7, %v3416_v27  ;;  %v3561_v3 = vadd.f32 %v3541_v1, %v3511_v9  ;;  %v3548_v9 = vmul.f32 %v3316_v23, %v9532_v22  ;;  %v3552_v22 = vmul.f32 %v3322_v18, %v9556_v12 }
 0x724   : > { %v3556_v5 = vmul.f32 %v3328_v58, %v9570_v45  ;;  %v3555_v18 = vmul.f32 %v3235_v44, %v9552_v20  ;;  %v7778_v44 = vld [vmem:[%s10939_s13] sm:$0xff]  }
 0x725   : > { %v3420_v11 = vpop.f32.mrb[76].mxu0  ;;  %v3515_v61 = vpop.f32.mrb[72].mxu1 }
 0x726   : > { %v3562_v10 = vadd.f32 %v3542_v16, %v3420_v11  ;;  %v3564_v42 = vadd.f32 %v3544_v19, %v3515_v61  ;;  %v3422_v52 = vpop.f32.mrb[77].mxu0  ;;  %v3517_v29 = vpop.f32.mrb[73].mxu1 }
 0x727   : > { %v3563_v38 = vadd.f32 %v3543_v41, %v3422_v52  ;;  %v3565_v32 = vadd.f32 %v3545_v37, %v3517_v29  ;;  %v3554_v41 = vmul.f32 %v3233_v47, %v9548_v39 }
 0x728   : > { %v3614_v27 = vpack.c.bf16 %v3562_v10, %v3558_v4  ;;  %v3616_v59 = vpack.c.bf16 %v3564_v42, %v3560_v34 }
 0x729   : > { %v3615_v31 = vpack.c.bf16 %v3563_v38, %v3559_v6  ;;  %v3617_v43 = vpack.c.bf16 %v3565_v32, %v3561_v3  ;;  %v3426_v33 = vpop.f32.mrb[78].mxu0  ;;  %v3521_v17 = vpop.f32.mrb[74].mxu1  ;;  %v3553_v3 = vmul.f32 %v3324_v26, %v9544_v50  ;;  %v11216_v38 = vld [vmem:[#allocation13_spill] sm:$0xff]  ;;  %v7783_v32 = vld [vmem:[%s10939_s13 + $0x28] sm:$0xff]  }
 0x72a   : > { %v3566_v16 = vadd.f32 %v3546_v24, %v3426_v33  ;;  %v3568_v19 = vadd.f32 %v3548_v9, %v3521_v17  ;;  %v3428_v54 = vpop.f32.mrb[79].mxu0  ;;  %v3523_v7 = vpop.f32.mrb[75].mxu1  ;;  %v7784_v24 = vld [vmem:[%s10939_s13 + $0x30] sm:$0xff]   ;;  %v7785_v9 = vld [vmem:[%s10939_s13 + $0x38] sm:$0xff]  }
 0x72b   : > { %v3567_v1 = vadd.f32 %v3547_v30, %v3428_v54  ;;  %v3569_v13 = vadd.f32 %v3549_v60, %v3523_v7  ;;  %3782 = vmatprep.subr.bf16.mxu0 %v3615_v31  ;;  %3995 = vmatprep.subr.bf16.mxu1 %v3617_v43  ;;  %v7788_v30 = vld [vmem:[%s10939_s13 + $0x50] sm:$0xff]   ;;  %v7789_v60 = vld [vmem:[%s10939_s13 + $0x58] sm:$0xff]   ;;  %v7790_v31 = vld [vmem:[%s10939_s13 + $0x60] sm:$0xff]  }
 0x72c   : > { %3783 = vmatpush1.bf16.msra.mxu0 %v3614_v27  ;;  %3996 = vmatpush1.bf16.msra.mxu1 %v3616_v59  ;;  %v7786_v27 = vld [vmem:[%s10939_s13 + $0x40] sm:$0xff]   ;;  %v7787_v59 = vld [vmem:[%s10939_s13 + $0x48] sm:$0xff]   ;;  %v7792_v33 = vld [vmem:[%s10939_s13 + $0x70] sm:$0xff]  }
 0x72d   : > { %v3432_v6 = vpop.f32.mrb[80].mxu0  ;;  %v3527_v48 = vpop.f32.mrb[76].mxu1  ;;  %v7791_v43 = vld [vmem:[%s10939_s13 + $0x68] sm:$0xff]   ;;  %v7793_v17 = vld [vmem:[%s10939_s13 + $0x78] sm:$0xff]   ;;  %v9934_v54 = vld [vmem:[%s10938_s12] sm:$0xff]  }
 0x72e   : > { %v3570_v4 = vadd.f32 %v3550_v25, %v3432_v6  ;;  %v3572_v34 = vadd.f32 %v3552_v22, %v3527_v48  ;;  %v3434_v8 = vpop.f32.mrb[81].mxu0  ;;  %v3529_v23 = vpop.f32.mrb[77].mxu1  ;;  %v11218_v7 = vld [vmem:[#allocation14_spill] sm:$0xff]  ;;  %v11221_v25 = vld [vmem:[#allocation19_spill] sm:$0xff]  ;;  %v9949_v22 = vld [vmem:[%s10938_s12 + $0x8] sm:$0xff]  }
 0x72f   : > { %v3571_v0 = vadd.f32 %v3551_v36, %v3434_v8  ;;  %v3573_v49 = vadd.f32 %v3553_v3, %v3529_v23  ;;  %v11222_v36 = vld [vmem:[#allocation18_spill] sm:$0xff]  ;;  %v11223_v3 = vld [vmem:[#allocation20_spill] sm:$0xff]  ;;  %v11224_v6 = vld [vmem:[#allocation21_spill] sm:$0xff] }
 0x730   : > { %v3618_v28 = vpack.c.bf16 %v3570_v4, %v3566_v16  ;;  %v3620_v12 = vpack.c.bf16 %v3572_v34, %v3568_v19  ;;  %v7794_v16 = vld [vmem:[%s10939_s13 + $0x80] sm:$0xff]   ;;  %v7795_v19 = vld [vmem:[%s10939_s13 + $0x88] sm:$0xff]   ;;  %v11226_v4 = vld [vmem:[#allocation22_spill] sm:$0xff] }
 0x731   : > { %v3619_v51 = vpack.c.bf16 %v3571_v0, %v3567_v1  ;;  %v3621_v50 = vpack.c.bf16 %v3573_v49, %v3569_v13  ;;  %v3438_v26 = vpop.f32.mrb[82].mxu0  ;;  %v3533_v37 = vpop.f32.mrb[78].mxu1  ;;  %v11219_v1 = vld [vmem:[#allocation16_spill] sm:$0xff]  ;;  %v11220_v13 = vld [vmem:[#allocation17_spill] sm:$0xff]  ;;  %v11225_v48 = vld [vmem:[#allocation23_spill] sm:$0xff] }
 0x732   : > { %v3574_v11 = vadd.f32 %v3554_v41, %v3438_v26  ;;  %v3576_v61 = vadd.f32 %v3556_v5, %v3533_v37  ;;  %v3440_v10 = vpop.f32.mrb[83].mxu0  ;;  %v3535_v42 = vpop.f32.mrb[79].mxu1  ;;  %v11227_v34 = vld [vmem:[#allocation24_spill] sm:$0xff]  ;;  %v11228_v8 = vld [vmem:[#allocation25_spill] sm:$0xff]  ;;  %v11229_v23 = vld [vmem:[#allocation27_spill] sm:$0xff] }
 0x733   : > { %v3575_v52 = vadd.f32 %v3555_v18, %v3440_v10  ;;  %v3577_v29 = vadd.f32 %v3557_v2, %v3535_v42  ;;  %3784 = vmatprep.subr.bf16.mxu0 %v3619_v51  ;;  %3997 = vmatprep.subr.bf16.mxu1 %v3621_v50  ;;  %v11230_v0 = vld [vmem:[#allocation26_spill] sm:$0xff]  ;;  %v11231_v49 = vld [vmem:[#allocation28_spill] sm:$0xff]  ;;  %v11232_v41 = vld [vmem:[#allocation29_spill] sm:$0xff] }
 0x734   : > { %v3622_v39 = vpack.c.bf16 %v3574_v11, %v3574_v11  ;;  %v3624_v45 = vpack.c.bf16 %v3576_v61, %v3576_v61  ;;  %3785 = vmatpush1.bf16.msra.mxu0 %v3618_v28  ;;  %3998 = vmatpush1.bf16.msra.mxu1 %v3620_v12  ;;  %v11233_v5 = vld [vmem:[#allocation31_spill] sm:$0xff]  ;;  %v11234_v28 = vld [vmem:[#allocation30_spill] sm:$0xff]  ;;  %v11235_v12 = vld [vmem:[#allocation32_spill] sm:$0xff] }
 0x735   : > { %v3623_v47 = vpack.c.bf16 %v3575_v52, %v3575_v52  ;;  %v3625_v20 = vpack.c.bf16 %v3577_v29, %v3577_v29  ;;  %v11236_v18 = vld [vmem:[#allocation33_spill] sm:$0xff]  ;;  %v11237_v2 = vld [vmem:[#allocation35_spill] sm:$0xff]  ;;  %v11238_v51 = vld [vmem:[#allocation34_spill] sm:$0xff] }
 0x736   : > { %v3771_v62 = vsel %vm3134_vm13, %v3622_v39, 0  ;;  %v3777_v58 = vsel %vm3134_vm13, %v3624_v45, 0  ;;  %v11239_v50 = vld [vmem:[#allocation37_spill] sm:$0xff]  ;;  %v11240_v26 = vld [vmem:[#allocation36_spill] sm:$0xff]  ;;  %v11241_v37 = vld [vmem:[#allocation38_spill] sm:$0xff] }
 0x737   : > { %6787 = vmatprep.subr.msk.bf16.mxu0 %vm3134_vm13, %v3623_v47  ;;  %6806 = vmatprep.subr.msk.bf16.mxu1 %vm3134_vm13, %v3625_v20  ;;  %v11243_v11 = vld [vmem:[#allocation39_spill] sm:$0xff]  ;;  %v11244_v61 = vld [vmem:[#allocation41_spill] sm:$0xff]  ;;  %v11245_v10 = vld [vmem:[#allocation42_spill] sm:$0xff] }
 0x738   : > { %3787 = vmatpush1.bf16.msra.mxu0 %v3771_v62  ;;  %4000 = vmatpush1.bf16.msra.mxu1 %v3777_v58  ;;  %v11246_v42 = vld [vmem:[#allocation43_spill] sm:$0xff]  ;;  %v11247_v52 = vld [vmem:[#allocation44_spill] sm:$0xff]  ;;  %v11248_v29 = vld [vmem:[#allocation46_spill] sm:$0xff] }
 0x739   : > { %4236 = vmatprep.subr.bf16.mxu0 %v8275_v35  ;;  %4289 = vmatprep.subr.bf16.mxu1 %v8303_v56  ;;  %v7779_v35 = vld [vmem:[%s10939_s13 + $0x8] sm:$0xff]   ;;  %v11214_v56 = vld [vmem:[#allocation11_spill] sm:$0xff]  ;;  %v11249_v39 = vld [vmem:[#allocation45_spill] sm:$0xff] }
 0x73a   : > { %v11250_v45 = vld [vmem:[#allocation47_spill] sm:$0xff]  ;;  %v11251_v47 = vld [vmem:[#allocation48_spill] sm:$0xff]  ;;  %v11252_v20 = vld [vmem:[#allocation50_spill] sm:$0xff] }
 0x73b   : > { %6788 = vmatmul.mubr.msk.bf16.vlgmr.msra.gmra.mrb[84].mxu0 %vm2796_vm12, %v7778_v44  ;;  %6807 = vmatmul.mubr.msk.bf16.vlgmr.msra.gmra.mrb[80].mxu1 %vm2796_vm12, %v7778_v44 }
 0x73c   : > { %4237 = vmatpush1.bf16.msra.mxu0 %v8301_v55  ;;  %4290 = vmatpush1.bf16.msra.mxu1 %v8309_v57  ;;  %v11217_v55 = vld [vmem:[#allocation15_spill] sm:$0xff]  ;;  %v7780_v57 = vld [vmem:[%s10939_s13 + $0x10] sm:$0xff]  }
 0x73d   : > { %4238 = vmatprep.subr.bf16.mxu0 %v8322_v21  ;;  %4291 = vmatprep.subr.bf16.mxu1 %v8350_v46  ;;  %v7781_v21 = vld [vmem:[%s10939_s13 + $0x18] sm:$0xff]   ;;  %v7782_v46 = vld [vmem:[%s10939_s13 + $0x20] sm:$0xff]  }
 0x73e   : > { %3824 = vmatprep.mubr.bf16.mxu0 %v11148_v53  ;;  %4037 = vmatprep.mubr.bf16.mxu1 %v11148_v53 }
 0x740   : > { %4239 = vmatpush1.bf16.msra.mxu0 %v11214_v56  ;;  %4292 = vmatpush1.bf16.msra.mxu1 %v11215_v14  ;;  %v11253_v56 = vld [vmem:[#allocation49_spill] sm:$0xff]  ;;  %v11254_v14 = vld [vmem:[#allocation51_spill] sm:$0xff] }
 0x741   : > { %4382 = vmatprep.subr.bf16.mxu0 %v11216_v38  ;;  %4435 = vmatprep.subr.bf16.mxu1 %v11217_v55 }
 0x743   : > { %6789 = vmatmul.mubr.msk.bf16.gmra.mrb[88].mxu0 %vm2796_vm12, %v7779_v35  ;;  %6808 = vmatmul.mubr.msk.bf16.gmra.mrb[84].mxu1 %vm2796_vm12, %v7779_v35 }
 0x744   : > { %3834 = vmatprep.mubr.bf16.mxu0 %v11148_v53  ;;  %4047 = vmatprep.mubr.bf16.mxu1 %v11148_v53 }
 0x74b   : > { %6790 = vmatmul.mubr.msk.bf16.gmra.mrb[92].mxu0 %vm2796_vm12, %v7780_v57  ;;  %6809 = vmatmul.mubr.msk.bf16.gmra.mrb[88].mxu1 %vm2796_vm12, %v7780_v57  ;;  %v11255_v57 = vld [vmem:[#allocation52_spill] sm:$0xff] }
 0x74c   : > { %3844 = vmatprep.mubr.bf16.mxu0 %v11148_v53  ;;  %4057 = vmatprep.mubr.bf16.mxu1 %v11148_v53 }
 0x753   : > { %6791 = vmatmul.mubr.msk.bf16.gmra.mrb[96].mxu0 %vm2796_vm12, %v7781_v21  ;;  %6810 = vmatmul.mubr.msk.bf16.gmra.mrb[92].mxu1 %vm2796_vm12, %v7781_v21  ;;  %v11256_v21 = vld [vmem:[#allocation54_spill] sm:$0xff] }
 0x754   : > { %3854 = vmatprep.mubr.bf16.mxu0 %v11148_v53  ;;  %4067 = vmatprep.mubr.bf16.mxu1 %v11148_v53 }
 0x75b   : > { %6792 = vmatmul.mubr.msk.bf16.gmra.mrb[100].mxu0 %vm2796_vm12, %v7782_v46  ;;  %6811 = vmatmul.mubr.msk.bf16.gmra.mrb[96].mxu1 %vm2796_vm12, %v7782_v46 }
 0x75c   : > { %3864 = vmatprep.mubr.bf16.mxu0 %v11148_v53  ;;  %4077 = vmatprep.mubr.bf16.mxu1 %v11148_v53 }
 0x763   : > { %6793 = vmatmul.mubr.msk.bf16.gmra.mrb[104].mxu0 %vm2796_vm12, %v7783_v32  ;;  %6812 = vmatmul.mubr.msk.bf16.gmra.mrb[100].mxu1 %vm2796_vm12, %v7783_v32 }
 0x764   : > { %3874 = vmatprep.mubr.bf16.mxu0 %v11148_v53  ;;  %4087 = vmatprep.mubr.bf16.mxu1 %v11148_v53 }
 0x76b   : > { %6794 = vmatmul.mubr.msk.bf16.gmra.mrb[108].mxu0 %vm2796_vm12, %v7784_v24  ;;  %6813 = vmatmul.mubr.msk.bf16.gmra.mrb[104].mxu1 %vm2796_vm12, %v7784_v24 }
 0x76c   : > { %3884 = vmatprep.mubr.bf16.mxu0 %v11148_v53  ;;  %4097 = vmatprep.mubr.bf16.mxu1 %v11148_v53 }
 0x773   : > { %6795 = vmatmul.mubr.msk.bf16.gmra.mrb[112].mxu0 %vm2796_vm12, %v7785_v9  ;;  %6814 = vmatmul.mubr.msk.bf16.gmra.mrb[108].mxu1 %vm2796_vm12, %v7785_v9 }
 0x774   : > { %3894 = vmatprep.mubr.bf16.mxu0 %v11148_v53  ;;  %4107 = vmatprep.mubr.bf16.mxu1 %v11148_v53 }
 0x77b   : > { %6796 = vmatmul.mubr.msk.bf16.gmra.mrb[116].mxu0 %vm2796_vm12, %v7786_v27  ;;  %6815 = vmatmul.mubr.msk.bf16.gmra.mrb[112].mxu1 %vm2796_vm12, %v7786_v27 }
 0x77c   : > { %3904 = vmatprep.mubr.bf16.mxu0 %v11148_v53  ;;  %4117 = vmatprep.mubr.bf16.mxu1 %v11148_v53 }
 0x783   : > { %6797 = vmatmul.mubr.msk.bf16.gmra.mrb[120].mxu0 %vm2796_vm12, %v7787_v59  ;;  %6816 = vmatmul.mubr.msk.bf16.gmra.mrb[116].mxu1 %vm2796_vm12, %v7787_v59 }
 0x784   : > { %3914 = vmatprep.mubr.bf16.mxu0 %v11148_v53  ;;  %4127 = vmatprep.mubr.bf16.mxu1 %v11148_v53 }
 0x78b   : > { %6798 = vmatmul.mubr.msk.bf16.gmra.mrb[124].mxu0 %vm2796_vm12, %v7788_v30  ;;  %6817 = vmatmul.mubr.msk.bf16.gmra.mrb[120].mxu1 %vm2796_vm12, %v7788_v30 }
 0x78c   : > { %3924 = vmatprep.mubr.bf16.mxu0 %v11148_v53  ;;  %4137 = vmatprep.mubr.bf16.mxu1 %v11148_v53 }
 0x793   : > { %6799 = vmatmul.mubr.msk.bf16.gmra.mrb[128].mxu0 %vm2796_vm12, %v7789_v60  ;;  %6818 = vmatmul.mubr.msk.bf16.gmra.mrb[124].mxu1 %vm2796_vm12, %v7789_v60 }
 0x794   : > { %3934 = vmatprep.mubr.bf16.mxu0 %v11148_v53  ;;  %4147 = vmatprep.mubr.bf16.mxu1 %v11148_v53 }
 0x79b   : > { %6800 = vmatmul.mubr.msk.bf16.gmra.mrb[132].mxu0 %vm2796_vm12, %v7790_v31  ;;  %6819 = vmatmul.mubr.msk.bf16.gmra.mrb[128].mxu1 %vm2796_vm12, %v7790_v31 }
 0x79c   : > { %3944 = vmatprep.mubr.bf16.mxu0 %v11148_v53  ;;  %4157 = vmatprep.mubr.bf16.mxu1 %v11148_v53 }
 0x7a3   : > { %6801 = vmatmul.mubr.msk.bf16.gmra.mrb[136].mxu0 %vm2796_vm12, %v7791_v43  ;;  %6820 = vmatmul.mubr.msk.bf16.gmra.mrb[132].mxu1 %vm2796_vm12, %v7791_v43 }
 0x7a4   : > { %3954 = vmatprep.mubr.bf16.mxu0 %v11148_v53  ;;  %4167 = vmatprep.mubr.bf16.mxu1 %v11148_v53 }
 0x7ab   : > { %6802 = vmatmul.mubr.msk.bf16.gmra.mrb[140].mxu0 %vm2796_vm12, %v7792_v33  ;;  %6821 = vmatmul.mubr.msk.bf16.gmra.mrb[136].mxu1 %vm2796_vm12, %v7792_v33  ;;  %v11257_v33 = vld [vmem:[#allocation53_spill] sm:$0xff] }
 0x7ac   : > { %3964 = vmatprep.mubr.bf16.mxu0 %v11148_v53  ;;  %4177 = vmatprep.mubr.bf16.mxu1 %v11148_v53 }
 0x7b3   : > { %6803 = vmatmul.mubr.msk.bf16.gmra.mrb[144].mxu0 %vm2796_vm12, %v7793_v17  ;;  %6822 = vmatmul.mubr.msk.bf16.gmra.mrb[140].mxu1 %vm2796_vm12, %v7793_v17  ;;  %v11258_v17 = vld [vmem:[#allocation55_spill] sm:$0xff] }
 0x7b4   : > { %3974 = vmatprep.mubr.bf16.mxu0 %v11148_v53  ;;  %4187 = vmatprep.mubr.bf16.mxu1 %v11148_v53 }
 0x7bb   : > { %6804 = vmatmul.mubr.msk.bf16.gmra.mrb[148].mxu0 %vm2796_vm12, %v7794_v16  ;;  %6823 = vmatmul.mubr.msk.bf16.gmra.mrb[144].mxu1 %vm2796_vm12, %v7794_v16  ;;  %v11259_v16 = vld [vmem:[#allocation56_spill] sm:$0xff] }
 0x7bc   : > { %3984 = vmatprep.mubr.bf16.mxu0 %v11148_v53  ;;  %4197 = vmatprep.mubr.bf16.mxu1 %v11148_v53 }
 0x7c3   : > { %6805 = vmatmul.mubr.msk.bf16.gmra.mrb[152].mxu0 %vm2796_vm12, %v7795_v19  ;;  %6824 = vmatmul.mubr.msk.bf16.gmra.mrb[148].mxu1 %vm2796_vm12, %v7795_v19  ;;  %v11260_v19 = vld [vmem:[#allocation58_spill] sm:$0xff] }
 0x7c4   : > { %4268 = vmatprep.mubr.bf16.mxu0 %v11148_v53  ;;  %4321 = vmatprep.mubr.bf16.mxu1 %v11148_v53 }
 0x7cb   : > { %6827 = vmatmul.mubr.msk.bf16.vlgmr.msra.gmra.mrb[156].mxu0 %vm1550_vm8, %v9934_v54  ;;  %6829 = vmatmul.mubr.msk.bf16.vlgmr.msra.gmra.mrb[152].mxu1 %vm1550_vm8, %v9934_v54 }
 0x7cc   : > { %4383 = vmatpush1.bf16.msra.mxu0 %v11218_v7  ;;  %4436 = vmatpush1.bf16.msra.mxu1 %v11219_v1 }
 0x7cd   : > { %4384 = vmatprep.subr.bf16.mxu0 %v11220_v13  ;;  %4437 = vmatprep.subr.bf16.mxu1 %v11221_v25 }
 0x7ce   : > { %4278 = vmatprep.mubr.bf16.mxu0 %v11148_v53  ;;  %4331 = vmatprep.mubr.bf16.mxu1 %v11148_v53 }
 0x7d0   : > { %4385 = vmatpush1.bf16.msra.mxu0 %v11222_v36  ;;  %4438 = vmatpush1.bf16.msra.mxu1 %v11223_v3  ;;  %v11261_v36 = vld [vmem:[#allocation57_spill] sm:$0xff]  ;;  %v11262_v3 = vld [vmem:[#allocation59_spill] sm:$0xff] }
 0x7d1   : > { %4528 = vmatprep.subr.bf16.mxu0 %v11224_v6  ;;  %4581 = vmatprep.subr.bf16.mxu1 %v11225_v48 }
 0x7d3   : > { %6828 = vmatmul.mubr.msk.bf16.gmra.mrb[160].mxu0 %vm1550_vm8, %v9949_v22  ;;  %6830 = vmatmul.mubr.msk.bf16.gmra.mrb[156].mxu1 %vm1550_vm8, %v9949_v22 }
 0x7d4   : > { %4414 = vmatprep.mubr.bf16.mxu0 %v11148_v53  ;;  %4467 = vmatprep.mubr.bf16.mxu1 %v11148_v53 }
 0x7db   : > { %6831 = vmatmul.mubr.msk.bf16.vlgmr.msra.gmra.mrb[164].mxu0 %vm1550_vm8, %v9934_v54  ;;  %6833 = vmatmul.mubr.msk.bf16.vlgmr.msra.gmra.mrb[160].mxu1 %vm1550_vm8, %v9934_v54 }
 0x7dc   : > { %4529 = vmatpush1.bf16.msra.mxu0 %v11226_v4  ;;  %4582 = vmatpush1.bf16.msra.mxu1 %v11227_v34  ;;  %v11263_v4 = vld [vmem:[#allocation60_spill] sm:$0xff]  ;;  %v11264_v34 = vld [vmem:[#allocation62_spill] sm:$0xff] }
 0x7dd   : > { %4530 = vmatprep.subr.bf16.mxu0 %v11228_v8  ;;  %4583 = vmatprep.subr.bf16.mxu1 %v11229_v23 }
 0x7de   : > { %4424 = vmatprep.mubr.bf16.mxu0 %v11148_v53  ;;  %4477 = vmatprep.mubr.bf16.mxu1 %v11148_v53 }
 0x7e0   : > { %4531 = vmatpush1.bf16.msra.mxu0 %v11230_v0  ;;  %4584 = vmatpush1.bf16.msra.mxu1 %v11231_v49 }
 0x7e1   : > { %4674 = vmatprep.subr.bf16.mxu0 %v11232_v41  ;;  %4727 = vmatprep.subr.bf16.mxu1 %v11233_v5 }
 0x7e3   : > { %6832 = vmatmul.mubr.msk.bf16.gmra.mrb[168].mxu0 %vm1550_vm8, %v9949_v22  ;;  %6834 = vmatmul.mubr.msk.bf16.gmra.mrb[164].mxu1 %vm1550_vm8, %v9949_v22 }
 0x7e4   : > { %4560 = vmatprep.mubr.bf16.mxu0 %v11148_v53  ;;  %4613 = vmatprep.mubr.bf16.mxu1 %v11148_v53 }
 0x7eb   : > { %6835 = vmatmul.mubr.msk.bf16.vlgmr.msra.gmra.mrb[172].mxu0 %vm1550_vm8, %v9934_v54  ;;  %6837 = vmatmul.mubr.msk.bf16.vlgmr.msra.gmra.mrb[168].mxu1 %vm1550_vm8, %v9934_v54 }
 0x7ec   : > { %4675 = vmatpush1.bf16.msra.mxu0 %v11234_v28  ;;  %4728 = vmatpush1.bf16.msra.mxu1 %v11235_v12 }
 0x7ed   : > { %4676 = vmatprep.subr.bf16.mxu0 %v11236_v18  ;;  %4729 = vmatprep.subr.bf16.mxu1 %v11237_v2 }
 0x7ee   : > { %4570 = vmatprep.mubr.bf16.mxu0 %v11148_v53  ;;  %4623 = vmatprep.mubr.bf16.mxu1 %v11148_v53 }
 0x7f0   : > { %4677 = vmatpush1.bf16.msra.mxu0 %v11238_v51  ;;  %4730 = vmatpush1.bf16.msra.mxu1 %v11239_v50  ;;  %v11265_v51 = vld [vmem:[#allocation61_spill] sm:$0xff]  ;;  %v11266_v50 = vld [vmem:[#allocation63_spill] sm:$0xff] }
 0x7f1   : > { %4820 = vmatprep.subr.bf16.mxu0 %v8642_v63  ;;  %4873 = vmatprep.subr.bf16.mxu1 %v11240_v26  ;;  %v11242_v63 = vld [vmem:[#allocation40_spill] sm:$0xff] }
 0x7f2   : > { %v11267_v26 = vld [vmem:[#allocation64_spill] sm:$0xff] }
 0x7f3   : > { %6836 = vmatmul.mubr.msk.bf16.gmra.mrb[176].mxu0 %vm1550_vm8, %v9949_v22  ;;  %6838 = vmatmul.mubr.msk.bf16.gmra.mrb[172].mxu1 %vm1550_vm8, %v9949_v22 }
 0x7f4   : > { %4706 = vmatprep.mubr.bf16.mxu0 %v11148_v53  ;;  %4759 = vmatprep.mubr.bf16.mxu1 %v11148_v53 }
 0x7fb   : > { %6839 = vmatmul.mubr.msk.bf16.vlgmr.msra.gmra.mrb[180].mxu0 %vm1550_vm8, %v9934_v54  ;;  %6841 = vmatmul.mubr.msk.bf16.vlgmr.msra.gmra.mrb[176].mxu1 %vm1550_vm8, %v9934_v54 }
 0x7fc   : > { %4821 = vmatpush1.bf16.msra.mxu0 %v11241_v37  ;;  %4874 = vmatpush1.bf16.msra.mxu1 %v11242_v63  ;;  %v11268_v37 = vld [vmem:[#allocation66_spill] sm:$0xff] }
 0x7fd   : > { %4822 = vmatprep.subr.bf16.mxu0 %v11243_v11  ;;  %4875 = vmatprep.subr.bf16.mxu1 %v11244_v61 }
 0x7fe   : > { %4716 = vmatprep.mubr.bf16.mxu0 %v11148_v53  ;;  %4769 = vmatprep.mubr.bf16.mxu1 %v11148_v53 }
 0x800   : > { %4823 = vmatpush1.bf16.msra.mxu0 %v11245_v10  ;;  %4876 = vmatpush1.bf16.msra.mxu1 %v11246_v42  ;;  %v11269_v42 = vld [vmem:[#allocation65_spill] sm:$0xff] }
 0x801   : > { %4966 = vmatprep.subr.bf16.mxu0 %v11247_v52  ;;  %5019 = vmatprep.subr.bf16.mxu1 %v11248_v29  ;;  %v11270_v52 = vld [vmem:[#allocation67_spill] sm:$0xff] }
 0x803   : > { %6840 = vmatmul.mubr.msk.bf16.gmra.mrb[184].mxu0 %vm1550_vm8, %v9949_v22  ;;  %6842 = vmatmul.mubr.msk.bf16.gmra.mrb[180].mxu1 %vm1550_vm8, %v9949_v22 }
 0x804   : > { %4852 = vmatprep.mubr.bf16.mxu0 %v11148_v53  ;;  %4905 = vmatprep.mubr.bf16.mxu1 %v11148_v53 }
 0x80b   : > { %6843 = vmatmul.mubr.msk.bf16.vlgmr.msra.gmra.mrb[188].mxu0 %vm1550_vm8, %v9934_v54  ;;  %6845 = vmatmul.mubr.msk.bf16.vlgmr.msra.gmra.mrb[184].mxu1 %vm1550_vm8, %v9934_v54 }
 0x80c   : > { %4967 = vmatpush1.bf16.msra.mxu0 %v11249_v39  ;;  %5020 = vmatpush1.bf16.msra.mxu1 %v11250_v45  ;;  %v11271_v45 = vld [vmem:[#allocation69_spill] sm:$0xff] }
 0x80d   : > { %4968 = vmatprep.subr.bf16.mxu0 %v11251_v47  ;;  %5021 = vmatprep.subr.bf16.mxu1 %v11252_v20  ;;  %v11272_v47 = vld [vmem:[#allocation71_spill] sm:$0xff] }
 0x80e   : > { %v10029_v62 = vpop.f32.mrb[84].mxu0  ;;  %v10031_v58 = vpop.f32.mrb[80].mxu1  ;;  %4862 = vmatprep.mubr.bf16.mxu0 %v11148_v53  ;;  %4915 = vmatprep.mubr.bf16.mxu1 %v11148_v53 }
 0x80f   : > { %v10035_v44 = vpop.f32.mrb[85].mxu0  ;;  %v10037_v35 = vpop.f32.mrb[81].mxu1 }
 0x810   : > { %4969 = vmatpush1.bf16.msra.mxu0 %v11253_v56  ;;  %5022 = vmatpush1.bf16.msra.mxu1 %v11254_v14  ;;  %v10041_v38 = vpop.f32.mrb[86].mxu0  ;;  %v10043_v55 = vpop.f32.mrb[82].mxu1 }
 0x811   : > { %5112 = vmatprep.subr.bf16.mxu0 %v11255_v57  ;;  %5165 = vmatprep.subr.bf16.mxu1 %v11256_v21  ;;  %v10047_v46 = vpop.f32.mrb[87].mxu0  ;;  %v10049_v32 = vpop.f32.mrb[83].mxu1 }
 0x813   : > { %6844 = vmatmul.mubr.msk.bf16.gmra.mrb[192].mxu0 %vm1550_vm8, %v9949_v22  ;;  %6846 = vmatmul.mubr.msk.bf16.gmra.mrb[188].mxu1 %vm1550_vm8, %v9949_v22 }
 0x814   : > { %4998 = vmatprep.mubr.bf16.mxu0 %v11148_v53  ;;  %5051 = vmatprep.mubr.bf16.mxu1 %v11148_v53 }
 0x816   : > { %v10057_v24 = vpop.f32.mrb[88].mxu0  ;;  %v10059_v9 = vpop.f32.mrb[84].mxu1 }
 0x817   : > { %v10061_v27 = vpop.f32.mrb[89].mxu0  ;;  %v10063_v59 = vpop.f32.mrb[85].mxu1 }
 0x818   : > { %v10065_v30 = vpop.f32.mrb[90].mxu0  ;;  %v10067_v60 = vpop.f32.mrb[86].mxu1 }
 0x819   : > { %v10069_v31 = vpop.f32.mrb[91].mxu0  ;;  %v10071_v43 = vpop.f32.mrb[87].mxu1 }
 0x81b   : > { %6847 = vmatmul.mubr.msk.bf16.vlgmr.msra.gmra.mrb[196].mxu0 %vm1550_vm8, %v9934_v54  ;;  %6849 = vmatmul.mubr.msk.bf16.vlgmr.msra.gmra.mrb[192].mxu1 %vm1550_vm8, %v9934_v54 }
 0x81c   : > { %5113 = vmatpush1.bf16.msra.mxu0 %v11257_v33  ;;  %5166 = vmatpush1.bf16.msra.mxu1 %v11258_v17 }
 0x81d   : > { %5114 = vmatprep.subr.bf16.mxu0 %v11259_v16  ;;  %5167 = vmatprep.subr.bf16.mxu1 %v11260_v19 }
 0x81e   : > { %v10081_v7 = vpop.f32.mrb[92].mxu0  ;;  %v10083_v1 = vpop.f32.mrb[88].mxu1  ;;  %5008 = vmatprep.mubr.bf16.mxu0 %v11148_v53  ;;  %5061 = vmatprep.mubr.bf16.mxu1 %v11148_v53 }
 0x81f   : > { %v10087_v13 = vpop.f32.mrb[93].mxu0  ;;  %v10089_v25 = vpop.f32.mrb[89].mxu1 }
 0x820   : > { %5115 = vmatpush1.bf16.msra.mxu0 %v11261_v36  ;;  %5168 = vmatpush1.bf16.msra.mxu1 %v11262_v3  ;;  %v10093_v6 = vpop.f32.mrb[94].mxu0  ;;  %v10095_v48 = vpop.f32.mrb[90].mxu1  ;;  %v11275_v3 = vld [vmem:[#allocation68_spill] sm:$0xff] }
 0x821   : > { %5258 = vmatprep.subr.bf16.mxu0 %v11263_v4  ;;  %5311 = vmatprep.subr.bf16.mxu1 %v11264_v34  ;;  %v10099_v8 = vpop.f32.mrb[95].mxu0  ;;  %v10101_v23 = vpop.f32.mrb[91].mxu1  ;;  %v11276_v4 = vld [vmem:[#allocation70_spill] sm:$0xff]  ;;  %v11277_v34 = vld [vmem:[#allocation73_spill] sm:$0xff] }
 0x823   : > { %6848 = vmatmul.mubr.msk.bf16.gmra.mrb[200].mxu0 %vm1550_vm8, %v9949_v22  ;;  %6850 = vmatmul.mubr.msk.bf16.gmra.mrb[196].mxu1 %vm1550_vm8, %v9949_v22 }
 0x824   : > { %5144 = vmatprep.mubr.bf16.mxu0 %v11148_v53  ;;  %5197 = vmatprep.mubr.bf16.mxu1 %v11148_v53 }
 0x826   : > { %v10109_v0 = vpop.f32.mrb[96].mxu0  ;;  %v10111_v49 = vpop.f32.mrb[92].mxu1 }
 0x827   : > { %v10113_v41 = vpop.f32.mrb[97].mxu0  ;;  %v10115_v5 = vpop.f32.mrb[93].mxu1 }
 0x828   : > { %v10117_v28 = vpop.f32.mrb[98].mxu0  ;;  %v10119_v12 = vpop.f32.mrb[94].mxu1 }
 0x829   : > { %v10121_v18 = vpop.f32.mrb[99].mxu0  ;;  %v10123_v2 = vpop.f32.mrb[95].mxu1 }
 0x82b   : > { %6851 = vmatmul.mubr.msk.bf16.vlgmr.msra.gmra.mrb[204].mxu0 %vm1550_vm8, %v9934_v54  ;;  %6853 = vmatmul.mubr.msk.bf16.vlgmr.msra.gmra.mrb[200].mxu1 %vm1550_vm8, %v9934_v54 }
 0x82c   : > { %5259 = vmatpush1.bf16.msra.mxu0 %v11265_v51  ;;  %5312 = vmatpush1.bf16.msra.mxu1 %v11266_v50  ;;  %v11278_v51 = vld [vmem:[#allocation75_spill] sm:$0xff] }
 0x82d   : > { %5260 = vmatprep.subr.bf16.mxu0 %v11267_v26  ;;  %5313 = vmatprep.subr.bf16.mxu1 %v11268_v37 }
 0x82e   : > { %v10133_v63 = vpop.f32.mrb[100].mxu0  ;;  %v10135_v11 = vpop.f32.mrb[96].mxu1  ;;  %5154 = vmatprep.mubr.bf16.mxu0 %v11148_v53  ;;  %5207 = vmatprep.mubr.bf16.mxu1 %v11148_v53 }
 0x82f   : > { %v10139_v61 = vpop.f32.mrb[101].mxu0  ;;  %v10141_v10 = vpop.f32.mrb[97].mxu1 }
 0x830   : > { %5261 = vmatpush1.bf16.msra.mxu0 %v11269_v42  ;;  %5314 = vmatpush1.bf16.msra.mxu1 %v11270_v52  ;;  %v10145_v29 = vpop.f32.mrb[102].mxu0  ;;  %v10147_v39 = vpop.f32.mrb[98].mxu1  ;;  %v11283_v52 = vld [vmem:[#allocation72_spill] sm:$0xff] }
 0x831   : > { %5404 = vmatprep.subr.bf16.mxu0 %v11271_v45  ;;  %5457 = vmatprep.subr.bf16.mxu1 %v11272_v47  ;;  %v10151_v20 = vpop.f32.mrb[103].mxu0  ;;  %v10153_v56 = vpop.f32.mrb[99].mxu1  ;;  %v11284_v45 = vld [vmem:[#allocation74_spill] sm:$0xff] }
 0x833   : > { %6852 = vmatmul.mubr.msk.bf16.gmra.mrb[208].mxu0 %vm1550_vm8, %v9949_v22  ;;  %6854 = vmatmul.mubr.msk.bf16.gmra.mrb[204].mxu1 %vm1550_vm8, %v9949_v22 }
 0x834   : > { %5290 = vmatprep.mubr.bf16.mxu0 %v11148_v53  ;;  %5343 = vmatprep.mubr.bf16.mxu1 %v11148_v53 }
 0x836   : > { %v10161_v14 = vpop.f32.mrb[104].mxu0  ;;  %v10163_v57 = vpop.f32.mrb[100].mxu1 }
 0x837   : > { %v10165_v21 = vpop.f32.mrb[105].mxu0  ;;  %v10167_v33 = vpop.f32.mrb[101].mxu1 }
 0x838   : > { %v10169_v17 = vpop.f32.mrb[106].mxu0  ;;  %v10171_v16 = vpop.f32.mrb[102].mxu1 }
 0x839   : > { %v10173_v19 = vpop.f32.mrb[107].mxu0  ;;  %v10175_v36 = vpop.f32.mrb[103].mxu1 }
 0x83a   : > { %11273 = vst [vmem:[#allocation11_spill] sm:$0xff] %v10173_v19  ;;  %11274 = vst [vmem:[#allocation12_spill] sm:$0xff] %v10175_v36 }
 0x83b   : > { %6855 = vmatmul.mubr.msk.bf16.vlgmr.msra.gmra.mrb[212].mxu0 %vm1550_vm8, %v9934_v54  ;;  %6857 = vmatmul.mubr.msk.bf16.vlgmr.msra.gmra.mrb[208].mxu1 %vm1550_vm8, %v9934_v54 }
 0x83c   : > { %5405 = vmatpush1.bf16.msra.mxu0 %v11275_v3  ;;  %5458 = vmatpush1.bf16.msra.mxu1 %v11276_v4 }
 0x83d   : > { %5406 = vmatprep.subr.bf16.mxu0 %v11277_v34  ;;  %5459 = vmatprep.subr.bf16.mxu1 %v11278_v51 }
 0x83e   : > { %v10185_v50 = vpop.f32.mrb[108].mxu0  ;;  %v10187_v26 = vpop.f32.mrb[104].mxu1  ;;  %5300 = vmatprep.mubr.bf16.mxu0 %v11148_v53  ;;  %5353 = vmatprep.mubr.bf16.mxu1 %v11148_v53 }
 0x83f   : > { %11279 = vst [vmem:[#allocation13_spill] sm:$0xff] %v10185_v50  ;;  %11280 = vst [vmem:[#allocation15_spill] sm:$0xff] %v10187_v26  ;;  %v10191_v37 = vpop.f32.mrb[109].mxu0  ;;  %v10193_v42 = vpop.f32.mrb[105].mxu1 }
 0x840   : > { %11281 = vst [vmem:[#allocation14_spill] sm:$0xff] %v10191_v37  ;;  %11282 = vst [vmem:[#allocation16_spill] sm:$0xff] %v10193_v42  ;;  %5407 = vmatpush1.bf16.msra.mxu0 %v11283_v52  ;;  %5460 = vmatpush1.bf16.msra.mxu1 %v11284_v45  ;;  %v10197_v47 = vpop.f32.mrb[110].mxu0  ;;  %v10199_v3 = vpop.f32.mrb[106].mxu1 }
 0x841   : > { %11285 = vst [vmem:[#allocation17_spill] sm:$0xff] %v10197_v47  ;;  %11286 = vst [vmem:[#allocation19_spill] sm:$0xff] %v10199_v3  ;;  %v10201_v4 = vpop.f32.mrb[111].mxu0  ;;  %v10203_v34 = vpop.f32.mrb[107].mxu1  ;;  %7599 = vmatprep.subr.bf16.mxu0 %v8952_v40  ;;  %7631 = vmatprep.subr.bf16.mxu1 %v8996_v15 }
 0x842   : > { %11287 = vst [vmem:[#allocation18_spill] sm:$0xff] %v10201_v4  ;;  %11288 = vst [vmem:[#allocation20_spill] sm:$0xff] %v10203_v34 }
 0x843   : > { %6856 = vmatmul.mubr.msk.bf16.gmra.mrb[216].mxu0 %vm1550_vm8, %v9949_v22  ;;  %6858 = vmatmul.mubr.msk.bf16.gmra.mrb[212].mxu1 %vm1550_vm8, %v9949_v22 }
 0x844   : > { %5436 = vmatprep.mubr.bf16.mxu0 %v11148_v53  ;;  %5489 = vmatprep.mubr.bf16.mxu1 %v11148_v53 }
 0x846   : > { %v10213_v51 = vpop.f32.mrb[112].mxu0  ;;  %v10215_v52 = vpop.f32.mrb[108].mxu1 }
 0x847   : > { %11289 = vst [vmem:[#allocation21_spill] sm:$0xff] %v10213_v51  ;;  %11290 = vst [vmem:[#allocation23_spill] sm:$0xff] %v10215_v52  ;;  %v10217_v45 = vpop.f32.mrb[113].mxu0  ;;  %v10219_v34 = vpop.f32.mrb[109].mxu1 }
 0x848   : > { %11291 = vst [vmem:[#allocation22_spill] sm:$0xff] %v10217_v45  ;;  %11292 = vst [vmem:[#allocation24_spill] sm:$0xff] %v10219_v34  ;;  %v10221_v40 = vpop.f32.mrb[114].mxu0  ;;  %v10223_v15 = vpop.f32.mrb[110].mxu1  ;;  %v11297_v45 = vld [vmem:[#allocation76_spill] sm:$0xff]  ;;  %v11298_v34 = vld [vmem:[#allocation78_spill] sm:$0xff] }
 0x849   : > { %11293 = vst [vmem:[#allocation25_spill] sm:$0xff] %v10221_v40  ;;  %11294 = vst [vmem:[#allocation27_spill] sm:$0xff] %v10223_v15  ;;  %v10225_v4 = vpop.f32.mrb[115].mxu0  ;;  %v10227_v3 = vpop.f32.mrb[111].mxu1 }
 0x84a   : > { %11295 = vst [vmem:[#allocation26_spill] sm:$0xff] %v10225_v4  ;;  %11296 = vst [vmem:[#allocation28_spill] sm:$0xff] %v10227_v3  ;;  %v11301_v4 = vld [vmem:[#allocation77_spill] sm:$0xff]  ;;  %v11302_v3 = vld [vmem:[#allocation80_spill] sm:$0xff] }
 0x84b   : > { %6859 = vmatmul.mubr.msk.bf16.vlgmr.msra.gmra.mrb[220].mxu0 %vm1550_vm8, %v9934_v54  ;;  %6861 = vmatmul.mubr.msk.bf16.vlgmr.msra.gmra.mrb[216].mxu1 %vm1550_vm8, %v9934_v54 }
 0x84c   : > { %5446 = vmatprep.mubr.bf16.mxu0 %v11148_v53  ;;  %5499 = vmatprep.mubr.bf16.mxu1 %v11148_v53 }
 0x84d   : > { %7601 = vmatpush3.bf16.msra.mxu0 %v11297_v45  ;;  %7633 = vmatpush3.bf16.msra.mxu1 %v11298_v34  ;;  %v11309_v34 = vld [vmem:[#allocation79_spill] sm:$0xff] }
 0x84e   : > { %v10237_v40 = vpop.f32.mrb[116].mxu0  ;;  %v10239_v15 = vpop.f32.mrb[112].mxu1  ;;  %7603 = vmatprep.subr.bf16.mxu0 %v11301_v4  ;;  %7635 = vmatprep.subr.bf16.mxu1 %v11302_v3  ;;  %v11312_v4 = vld [vmem:[#allocation84_spill] sm:$0xff]  ;;  %v11313_v3 = vld [vmem:[#allocation83_spill] sm:$0xff] }
 0x84f   : > { %11299 = vst [vmem:[#allocation29_spill] sm:$0xff] %v10237_v40  ;;  %11300 = vst [vmem:[#allocation31_spill] sm:$0xff] %v10239_v15  ;;  %v10243_v52 = vpop.f32.mrb[117].mxu0  ;;  %v10245_v51 = vpop.f32.mrb[113].mxu1  ;;  %v11310_v40 = vld [vmem:[#allocation82_spill] sm:$0xff]  ;;  %v11311_v15 = vld [vmem:[#allocation81_spill] sm:$0xff] }
 0x850   : > { %11303 = vst [vmem:[#allocation30_spill] sm:$0xff] %v10243_v52  ;;  %11304 = vst [vmem:[#allocation32_spill] sm:$0xff] %v10245_v51  ;;  %v10247_v54 = vpop.f32.mrb[118].mxu0  ;;  %v10249_v47 = vpop.f32.mrb[114].mxu1 }
 0x851   : > { %11305 = vst [vmem:[#allocation33_spill] sm:$0xff] %v10247_v54  ;;  %11306 = vst [vmem:[#allocation35_spill] sm:$0xff] %v10249_v47  ;;  %v10251_v53 = vpop.f32.mrb[119].mxu0  ;;  %v10253_v45 = vpop.f32.mrb[115].mxu1  ;;  %7605 = vmatpush3.bf16.msra.mxu0 %v11309_v34  ;;  %7637 = vmatpush3.bf16.msra.mxu1 %v11310_v40  ;;  %v11314_v47 = vld [vmem:[#allocation86_spill] sm:$0xff]  ;;  %v11317_v34 = vld [vmem:[#allocation85_spill] sm:$0xff] }
 0x852   : > { %11307 = vst [vmem:[#allocation34_spill] sm:$0xff] %v10251_v53  ;;  %11308 = vst [vmem:[#allocation37_spill] sm:$0xff] %v10253_v45  ;;  %7607 = vmatprep.subr.bf16.mxu0 %v11311_v15  ;;  %7639 = vmatprep.subr.bf16.mxu1 %v11312_v4  ;;  %v11318_v40 = vld [vmem:[#allocation88_spill] sm:$0xff] }
 0x853   : > { %6860 = vmatmul.mubr.msk.bf16.gmra.mrb[224].mxu0 %vm1550_vm8, %v9949_v22  ;;  %6862 = vmatmul.mubr.msk.bf16.gmra.mrb[220].mxu1 %vm1550_vm8, %v9949_v22 }
 0x855   : > { %7609 = vmatpush3.bf16.msra.mxu0 %v11313_v3  ;;  %7641 = vmatpush3.bf16.msra.mxu1 %v11314_v47  ;;  %v11325_v47 = vld [vmem:[#allocation87_spill] sm:$0xff] }
 0x856   : > { %v10265_v53 = vpop.f32.mrb[120].mxu0  ;;  %v10267_v45 = vpop.f32.mrb[116].mxu1  ;;  %7611 = vmatprep.subr.bf16.mxu0 %v11317_v34  ;;  %7643 = vmatprep.subr.bf16.mxu1 %v11318_v40  ;;  %v11328_v34 = vld [vmem:[#allocation92_spill] sm:$0xff]  ;;  %v11329_v40 = vld [vmem:[#allocation91_spill] sm:$0xff] }
 0x857   : > { %11315 = vst [vmem:[#allocation36_spill] sm:$0xff] %v10265_v53  ;;  %11316 = vst [vmem:[#allocation38_spill] sm:$0xff] %v10267_v45  ;;  %v10271_v15 = vpop.f32.mrb[121].mxu0  ;;  %v10273_v4 = vpop.f32.mrb[117].mxu1  ;;  %v11326_v53 = vld [vmem:[#allocation90_spill] sm:$0xff]  ;;  %v11327_v45 = vld [vmem:[#allocation89_spill] sm:$0xff] }
 0x858   : > { %11319 = vst [vmem:[#allocation40_spill] sm:$0xff] %v10271_v15  ;;  %11320 = vst [vmem:[#allocation39_spill] sm:$0xff] %v10273_v4  ;;  %v10275_v54 = vpop.f32.mrb[122].mxu0  ;;  %v10277_v51 = vpop.f32.mrb[118].mxu1  ;;  %v11330_v15 = vld [vmem:[#allocation94_spill] sm:$0xff] }
 0x859   : > { %11321 = vst [vmem:[#allocation41_spill] sm:$0xff] %v10275_v54  ;;  %11322 = vst [vmem:[#allocation42_spill] sm:$0xff] %v10277_v51  ;;  %v10279_v22 = vpop.f32.mrb[123].mxu0  ;;  %v10281_v3 = vpop.f32.mrb[119].mxu1  ;;  %7613 = vmatpush3.bf16.msra.mxu0 %v11325_v47  ;;  %7645 = vmatpush3.bf16.msra.mxu1 %v11326_v53  ;;  %v11333_v51 = vld [vmem:[#allocation93_spill] sm:$0xff] }
 0x85a   : > { %11323 = vst [vmem:[#allocation43_spill] sm:$0xff] %v10279_v22  ;;  %11324 = vst [vmem:[#allocation44_spill] sm:$0xff] %v10281_v3  ;;  %7615 = vmatprep.subr.bf16.mxu0 %v11327_v45  ;;  %7647 = vmatprep.subr.bf16.mxu1 %v11328_v34  ;;  %v11334_v22 = vld [vmem:[#allocation96_spill] sm:$0xff] }
 0x85d   : > { %7617 = vmatpush3.bf16.msra.mxu0 %v11329_v40  ;;  %7649 = vmatpush3.bf16.msra.mxu1 %v11330_v15  ;;  %v11341_v15 = vld [vmem:[#allocation95_spill] sm:$0xff] }
 0x85e   : > { %v10289_v4 = vpop.f32.mrb[124].mxu0  ;;  %v10291_v54 = vpop.f32.mrb[120].mxu1  ;;  %7619 = vmatprep.subr.bf16.mxu0 %v11333_v51  ;;  %7651 = vmatprep.subr.bf16.mxu1 %v11334_v22  ;;  %v11344_v51 = vld [vmem:[#allocation101_spill] sm:$0xff]  ;;  %v11345_v22 = vld [vmem:[#allocation99_spill] sm:$0xff] }
 0x85f   : > { %11331 = vst [vmem:[#allocation46_spill] sm:$0xff] %v10289_v4  ;;  %11332 = vst [vmem:[#allocation45_spill] sm:$0xff] %v10291_v54  ;;  %v10295_v3 = vpop.f32.mrb[125].mxu0  ;;  %v10297_v47 = vpop.f32.mrb[121].mxu1  ;;  %v11342_v4 = vld [vmem:[#allocation98_spill] sm:$0xff]  ;;  %v11343_v54 = vld [vmem:[#allocation97_spill] sm:$0xff] }
 0x860   : > { %11335 = vst [vmem:[#allocation47_spill] sm:$0xff] %v10295_v3  ;;  %11336 = vst [vmem:[#allocation48_spill] sm:$0xff] %v10297_v47  ;;  %v10299_v53 = vpop.f32.mrb[126].mxu0  ;;  %v10301_v45 = vpop.f32.mrb[122].mxu1  ;;  %v11346_v3 = vld [vmem:[#allocation103_spill] sm:$0xff] }
 0x861   : > { %11337 = vst [vmem:[#allocation50_spill] sm:$0xff] %v10299_v53  ;;  %11338 = vst [vmem:[#allocation49_spill] sm:$0xff] %v10301_v45  ;;  %v10303_v34 = vpop.f32.mrb[127].mxu0  ;;  %v10305_v40 = vpop.f32.mrb[123].mxu1  ;;  %7621 = vmatpush3.bf16.msra.mxu0 %v11341_v15  ;;  %7653 = vmatpush3.bf16.msra.mxu1 %v11342_v4  ;;  %v11349_v45 = vld [vmem:[#allocation100_spill] sm:$0xff] }
 0x862   : > { %11339 = vst [vmem:[#allocation51_spill] sm:$0xff] %v10303_v34  ;;  %11340 = vst [vmem:[#allocation52_spill] sm:$0xff] %v10305_v40  ;;  %7623 = vmatprep.subr.bf16.mxu0 %v11343_v54  ;;  %7655 = vmatprep.subr.bf16.mxu1 %v11344_v51  ;;  %v11350_v34 = vld [vmem:[#allocation104_spill] sm:$0xff] }
 0x865   : > { %7625 = vmatpush3.bf16.msra.mxu0 %v11345_v22  ;;  %7657 = vmatpush3.bf16.msra.mxu1 %v11346_v3  ;;  %v11357_v3 = vld [vmem:[#allocation102_spill] sm:$0xff] }
 0x866   : > { %v10313_v47 = vpop.f32.mrb[128].mxu0  ;;  %v10315_v53 = vpop.f32.mrb[124].mxu1  ;;  %7627 = vmatprep.subr.bf16.mxu0 %v11349_v45  ;;  %7659 = vmatprep.subr.bf16.mxu1 %v11350_v34 }
 0x867   : > { %11347 = vst [vmem:[#allocation54_spill] sm:$0xff] %v10313_v47  ;;  %11348 = vst [vmem:[#allocation53_spill] sm:$0xff] %v10315_v53  ;;  %v10319_v40 = vpop.f32.mrb[129].mxu0  ;;  %v10321_v15 = vpop.f32.mrb[125].mxu1  ;;  %v11358_v47 = vld [vmem:[#allocation105_spill] sm:$0xff] }
 0x868   : > { %11351 = vst [vmem:[#allocation55_spill] sm:$0xff] %v10319_v40  ;;  %11352 = vst [vmem:[#allocation56_spill] sm:$0xff] %v10321_v15  ;;  %v10323_v4 = vpop.f32.mrb[130].mxu0  ;;  %v10325_v54 = vpop.f32.mrb[126].mxu1 }
 0x869   : > { %11353 = vst [vmem:[#allocation58_spill] sm:$0xff] %v10323_v4  ;;  %11354 = vst [vmem:[#allocation57_spill] sm:$0xff] %v10325_v54  ;;  %v10327_v51 = vpop.f32.mrb[131].mxu0  ;;  %v10329_v22 = vpop.f32.mrb[127].mxu1  ;;  %7629 = vmatpush3.bf16.msra.mxu0 %v11357_v3  ;;  %7661 = vmatpush3.bf16.msra.mxu1 %v11358_v47 }
 0x86a   : > { %11355 = vst [vmem:[#allocation59_spill] sm:$0xff] %v10327_v51  ;;  %11356 = vst [vmem:[#allocation60_spill] sm:$0xff] %v10329_v22 }
 0x86e   : > { %v10333_v53 = vpop.f32.mrb[132].mxu0  ;;  %v10335_v45 = vpop.f32.mrb[128].mxu1 }
 0x86f   : > { %11359 = vst [vmem:[#allocation62_spill] sm:$0xff] %v10333_v53  ;;  %11360 = vst [vmem:[#allocation61_spill] sm:$0xff] %v10335_v45  ;;  %v10337_v34 = vpop.f32.mrb[133].mxu0  ;;  %v10339_v40 = vpop.f32.mrb[129].mxu1 }
 0x870   : > { %11361 = vst [vmem:[#allocation63_spill] sm:$0xff] %v10337_v34  ;;  %11362 = vst [vmem:[#allocation64_spill] sm:$0xff] %v10339_v40  ;;  %v10341_v15 = vpop.f32.mrb[134].mxu0  ;;  %v10343_v4 = vpop.f32.mrb[130].mxu1 }
 0x871   : > { %11363 = vst [vmem:[#allocation66_spill] sm:$0xff] %v10341_v15  ;;  %11364 = vst [vmem:[#allocation65_spill] sm:$0xff] %v10343_v4  ;;  %v10345_v54 = vpop.f32.mrb[135].mxu0  ;;  %v10347_v51 = vpop.f32.mrb[131].mxu1 }
 0x872   : > { %11365 = vst [vmem:[#allocation67_spill] sm:$0xff] %v10345_v54  ;;  %11366 = vst [vmem:[#allocation69_spill] sm:$0xff] %v10347_v51 }
 0x876   : > { %v10349_v22 = vpop.f32.mrb[136].mxu0  ;;  %v10351_v3 = vpop.f32.mrb[132].mxu1 }
 0x877   : > { %11367 = vst [vmem:[#allocation71_spill] sm:$0xff] %v10349_v22  ;;  %11368 = vst [vmem:[#allocation68_spill] sm:$0xff] %v10351_v3  ;;  %v10353_v47 = vpop.f32.mrb[137].mxu0  ;;  %v10355_v53 = vpop.f32.mrb[133].mxu1 }
 0x878   : > { %11369 = vst [vmem:[#allocation70_spill] sm:$0xff] %v10353_v47  ;;  %11370 = vst [vmem:[#allocation73_spill] sm:$0xff] %v10355_v53  ;;  %v10357_v45 = vpop.f32.mrb[138].mxu0  ;;  %v10359_v34 = vpop.f32.mrb[134].mxu1 }
 0x879   : > { %11371 = vst [vmem:[#allocation75_spill] sm:$0xff] %v10357_v45  ;;  %11372 = vst [vmem:[#allocation72_spill] sm:$0xff] %v10359_v34  ;;  %v10361_v40 = vpop.f32.mrb[139].mxu0  ;;  %v10363_v15 = vpop.f32.mrb[135].mxu1 }
 0x87a   : > { %11373 = vst [vmem:[#allocation74_spill] sm:$0xff] %v10361_v40  ;;  %11374 = vst [vmem:[#allocation76_spill] sm:$0xff] %v10363_v15 }
 0x87e   : > { %v10365_v4 = vpop.f32.mrb[140].mxu0  ;;  %v10367_v54 = vpop.f32.mrb[136].mxu1 }
 0x87f   : > { %11375 = vst [vmem:[#allocation78_spill] sm:$0xff] %v10365_v4  ;;  %11376 = vst [vmem:[#allocation77_spill] sm:$0xff] %v10367_v54  ;;  %v10369_v51 = vpop.f32.mrb[141].mxu0  ;;  %v10371_v22 = vpop.f32.mrb[137].mxu1 }
 0x880   : > { %11377 = vst [vmem:[#allocation80_spill] sm:$0xff] %v10369_v51  ;;  %11378 = vst [vmem:[#allocation79_spill] sm:$0xff] %v10371_v22  ;;  %v10373_v3 = vpop.f32.mrb[142].mxu0  ;;  %v10375_v47 = vpop.f32.mrb[138].mxu1 }
 0x881   : > { %11379 = vst [vmem:[#allocation82_spill] sm:$0xff] %v10373_v3  ;;  %11380 = vst [vmem:[#allocation81_spill] sm:$0xff] %v10375_v47  ;;  %v10377_v53 = vpop.f32.mrb[143].mxu0  ;;  %v10379_v45 = vpop.f32.mrb[139].mxu1 }
 0x882   : > { %11381 = vst [vmem:[#allocation84_spill] sm:$0xff] %v10377_v53  ;;  %11382 = vst [vmem:[#allocation83_spill] sm:$0xff] %v10379_v45 }
 0x886   : > { %v10381_v34 = vpop.f32.mrb[144].mxu0  ;;  %v10383_v40 = vpop.f32.mrb[140].mxu1 }
 0x887   : > { %11383 = vst [vmem:[#allocation86_spill] sm:$0xff] %v10381_v34  ;;  %11384 = vst [vmem:[#allocation85_spill] sm:$0xff] %v10383_v40  ;;  %v10385_v15 = vpop.f32.mrb[145].mxu0  ;;  %v10387_v4 = vpop.f32.mrb[141].mxu1 }
 0x888   : > { %11385 = vst [vmem:[#allocation88_spill] sm:$0xff] %v10385_v15  ;;  %11386 = vst [vmem:[#allocation87_spill] sm:$0xff] %v10387_v4  ;;  %v10389_v54 = vpop.f32.mrb[146].mxu0  ;;  %v10391_v51 = vpop.f32.mrb[142].mxu1 }
 0x889   : > { %11387 = vst [vmem:[#allocation90_spill] sm:$0xff] %v10389_v54  ;;  %11388 = vst [vmem:[#allocation89_spill] sm:$0xff] %v10391_v51  ;;  %v10393_v22 = vpop.f32.mrb[147].mxu0  ;;  %v10395_v3 = vpop.f32.mrb[143].mxu1 }
 0x88a   : > { %11389 = vst [vmem:[#allocation92_spill] sm:$0xff] %v10393_v22  ;;  %11390 = vst [vmem:[#allocation91_spill] sm:$0xff] %v10395_v3 }
 0x88e   : > { %v10397_v47 = vpop.f32.mrb[148].mxu0  ;;  %v10399_v53 = vpop.f32.mrb[144].mxu1 }
 0x88f   : > { %11391 = vst [vmem:[#allocation94_spill] sm:$0xff] %v10397_v47  ;;  %11392 = vst [vmem:[#allocation93_spill] sm:$0xff] %v10399_v53  ;;  %v10401_v45 = vpop.f32.mrb[149].mxu0  ;;  %v10403_v34 = vpop.f32.mrb[145].mxu1 }
 0x890   : > { %11393 = vst [vmem:[#allocation96_spill] sm:$0xff] %v10401_v45  ;;  %11394 = vst [vmem:[#allocation95_spill] sm:$0xff] %v10403_v34  ;;  %v10405_v40 = vpop.f32.mrb[150].mxu0  ;;  %v10407_v15 = vpop.f32.mrb[146].mxu1 }
 0x891   : > { %11395 = vst [vmem:[#allocation98_spill] sm:$0xff] %v10405_v40  ;;  %11396 = vst [vmem:[#allocation97_spill] sm:$0xff] %v10407_v15  ;;  %v10409_v4 = vpop.f32.mrb[151].mxu0  ;;  %v10411_v54 = vpop.f32.mrb[147].mxu1 }
 0x892   : > { %11397 = vst [vmem:[#allocation101_spill] sm:$0xff] %v10409_v4  ;;  %11398 = vst [vmem:[#allocation99_spill] sm:$0xff] %v10411_v54 }
 0x896   : > { %v10413_v51 = vpop.f32.mrb[152].mxu0  ;;  %v10415_v22 = vpop.f32.mrb[148].mxu1 }
 0x897   : > { %11399 = vst [vmem:[#allocation103_spill] sm:$0xff] %v10413_v51  ;;  %11400 = vst [vmem:[#allocation100_spill] sm:$0xff] %v10415_v22  ;;  %v10417_v3 = vpop.f32.mrb[153].mxu0  ;;  %v10419_v47 = vpop.f32.mrb[149].mxu1 }
 0x898   : > { %11401 = vst [vmem:[#allocation104_spill] sm:$0xff] %v10417_v3  ;;  %11402 = vst [vmem:[#allocation102_spill] sm:$0xff] %v10419_v47  ;;  %v10421_v53 = vpop.f32.mrb[154].mxu0  ;;  %v10423_v45 = vpop.f32.mrb[150].mxu1 }
 0x899   : > { %11403 = vst [vmem:[#allocation105_spill] sm:$0xff] %v10421_v53  ;;  %11404 = vst [vmem:[#allocation130_spill] sm:$0xff] %v10423_v45  ;;  %v10425_v34 = vpop.f32.mrb[155].mxu0  ;;  %v10427_v40 = vpop.f32.mrb[151].mxu1 }
 0x89a   : > { %11405 = vst [vmem:[#allocation131_spill] sm:$0xff] %v10425_v34  ;;  %11406 = vst [vmem:[#allocation132_spill] sm:$0xff] %v10427_v40 }
 0x89e   : > { %v4270_v15 = vpop.f32.mrb[156].mxu0  ;;  %v4323_v4 = vpop.f32.mrb[152].mxu1 }
 0x89f   : > { %v4342_v54 = vmul.f32 %v4270_v15, %v10029_v62  ;;  %v4344_v51 = vmul.f32 %v4323_v4, %v10031_v58  ;;  %v4272_v52 = vpop.f32.mrb[157].mxu0  ;;  %v4325_v22 = vpop.f32.mrb[153].mxu1 }
 0x8a0   : > { %v4343_v3 = vmul.f32 %v4272_v52, %v10035_v44  ;;  %v4345_v47 = vmul.f32 %v4325_v22, %v10037_v35  ;;  %v4274_v42 = vpop.f32.mrb[158].mxu0  ;;  %v4327_v53 = vpop.f32.mrb[154].mxu1 }
 0x8a1   : > { %v4346_v45 = vmul.f32 %v4274_v42, %v10041_v38  ;;  %v4348_v34 = vmul.f32 %v4327_v53, %v10043_v55  ;;  %v4276_v37 = vpop.f32.mrb[159].mxu0  ;;  %v4329_v40 = vpop.f32.mrb[155].mxu1 }
 0x8a2   : > { %v4347_v26 = vmul.f32 %v4276_v37, %v10047_v46  ;;  %v4349_v62 = vmul.f32 %v4329_v40, %v10049_v32 }
 0x8a6   : > { %v4280_v15 = vpop.f32.mrb[160].mxu0  ;;  %v4333_v58 = vpop.f32.mrb[156].mxu1 }
 0x8a7   : > { %v4350_v4 = vmul.f32 %v4280_v15, %v10057_v24  ;;  %v4352_v44 = vmul.f32 %v4333_v58, %v10059_v9  ;;  %v4282_v52 = vpop.f32.mrb[161].mxu0  ;;  %v4335_v35 = vpop.f32.mrb[157].mxu1 }
 0x8a8   : > { %v4351_v22 = vmul.f32 %v4282_v52, %v10061_v27  ;;  %v4353_v38 = vmul.f32 %v4335_v35, %v10063_v59  ;;  %v4284_v42 = vpop.f32.mrb[162].mxu0  ;;  %v4337_v55 = vpop.f32.mrb[158].mxu1 }
 0x8a9   : > { %v4354_v53 = vmul.f32 %v4284_v42, %v10065_v30  ;;  %v4356_v46 = vmul.f32 %v4337_v55, %v10067_v60  ;;  %v4286_v37 = vpop.f32.mrb[163].mxu0  ;;  %v4339_v32 = vpop.f32.mrb[159].mxu1 }
 0x8aa   : > { %v4355_v40 = vmul.f32 %v4286_v37, %v10069_v31  ;;  %v4357_v24 = vmul.f32 %v4339_v32, %v10071_v43 }
 0x8ae   : > { %v4416_v15 = vpop.f32.mrb[164].mxu0  ;;  %v4469_v9 = vpop.f32.mrb[160].mxu1 }
 0x8af   : > { %v4488_v58 = vmul.f32 %v4416_v15, %v10081_v7  ;;  %v4490_v27 = vmul.f32 %v4469_v9, %v10083_v1  ;;  %v4418_v52 = vpop.f32.mrb[165].mxu0  ;;  %v4471_v59 = vpop.f32.mrb[161].mxu1 }
 0x8b0   : > { %v4489_v35 = vmul.f32 %v4418_v52, %v10087_v13  ;;  %v4491_v30 = vmul.f32 %v4471_v59, %v10089_v25  ;;  %v4420_v42 = vpop.f32.mrb[166].mxu0  ;;  %v4473_v60 = vpop.f32.mrb[162].mxu1 }
 0x8b1   : > { %v4504_v55 = vadd.f32 %v4488_v58, %v4342_v54  ;;  %v4506_v50 = vadd.f32 %v4490_v27, %v4344_v51  ;;  %v4492_v31 = vmul.f32 %v4420_v42, %v10093_v6  ;;  %v4494_v43 = vmul.f32 %v4473_v60, %v10095_v48  ;;  %v4422_v37 = vpop.f32.mrb[167].mxu0  ;;  %v4475_v32 = vpop.f32.mrb[163].mxu1 }
 0x8b2   : > { %v4505_v36 = vadd.f32 %v4489_v35, %v4343_v3  ;;  %v4507_v7 = vadd.f32 %v4491_v30, %v4345_v47  ;;  %v4493_v1 = vmul.f32 %v4422_v37, %v10099_v8  ;;  %v4495_v15 = vmul.f32 %v4475_v32, %v10101_v23 }
 0x8b3   : > { %v4508_v9 = vadd.f32 %v4492_v31, %v4346_v45  ;;  %v4510_v13 = vadd.f32 %v4494_v43, %v4348_v34 }
 0x8b4   : > { %v4509_v52 = vadd.f32 %v4493_v1, %v4347_v26  ;;  %v4511_v25 = vadd.f32 %v4495_v15, %v4349_v62 }
 0x8b6   : > { %v4426_v59 = vpop.f32.mrb[168].mxu0  ;;  %v4479_v19 = vpop.f32.mrb[164].mxu1 }
 0x8b7   : > { %v4496_v54 = vmul.f32 %v4426_v59, %v10109_v0  ;;  %v4498_v6 = vmul.f32 %v4479_v19, %v10111_v49  ;;  %v4428_v51 = vpop.f32.mrb[169].mxu0  ;;  %v4481_v48 = vpop.f32.mrb[165].mxu1 }
 0x8b8   : > { %v4497_v58 = vmul.f32 %v4428_v51, %v10113_v41  ;;  %v4499_v3 = vmul.f32 %v4481_v48, %v10115_v5  ;;  %v4430_v47 = vpop.f32.mrb[170].mxu0  ;;  %v4483_v8 = vpop.f32.mrb[166].mxu1 }
 0x8b9   : > { %v4512_v27 = vadd.f32 %v4496_v54, %v4350_v4  ;;  %v4514_v23 = vadd.f32 %v4498_v6, %v4352_v44  ;;  %v4500_v45 = vmul.f32 %v4430_v47, %v10117_v28  ;;  %v4502_v26 = vmul.f32 %v4483_v8, %v10119_v12  ;;  %v4432_v34 = vpop.f32.mrb[171].mxu0  ;;  %v4485_v62 = vpop.f32.mrb[167].mxu1  ;;  %v11408_v47 = vld [vmem:[#allocation12_spill] sm:$0xff] }
 0x8ba   : > { %v4513_v35 = vadd.f32 %v4497_v58, %v4351_v22  ;;  %v4515_v0 = vadd.f32 %v4499_v3, %v4353_v38  ;;  %v4501_v49 = vmul.f32 %v4432_v34, %v10121_v18  ;;  %v4503_v19 = vmul.f32 %v4485_v62, %v10123_v2  ;;  %v11407_v3 = vld [vmem:[#allocation11_spill] sm:$0xff] }
 0x8bb   : > { %v4516_v30 = vadd.f32 %v4500_v45, %v4354_v53  ;;  %v4518_v41 = vadd.f32 %v4502_v26, %v4356_v46 }
 0x8bc   : > { %v4517_v42 = vadd.f32 %v4501_v49, %v4355_v40  ;;  %v4519_v5 = vadd.f32 %v4503_v19, %v4357_v24  ;;  %v11410_v49 = vld [vmem:[#allocation15_spill] sm:$0xff] }
 0x8be   : > { %v4562_v60 = vpop.f32.mrb[172].mxu0  ;;  %v4615_v31 = vpop.f32.mrb[168].mxu1 }
 0x8bf   : > { %v4634_v4 = vmul.f32 %v4562_v60, %v10133_v63  ;;  %v4636_v28 = vmul.f32 %v4615_v31, %v10135_v11  ;;  %v4564_v44 = vpop.f32.mrb[173].mxu0  ;;  %v4617_v12 = vpop.f32.mrb[169].mxu1  ;;  %v11411_v60 = vld [vmem:[#allocation14_spill] sm:$0xff] }
 0x8c0   : > { %v4635_v43 = vmul.f32 %v4564_v44, %v10139_v61  ;;  %v4637_v22 = vmul.f32 %v4617_v12, %v10141_v10  ;;  %v4566_v38 = vpop.f32.mrb[174].mxu0  ;;  %v4619_v18 = vpop.f32.mrb[170].mxu1 }
 0x8c1   : > { %v4650_v37 = vadd.f32 %v4634_v4, %v4504_v55  ;;  %v4652_v2 = vadd.f32 %v4636_v28, %v4506_v50  ;;  %v4638_v53 = vmul.f32 %v4566_v38, %v10145_v29  ;;  %v4640_v46 = vmul.f32 %v4619_v18, %v10147_v39  ;;  %v4568_v40 = vpop.f32.mrb[175].mxu0  ;;  %v4621_v24 = vpop.f32.mrb[171].mxu1 }
 0x8c2   : > { %v4651_v32 = vadd.f32 %v4635_v43, %v4505_v36  ;;  %v4653_v63 = vadd.f32 %v4637_v22, %v4507_v7  ;;  %v4639_v11 = vmul.f32 %v4568_v40, %v10151_v20  ;;  %v4641_v1 = vmul.f32 %v4621_v24, %v10153_v56  ;;  %v11416_v40 = vld [vmem:[#allocation20_spill] sm:$0xff] }
 0x8c3   : > { %v4654_v15 = vadd.f32 %v4638_v53, %v4508_v9  ;;  %v4656_v61 = vadd.f32 %v4640_v46, %v4510_v13  ;;  %v11415_v53 = vld [vmem:[#allocation18_spill] sm:$0xff] }
 0x8c4   : > { %v4655_v59 = vadd.f32 %v4639_v11, %v4509_v52  ;;  %v4657_v10 = vadd.f32 %v4641_v1, %v4511_v25 }
 0x8c6   : > { %v4572_v54 = vpop.f32.mrb[176].mxu0  ;;  %v4625_v6 = vpop.f32.mrb[172].mxu1 }
 0x8c7   : > { %v4642_v50 = vmul.f32 %v4572_v54, %v10161_v14  ;;  %v4644_v29 = vmul.f32 %v4625_v6, %v10163_v57  ;;  %v4574_v55 = vpop.f32.mrb[177].mxu0  ;;  %v4627_v39 = vpop.f32.mrb[173].mxu1 }
 0x8c8   : > { %v4643_v51 = vmul.f32 %v4574_v55, %v10165_v21  ;;  %v4645_v36 = vmul.f32 %v4627_v39, %v10167_v33  ;;  %v4576_v7 = vpop.f32.mrb[178].mxu0  ;;  %v4629_v20 = vpop.f32.mrb[174].mxu1  ;;  %v11418_v55 = vld [vmem:[#allocation23_spill] sm:$0xff] }
 0x8c9   : > { %v4658_v48 = vadd.f32 %v4642_v50, %v4512_v27  ;;  %v4660_v56 = vadd.f32 %v4644_v29, %v4514_v23  ;;  %v4646_v9 = vmul.f32 %v4576_v7, %v10169_v17  ;;  %v4648_v13 = vmul.f32 %v4629_v20, %v10171_v16  ;;  %v4578_v52 = vpop.f32.mrb[179].mxu0  ;;  %v4631_v25 = vpop.f32.mrb[175].mxu1  ;;  %v11409_v27 = vld [vmem:[#allocation13_spill] sm:$0xff]  ;;  %v11419_v7 = vld [vmem:[#allocation22_spill] sm:$0xff] }
 0x8ca   : > { %v4659_v58 = vadd.f32 %v4643_v51, %v4513_v35  ;;  %v4661_v14 = vadd.f32 %v4645_v36, %v4515_v0  ;;  %v4647_v57 = vmul.f32 %v4578_v52, %v11407_v3  ;;  %v4649_v8 = vmul.f32 %v4631_v25, %v11408_v47  ;;  %v11412_v35 = vld [vmem:[#allocation16_spill] sm:$0xff] }
 0x8cb   : > { %v4662_v45 = vadd.f32 %v4646_v9, %v4516_v30  ;;  %v4664_v21 = vadd.f32 %v4648_v13, %v4518_v41  ;;  %v11413_v30 = vld [vmem:[#allocation17_spill] sm:$0xff] }
 0x8cc   : > { %v4663_v26 = vadd.f32 %v4647_v57, %v4517_v42  ;;  %v4665_v33 = vadd.f32 %v4649_v8, %v4519_v5  ;;  %v11414_v42 = vld [vmem:[#allocation19_spill] sm:$0xff] }
 0x8ce   : > { %v4708_v34 = vpop.f32.mrb[180].mxu0  ;;  %v4761_v62 = vpop.f32.mrb[176].mxu1 }
 0x8cf   : > { %v4780_v23 = vmul.f32 %v4708_v34, %v11409_v27  ;;  %v4782_v17 = vmul.f32 %v4761_v62, %v11410_v49  ;;  %v4710_v19 = vpop.f32.mrb[181].mxu0  ;;  %v4763_v16 = vpop.f32.mrb[177].mxu1  ;;  %v11423_v34 = vld [vmem:[#allocation26_spill] sm:$0xff]  ;;  %v11424_v27 = vld [vmem:[#allocation28_spill] sm:$0xff] }
 0x8d0   : > { %v4781_v31 = vmul.f32 %v4710_v19, %v11411_v60  ;;  %v4783_v0 = vmul.f32 %v4763_v16, %v11412_v35  ;;  %v4712_v4 = vpop.f32.mrb[182].mxu0  ;;  %v4765_v28 = vpop.f32.mrb[178].mxu1  ;;  %v11426_v35 = vld [vmem:[#allocation31_spill] sm:$0xff] }
 0x8d1   : > { %v4796_v44 = vadd.f32 %v4780_v23, %v4650_v37  ;;  %v4798_v12 = vadd.f32 %v4782_v17, %v4652_v2  ;;  %v4784_v41 = vmul.f32 %v4712_v4, %v11413_v30  ;;  %v4786_v5 = vmul.f32 %v4765_v28, %v11414_v42  ;;  %v4714_v43 = vpop.f32.mrb[183].mxu0  ;;  %v4767_v22 = vpop.f32.mrb[179].mxu1  ;;  %v11417_v37 = vld [vmem:[#allocation21_spill] sm:$0xff]  ;;  %v11427_v30 = vld [vmem:[#allocation30_spill] sm:$0xff] }
 0x8d2   : > { %v4797_v38 = vadd.f32 %v4781_v31, %v4651_v32  ;;  %v4799_v18 = vadd.f32 %v4783_v0, %v4653_v63  ;;  %v4785_v46 = vmul.f32 %v4714_v43, %v11415_v53  ;;  %v4787_v24 = vmul.f32 %v4767_v22, %v11416_v40  ;;  %v11420_v32 = vld [vmem:[#allocation24_spill] sm:$0xff] }
 0x8d3   : > { %v4800_v11 = vadd.f32 %v4784_v41, %v4654_v15  ;;  %v4802_v1 = vadd.f32 %v4786_v5, %v4656_v61  ;;  %v11421_v15 = vld [vmem:[#allocation25_spill] sm:$0xff] }
 0x8d4   : > { %v4801_v54 = vadd.f32 %v4785_v46, %v4655_v59  ;;  %v4803_v6 = vadd.f32 %v4787_v24, %v4657_v10  ;;  %v11422_v59 = vld [vmem:[#allocation27_spill] sm:$0xff] }
 0x8d6   : > { %v4718_v50 = vpop.f32.mrb[184].mxu0  ;;  %v4771_v29 = vpop.f32.mrb[180].mxu1 }
 0x8d7   : > { %v4788_v2 = vmul.f32 %v4718_v50, %v11417_v37  ;;  %v4790_v39 = vmul.f32 %v4771_v29, %v11418_v55  ;;  %v4720_v51 = vpop.f32.mrb[185].mxu0  ;;  %v4773_v36 = vpop.f32.mrb[181].mxu1  ;;  %v11431_v50 = vld [vmem:[#allocation34_spill] sm:$0xff]  ;;  %v11432_v37 = vld [vmem:[#allocation37_spill] sm:$0xff] }
 0x8d8   : > { %v4789_v20 = vmul.f32 %v4720_v51, %v11419_v7  ;;  %v4791_v63 = vmul.f32 %v4773_v36, %v11420_v32  ;;  %v4722_v9 = vpop.f32.mrb[186].mxu0  ;;  %v4775_v13 = vpop.f32.mrb[182].mxu1  ;;  %v11434_v32 = vld [vmem:[#allocation38_spill] sm:$0xff] }
 0x8d9   : > { %v4804_v52 = vadd.f32 %v4788_v2, %v4658_v48  ;;  %v4806_v25 = vadd.f32 %v4790_v39, %v4660_v56  ;;  %v4792_v61 = vmul.f32 %v4722_v9, %v11421_v15  ;;  %v4794_v10 = vmul.f32 %v4775_v13, %v11422_v59  ;;  %v4724_v3 = vpop.f32.mrb[187].mxu0  ;;  %v4777_v57 = vpop.f32.mrb[183].mxu1  ;;  %v11425_v48 = vld [vmem:[#allocation29_spill] sm:$0xff]  ;;  %v11435_v15 = vld [vmem:[#allocation40_spill] sm:$0xff] }
 0x8da   : > { %v4805_v47 = vadd.f32 %v4789_v20, %v4659_v58  ;;  %v4807_v8 = vadd.f32 %v4791_v63, %v4661_v14  ;;  %v4793_v62 = vmul.f32 %v4724_v3, %v11423_v34  ;;  %v4795_v23 = vmul.f32 %v4777_v57, %v11424_v27  ;;  %v11428_v58 = vld [vmem:[#allocation32_spill] sm:$0xff] }
 0x8db   : > { %v4808_v49 = vadd.f32 %v4792_v61, %v4662_v45  ;;  %v4810_v17 = vadd.f32 %v4794_v10, %v4664_v21  ;;  %v11429_v45 = vld [vmem:[#allocation33_spill] sm:$0xff] }
 0x8dc   : > { %v4809_v19 = vadd.f32 %v4793_v62, %v4663_v26  ;;  %v4811_v16 = vadd.f32 %v4795_v23, %v4665_v33  ;;  %v11430_v26 = vld [vmem:[#allocation35_spill] sm:$0xff] }
 0x8de   : > { %v4854_v60 = vpop.f32.mrb[188].mxu0  ;;  %v4907_v31 = vpop.f32.mrb[184].mxu1 }
 0x8df   : > { %v4926_v56 = vmul.f32 %v4854_v60, %v11425_v48  ;;  %v4928_v0 = vmul.f32 %v4907_v31, %v11426_v35  ;;  %v4856_v4 = vpop.f32.mrb[189].mxu0  ;;  %v4909_v28 = vpop.f32.mrb[185].mxu1  ;;  %v11439_v60 = vld [vmem:[#allocation43_spill] sm:$0xff]  ;;  %v11440_v48 = vld [vmem:[#allocation44_spill] sm:$0xff] }
 0x8e0   : > { %v4927_v41 = vmul.f32 %v4856_v4, %v11427_v30  ;;  %v4929_v14 = vmul.f32 %v4909_v28, %v11428_v58  ;;  %v4858_v42 = vpop.f32.mrb[190].mxu0  ;;  %v4911_v5 = vpop.f32.mrb[186].mxu1  ;;  %v11442_v58 = vld [vmem:[#allocation45_spill] sm:$0xff] }
 0x8e1   : > { %v4942_v43 = vadd.f32 %v4926_v56, %v4796_v44  ;;  %v4944_v22 = vadd.f32 %v4928_v0, %v4798_v12  ;;  %v4930_v21 = vmul.f32 %v4858_v42, %v11429_v45  ;;  %v4932_v33 = vmul.f32 %v4911_v5, %v11430_v26  ;;  %v4860_v53 = vpop.f32.mrb[191].mxu0  ;;  %v4913_v46 = vpop.f32.mrb[187].mxu1  ;;  %v11433_v44 = vld [vmem:[#allocation36_spill] sm:$0xff]  ;;  %v11443_v45 = vld [vmem:[#allocation47_spill] sm:$0xff] }
 0x8e2   : > { %v4943_v40 = vadd.f32 %v4927_v41, %v4797_v38  ;;  %v4945_v24 = vadd.f32 %v4929_v14, %v4799_v18  ;;  %v4931_v29 = vmul.f32 %v4860_v53, %v11431_v50  ;;  %v4933_v2 = vmul.f32 %v4913_v46, %v11432_v37  ;;  %v11436_v38 = vld [vmem:[#allocation39_spill] sm:$0xff] }
 0x8e3   : > { %v4946_v55 = vadd.f32 %v4930_v21, %v4800_v11  ;;  %v4948_v39 = vadd.f32 %v4932_v33, %v4802_v1  ;;  %v11437_v11 = vld [vmem:[#allocation41_spill] sm:$0xff] }
 0x8e4   : > { %v4947_v51 = vadd.f32 %v4931_v29, %v4801_v54  ;;  %v4949_v36 = vadd.f32 %v4933_v2, %v4803_v6  ;;  %v11438_v54 = vld [vmem:[#allocation42_spill] sm:$0xff] }
 0x8e6   : > { %v4864_v7 = vpop.f32.mrb[192].mxu0  ;;  %v4917_v20 = vpop.f32.mrb[188].mxu1 }
 0x8e7   : > { %v4934_v12 = vmul.f32 %v4864_v7, %v11433_v44  ;;  %v4936_v63 = vmul.f32 %v4917_v20, %v11434_v32  ;;  %v4866_v9 = vpop.f32.mrb[193].mxu0  ;;  %v4919_v13 = vpop.f32.mrb[189].mxu1  ;;  %v11447_v7 = vld [vmem:[#allocation51_spill] sm:$0xff]  ;;  %v11448_v44 = vld [vmem:[#allocation52_spill] sm:$0xff] }
 0x8e8   : > { %v4935_v61 = vmul.f32 %v4866_v9, %v11435_v15  ;;  %v4937_v18 = vmul.f32 %v4919_v13, %v11436_v38  ;;  %v4868_v59 = vpop.f32.mrb[194].mxu0  ;;  %v4921_v10 = vpop.f32.mrb[190].mxu1  ;;  %v11450_v38 = vld [vmem:[#allocation53_spill] sm:$0xff] }
 0x8e9   : > { %v4950_v3 = vadd.f32 %v4934_v12, %v4804_v52  ;;  %v4952_v57 = vadd.f32 %v4936_v63, %v4806_v25  ;;  %v4938_v1 = vmul.f32 %v4868_v59, %v11437_v11  ;;  %v4940_v6 = vmul.f32 %v4921_v10, %v11438_v54  ;;  %v4870_v34 = vpop.f32.mrb[195].mxu0  ;;  %v4923_v62 = vpop.f32.mrb[191].mxu1  ;;  %v11441_v52 = vld [vmem:[#allocation46_spill] sm:$0xff]  ;;  %v11451_v11 = vld [vmem:[#allocation55_spill] sm:$0xff] }
 0x8ea   : > { %v4951_v27 = vadd.f32 %v4935_v61, %v4805_v47  ;;  %v4953_v23 = vadd.f32 %v4937_v18, %v4807_v8  ;;  %v4939_v31 = vmul.f32 %v4870_v34, %v11439_v60  ;;  %v4941_v56 = vmul.f32 %v4923_v62, %v11440_v48  ;;  %v11444_v47 = vld [vmem:[#allocation48_spill] sm:$0xff] }
 0x8eb   : > { %v4954_v35 = vadd.f32 %v4938_v1, %v4808_v49  ;;  %v4956_v0 = vadd.f32 %v4940_v6, %v4810_v17  ;;  %v11445_v49 = vld [vmem:[#allocation50_spill] sm:$0xff] }
 0x8ec   : > { %v4955_v4 = vadd.f32 %v4939_v31, %v4809_v19  ;;  %v4957_v28 = vadd.f32 %v4941_v56, %v4811_v16  ;;  %v11446_v19 = vld [vmem:[#allocation49_spill] sm:$0xff] }
 0x8ee   : > { %v5000_v30 = vpop.f32.mrb[196].mxu0  ;;  %v5053_v41 = vpop.f32.mrb[192].mxu1 }
 0x8ef   : > { %v5072_v25 = vmul.f32 %v5000_v30, %v11441_v52  ;;  %v5074_v14 = vmul.f32 %v5053_v41, %v11442_v58  ;;  %v5002_v42 = vpop.f32.mrb[197].mxu0  ;;  %v5055_v5 = vpop.f32.mrb[193].mxu1  ;;  %v11455_v30 = vld [vmem:[#allocation59_spill] sm:$0xff]  ;;  %v11456_v52 = vld [vmem:[#allocation60_spill] sm:$0xff] }
 0x8f0   : > { %v5073_v21 = vmul.f32 %v5002_v42, %v11443_v45  ;;  %v5075_v8 = vmul.f32 %v5055_v5, %v11444_v47  ;;  %v5004_v26 = vpop.f32.mrb[198].mxu0  ;;  %v5057_v33 = vpop.f32.mrb[194].mxu1  ;;  %v11458_v47 = vld [vmem:[#allocation61_spill] sm:$0xff] }
 0x8f1   : > { %v5088_v53 = vadd.f32 %v5072_v25, %v4942_v43  ;;  %v5090_v46 = vadd.f32 %v5074_v14, %v4944_v22  ;;  %v5076_v17 = vmul.f32 %v5004_v26, %v11445_v49  ;;  %v5078_v16 = vmul.f32 %v5057_v33, %v11446_v19  ;;  %v5006_v50 = vpop.f32.mrb[199].mxu0  ;;  %v5059_v29 = vpop.f32.mrb[195].mxu1  ;;  %v11449_v43 = vld [vmem:[#allocation54_spill] sm:$0xff]  ;;  %v11459_v49 = vld [vmem:[#allocation63_spill] sm:$0xff] }
 0x8f2   : > { %v5089_v37 = vadd.f32 %v5073_v21, %v4943_v40  ;;  %v5091_v2 = vadd.f32 %v5075_v8, %v4945_v24  ;;  %v5077_v20 = vmul.f32 %v5006_v50, %v11447_v7  ;;  %v5079_v12 = vmul.f32 %v5059_v29, %v11448_v44  ;;  %v11452_v40 = vld [vmem:[#allocation56_spill] sm:$0xff] }
 0x8f3   : > { %v5092_v32 = vadd.f32 %v5076_v17, %v4946_v55  ;;  %v5094_v63 = vadd.f32 %v5078_v16, %v4948_v39  ;;  %v11453_v55 = vld [vmem:[#allocation58_spill] sm:$0xff] }
 0x8f4   : > { %v5093_v9 = vadd.f32 %v5077_v20, %v4947_v51  ;;  %v5095_v13 = vadd.f32 %v5079_v12, %v4949_v36  ;;  %v11454_v51 = vld [vmem:[#allocation57_spill] sm:$0xff] }
 0x8f6   : > { %v5010_v15 = vpop.f32.mrb[200].mxu0  ;;  %v5063_v61 = vpop.f32.mrb[196].mxu1 }
 0x8f7   : > { %v5080_v22 = vmul.f32 %v5010_v15, %v11449_v43  ;;  %v5082_v18 = vmul.f32 %v5063_v61, %v11450_v38  ;;  %v5012_v59 = vpop.f32.mrb[201].mxu0  ;;  %v5065_v10 = vpop.f32.mrb[197].mxu1  ;;  %v11463_v15 = vld [vmem:[#allocation67_spill] sm:$0xff]  ;;  %v11464_v43 = vld [vmem:[#allocation69_spill] sm:$0xff] }
 0x8f8   : > { %v5081_v1 = vmul.f32 %v5012_v59, %v11451_v11  ;;  %v5083_v24 = vmul.f32 %v5065_v10, %v11452_v40  ;;  %v5014_v54 = vpop.f32.mrb[202].mxu0  ;;  %v5067_v6 = vpop.f32.mrb[198].mxu1  ;;  %v11466_v40 = vld [vmem:[#allocation68_spill] sm:$0xff] }
 0x8f9   : > { %v5096_v34 = vadd.f32 %v5080_v22, %v4950_v3  ;;  %v5098_v62 = vadd.f32 %v5082_v18, %v4952_v57  ;;  %v5084_v39 = vmul.f32 %v5014_v54, %v11453_v55  ;;  %v5086_v36 = vmul.f32 %v5067_v6, %v11454_v51  ;;  %v5016_v60 = vpop.f32.mrb[203].mxu0  ;;  %v5069_v31 = vpop.f32.mrb[199].mxu1  ;;  %v11457_v3 = vld [vmem:[#allocation62_spill] sm:$0xff] }
 0x8fa   : > { %v5097_v48 = vadd.f32 %v5081_v1, %v4951_v27  ;;  %v5099_v56 = vadd.f32 %v5083_v24, %v4953_v23  ;;  %v5085_v41 = vmul.f32 %v5016_v60, %v11455_v30  ;;  %v5087_v25 = vmul.f32 %v5069_v31, %v11456_v52  ;;  %v11460_v27 = vld [vmem:[#allocation64_spill] sm:$0xff]  ;;  %v11467_v55 = vld [vmem:[#allocation70_spill] sm:$0xff] }
 0x8fb   : > { %v5100_v58 = vadd.f32 %v5084_v39, %v4954_v35  ;;  %v5102_v14 = vadd.f32 %v5086_v36, %v4956_v0  ;;  %v11461_v35 = vld [vmem:[#allocation66_spill] sm:$0xff] }
 0x8fc   : > { %v5101_v42 = vadd.f32 %v5085_v41, %v4955_v4  ;;  %v5103_v5 = vadd.f32 %v5087_v25, %v4957_v28  ;;  %v11462_v4 = vld [vmem:[#allocation65_spill] sm:$0xff] }
 0x8fe   : > { %v5146_v45 = vpop.f32.mrb[204].mxu0  ;;  %v5199_v21 = vpop.f32.mrb[200].mxu1 }
 0x8ff   : > { %v5218_v57 = vmul.f32 %v5146_v45, %v11457_v3  ;;  %v5220_v8 = vmul.f32 %v5199_v21, %v11458_v47  ;;  %v5148_v26 = vpop.f32.mrb[205].mxu0  ;;  %v5201_v33 = vpop.f32.mrb[201].mxu1  ;;  %v11471_v45 = vld [vmem:[#allocation74_spill] sm:$0xff]  ;;  %v11472_v3 = vld [vmem:[#allocation76_spill] sm:$0xff] }
 0x900   : > { %v5219_v17 = vmul.f32 %v5148_v26, %v11459_v49  ;;  %v5221_v23 = vmul.f32 %v5201_v33, %v11460_v27  ;;  %v5150_v19 = vpop.f32.mrb[206].mxu0  ;;  %v5203_v16 = vpop.f32.mrb[202].mxu1  ;;  %v11474_v27 = vld [vmem:[#allocation77_spill] sm:$0xff] }
 0x901   : > { %v5234_v50 = vadd.f32 %v5218_v57, %v5088_v53  ;;  %v5236_v29 = vadd.f32 %v5220_v8, %v5090_v46  ;;  %v5222_v0 = vmul.f32 %v5150_v19, %v11461_v35  ;;  %v5224_v28 = vmul.f32 %v5203_v16, %v11462_v4  ;;  %v5152_v7 = vpop.f32.mrb[207].mxu0  ;;  %v5205_v20 = vpop.f32.mrb[203].mxu1  ;;  %v11465_v53 = vld [vmem:[#allocation71_spill] sm:$0xff]  ;;  %v11475_v35 = vld [vmem:[#allocation80_spill] sm:$0xff] }
 0x902   : > { %v5235_v44 = vadd.f32 %v5219_v17, %v5089_v37  ;;  %v5237_v12 = vadd.f32 %v5221_v23, %v5091_v2  ;;  %v5223_v61 = vmul.f32 %v5152_v7, %v11463_v15  ;;  %v5225_v22 = vmul.f32 %v5205_v20, %v11464_v43  ;;  %v11468_v37 = vld [vmem:[#allocation73_spill] sm:$0xff] }
 0x903   : > { %v5238_v38 = vadd.f32 %v5222_v0, %v5092_v32  ;;  %v5240_v18 = vadd.f32 %v5224_v28, %v5094_v63  ;;  %v11469_v32 = vld [vmem:[#allocation75_spill] sm:$0xff] }
 0x904   : > { %v5239_v59 = vadd.f32 %v5223_v61, %v5093_v9  ;;  %v5241_v10 = vadd.f32 %v5225_v22, %v5095_v13  ;;  %v11470_v9 = vld [vmem:[#allocation72_spill] sm:$0xff] }
 0x906   : > { %v5156_v11 = vpop.f32.mrb[208].mxu0  ;;  %v5209_v1 = vpop.f32.mrb[204].mxu1 }
 0x907   : > { %v5226_v46 = vmul.f32 %v5156_v11, %v11465_v53  ;;  %v5228_v24 = vmul.f32 %v5209_v1, %v11466_v40  ;;  %v5158_v54 = vpop.f32.mrb[209].mxu0  ;;  %v5211_v6 = vpop.f32.mrb[205].mxu1  ;;  %v11479_v11 = vld [vmem:[#allocation84_spill] sm:$0xff]  ;;  %v11480_v53 = vld [vmem:[#allocation83_spill] sm:$0xff] }
 0x908   : > { %v5227_v39 = vmul.f32 %v5158_v54, %v11467_v55  ;;  %v5229_v2 = vmul.f32 %v5211_v6, %v11468_v37  ;;  %v5160_v51 = vpop.f32.mrb[210].mxu0  ;;  %v5213_v36 = vpop.f32.mrb[206].mxu1  ;;  %v11482_v37 = vld [vmem:[#allocation85_spill] sm:$0xff] }
 0x909   : > { %v5242_v60 = vadd.f32 %v5226_v46, %v5096_v34  ;;  %v5244_v31 = vadd.f32 %v5228_v24, %v5098_v62  ;;  %v5230_v63 = vmul.f32 %v5160_v51, %v11469_v32  ;;  %v5232_v13 = vmul.f32 %v5213_v36, %v11470_v9  ;;  %v5162_v30 = vpop.f32.mrb[211].mxu0  ;;  %v5215_v41 = vpop.f32.mrb[207].mxu1  ;;  %v11473_v34 = vld [vmem:[#allocation78_spill] sm:$0xff]  ;;  %v11483_v32 = vld [vmem:[#allocation88_spill] sm:$0xff] }
 0x90a   : > { %v5243_v52 = vadd.f32 %v5227_v39, %v5097_v48  ;;  %v5245_v25 = vadd.f32 %v5229_v2, %v5099_v56  ;;  %v5231_v21 = vmul.f32 %v5162_v30, %v11471_v45  ;;  %v5233_v57 = vmul.f32 %v5215_v41, %v11472_v3  ;;  %v11476_v48 = vld [vmem:[#allocation79_spill] sm:$0xff] }
 0x90b   : > { %v5246_v47 = vadd.f32 %v5230_v63, %v5100_v58  ;;  %v5248_v8 = vadd.f32 %v5232_v13, %v5102_v14  ;;  %v11477_v58 = vld [vmem:[#allocation82_spill] sm:$0xff] }
 0x90c   : > { %v5247_v26 = vadd.f32 %v5231_v21, %v5101_v42  ;;  %v5249_v33 = vadd.f32 %v5233_v57, %v5103_v5  ;;  %v11478_v42 = vld [vmem:[#allocation81_spill] sm:$0xff] }
 0x90e   : > { %v5292_v49 = vpop.f32.mrb[212].mxu0  ;;  %v5345_v17 = vpop.f32.mrb[208].mxu1 }
 0x90f   : > { %v5364_v62 = vmul.f32 %v5292_v49, %v11473_v34  ;;  %v5366_v23 = vmul.f32 %v5345_v17, %v11474_v27  ;;  %v5294_v19 = vpop.f32.mrb[213].mxu0  ;;  %v5347_v16 = vpop.f32.mrb[209].mxu1  ;;  %v11487_v49 = vld [vmem:[#allocation92_spill] sm:$0xff]  ;;  %v11488_v34 = vld [vmem:[#allocation91_spill] sm:$0xff] }
 0x910   : > { %v5365_v0 = vmul.f32 %v5294_v19, %v11475_v35  ;;  %v5367_v56 = vmul.f32 %v5347_v16, %v11476_v48  ;;  %v5296_v4 = vpop.f32.mrb[214].mxu0  ;;  %v5349_v28 = vpop.f32.mrb[210].mxu1  ;;  %v11489_v35 = vld [vmem:[#allocation94_spill] sm:$0xff] }
 0x911   : > { %v5380_v7 = vadd.f32 %v5364_v62, %v5234_v50  ;;  %v5382_v20 = vadd.f32 %v5366_v23, %v5236_v29  ;;  %v5368_v14 = vmul.f32 %v5296_v4, %v11477_v58  ;;  %v5370_v5 = vmul.f32 %v5349_v28, %v11478_v42  ;;  %v5298_v15 = vpop.f32.mrb[215].mxu0  ;;  %v5351_v61 = vpop.f32.mrb[211].mxu1  ;;  %v11481_v50 = vld [vmem:[#allocation86_spill] sm:$0xff]  ;;  %v11491_v4 = vld [vmem:[#allocation96_spill] sm:$0xff]  ;;  %v11492_v58 = vld [vmem:[#allocation95_spill] sm:$0xff] }
 0x912   : > { %v5381_v43 = vadd.f32 %v5365_v0, %v5235_v44  ;;  %v5383_v22 = vadd.f32 %v5367_v56, %v5237_v12  ;;  %v5369_v1 = vmul.f32 %v5298_v15, %v11479_v11  ;;  %v5371_v46 = vmul.f32 %v5351_v61, %v11480_v53  ;;  %v11484_v44 = vld [vmem:[#allocation87_spill] sm:$0xff]  ;;  %v11494_v15 = vld [vmem:[#allocation97_spill] sm:$0xff] }
 0x913   : > { %v5384_v40 = vadd.f32 %v5368_v14, %v5238_v38  ;;  %v5386_v24 = vadd.f32 %v5370_v5, %v5240_v18  ;;  %v11485_v18 = vld [vmem:[#allocation90_spill] sm:$0xff] }
 0x914   : > { %v5385_v54 = vadd.f32 %v5369_v1, %v5239_v59  ;;  %v5387_v6 = vadd.f32 %v5371_v46, %v5241_v10  ;;  %v11486_v10 = vld [vmem:[#allocation89_spill] sm:$0xff] }
 0x916   : > { %v5302_v55 = vpop.f32.mrb[216].mxu0  ;;  %v5355_v39 = vpop.f32.mrb[212].mxu1 }
 0x917   : > { %v5372_v29 = vmul.f32 %v5302_v55, %v11481_v50  ;;  %v5374_v2 = vmul.f32 %v5355_v39, %v11482_v37  ;;  %v5304_v51 = vpop.f32.mrb[217].mxu0  ;;  %v5357_v36 = vpop.f32.mrb[213].mxu1  ;;  %v11495_v55 = vld [vmem:[#allocation101_spill] sm:$0xff]  ;;  %v11496_v50 = vld [vmem:[#allocation99_spill] sm:$0xff] }
 0x918   : > { %v5373_v63 = vmul.f32 %v5304_v51, %v11483_v32  ;;  %v5375_v12 = vmul.f32 %v5357_v36, %v11484_v44  ;;  %v5306_v9 = vpop.f32.mrb[218].mxu0  ;;  %v5359_v13 = vpop.f32.mrb[214].mxu1 }
 0x919   : > { %v10553_v30 = vadd.f32 %v5372_v29, %v5242_v60  ;;  %v10555_v38 = vadd.f32 %v5374_v2, %v5244_v31  ;;  %v5376_v59 = vmul.f32 %v5306_v9, %v11485_v18  ;;  %v5378_v41 = vmul.f32 %v5359_v13, %v11486_v10  ;;  %v5308_v45 = vpop.f32.mrb[219].mxu0  ;;  %v5361_v21 = vpop.f32.mrb[215].mxu1 }
 0x91a   : > { %v10559_v3 = vadd.f32 %v5373_v63, %v5243_v52  ;;  %v10561_v57 = vadd.f32 %v5375_v12, %v5245_v25  ;;  %v5377_v17 = vmul.f32 %v5308_v45, %v11487_v49  ;;  %v5379_v62 = vmul.f32 %v5361_v21, %v11488_v34  ;;  %v11490_v52 = vld [vmem:[#allocation93_spill] sm:$0xff]  ;;  %v11497_v45 = vld [vmem:[#allocation103_spill] sm:$0xff]  ;;  %v11498_v34 = vld [vmem:[#allocation100_spill] sm:$0xff] }
 0x91b   : > { %v10565_v27 = vadd.f32 %v5376_v59, %v5246_v47  ;;  %v10567_v60 = vadd.f32 %v5378_v41, %v5248_v8 }
 0x91c   : > { %v10569_v31 = vadd.f32 %v5377_v17, %v5247_v26  ;;  %v10571_v23 = vadd.f32 %v5379_v62, %v5249_v33  ;;  %v11493_v33 = vld [vmem:[#allocation98_spill] sm:$0xff] }
 0x91e   : > { %v5438_v19 = vpop.f32.mrb[220].mxu0  ;;  %v5491_v16 = vpop.f32.mrb[216].mxu1 }
 0x91f   : > { %v5510_v0 = vmul.f32 %v5438_v19, %v11489_v35  ;;  %v5512_v48 = vmul.f32 %v5491_v16, %v11490_v52  ;;  %v5440_v25 = vpop.f32.mrb[221].mxu0  ;;  %v5493_v56 = vpop.f32.mrb[217].mxu1  ;;  %v11499_v19 = vld [vmem:[#allocation104_spill] sm:$0xff]  ;;  %v11500_v35 = vld [vmem:[#allocation102_spill] sm:$0xff] }
 0x920   : > { %v5511_v28 = vmul.f32 %v5440_v25, %v11491_v4  ;;  %v5513_v14 = vmul.f32 %v5493_v56, %v11492_v58  ;;  %v5442_v47 = vpop.f32.mrb[222].mxu0  ;;  %v5495_v42 = vpop.f32.mrb[218].mxu1  ;;  %v11501_v56 = vld [vmem:[#allocation105_spill] sm:$0xff] }
 0x921   : > { %v10577_v8 = vadd.f32 %v5510_v0, %v5380_v7  ;;  %v10579_v26 = vadd.f32 %v5512_v48, %v5382_v20  ;;  %v5514_v5 = vmul.f32 %v5442_v47, %v11493_v33  ;;  %v5516_v61 = vmul.f32 %v5495_v42, %v11494_v15  ;;  %v5444_v11 = vpop.f32.mrb[223].mxu0  ;;  %v5497_v1 = vpop.f32.mrb[219].mxu1 }
 0x922   : > { %v10583_v53 = vadd.f32 %v5511_v28, %v5381_v43  ;;  %v10585_v46 = vadd.f32 %v5513_v14, %v5383_v22  ;;  %v5515_v39 = vmul.f32 %v5444_v11, %v11495_v55  ;;  %v5517_v29 = vmul.f32 %v5497_v1, %v11496_v50  ;;  %v11502_v28 = vld [vmem:[#allocation130_spill] sm:$0xff]  ;;  %v11503_v50 = vld [vmem:[#allocation131_spill] sm:$0xff] }
 0x923   : > { %v5542_v37 = vsub.f32 0.0, %v10577_v8  ;;  %v5544_v7 = vsub.f32 0.0, %v10579_v26  ;;  %v10591_v20 = vadd.f32 %v5514_v5, %v5384_v40  ;;  %v10593_v2 = vadd.f32 %v5516_v61, %v5386_v24 }
 0x924   : > { %v5543_v51 = vsub.f32 0.0, %v10583_v53  ;;  %v5545_v36 = vsub.f32 0.0, %v10585_v46  ;;  %v10597_v43 = vadd.f32 %v5515_v39, %v5385_v54  ;;  %v10599_v22 = vadd.f32 %v5517_v29, %v5387_v6 }
 0x925   : > { %v5558_v32 = vmul.f32 1.442695, %v5542_v37  ;;  %v5562_v63 = vmul.f32 1.442695, %v5544_v7  ;;  %v5546_v44 = vsub.f32 0.0, %v10591_v20  ;;  %v5548_v12 = vsub.f32 0.0, %v10593_v2 }
 0x926   : > { %v5560_v9 = vmul.f32 1.442695, %v5543_v51  ;;  %v5564_v13 = vmul.f32 1.442695, %v5545_v36  ;;  %v5547_v40 = vsub.f32 0.0, %v10597_v43  ;;  %v5549_v24 = vsub.f32 0.0, %v10599_v22 }
 0x927   : > { %7808 = vpow2.f32 %v5558_v32  ;;  %v5566_v18 = vmul.f32 1.442695, %v5546_v44  ;;  %v5570_v59 = vmul.f32 1.442695, %v5548_v12  ;;  %v5448_v10 = vpop.f32.mrb[224].mxu0  ;;  %v5501_v54 = vpop.f32.mrb[220].mxu1 }
 0x928   : > { %7810 = vpow2.f32 %v5562_v63  ;;  %v5568_v6 = vmul.f32 1.442695, %v5547_v40  ;;  %v5572_v41 = vmul.f32 1.442695, %v5549_v24  ;;  %v5518_v21 = vmul.f32 %v5448_v10, %v11497_v45  ;;  %v5450_v49 = vpop.f32.mrb[225].mxu0  ;;  %v5503_v17 = vpop.f32.mrb[221].mxu1 }
 0x929   : > { %7812 = vpow2.f32 %v5560_v9  ;;  %v5520_v62 = vmul.f32 %v5501_v54, %v11498_v34  ;;  %v5519_v16 = vmul.f32 %v5450_v49, %v11499_v19  ;;  %v5521_v0 = vmul.f32 %v5503_v17, %v11500_v35  ;;  %v5452_v52 = vpop.f32.mrb[226].mxu0  ;;  %v5505_v48 = vpop.f32.mrb[222].mxu1 }
 0x92a   : > { %7814 = vpow2.f32 %v5564_v13  ;;  %v10610_v25 = vadd.f32 %v5518_v21, %v10553_v30  ;;  %v5522_v4 = vmul.f32 %v5452_v52, %v11501_v56  ;;  %v5524_v58 = vmul.f32 %v5505_v48, %v11502_v28  ;;  %v5454_v14 = vpop.f32.mrb[227].mxu0  ;;  %v5507_v47 = vpop.f32.mrb[223].mxu1 }
 0x92b   : > { %7816 = vpow2.f32 %v5566_v18  ;;  %v10615_v42 = vadd.f32 %v5520_v62, %v10555_v38  ;;  %v10618_v33 = vadd.f32 %v5519_v16, %v10559_v3  ;;  %v10621_v5 = vadd.f32 %v5521_v0, %v10561_v57 }
 0x92c   : > { %7818 = vpow2.f32 %v5570_v59  ;;  %v5550_v30 = vsub.f32 0.0, %v10610_v25  ;;  %v10625_v15 = vadd.f32 %v5522_v4, %v10565_v27  ;;  %v10628_v61 = vadd.f32 %v5524_v58, %v10567_v60  ;;  %v11504_v27 = vld [vmem:[#allocation132_spill] sm:$0xff] }
 0x92d   : > { %7820 = vpow2.f32 %v5568_v6  ;;  %v5552_v11 = vsub.f32 0.0, %v10615_v42  ;;  %v5551_v38 = vsub.f32 0.0, %v10618_v33  ;;  %v5553_v3 = vsub.f32 0.0, %v10621_v5 }
 0x92e   : > { %7822 = vpow2.f32 %v5572_v41  ;;  %v5574_v1 = vmul.f32 1.442695, %v5550_v30  ;;  %v5523_v29 = vmul.f32 %v5454_v14, %v11503_v50  ;;  %v5525_v37 = vmul.f32 %v5507_v47, %v11504_v27 }
 0x92f   : > { %v5578_v57 = vmul.f32 1.442695, %v5552_v11  ;;  %v5576_v55 = vmul.f32 1.442695, %v5551_v38  ;;  %v5580_v39 = vmul.f32 1.442695, %v5553_v3 }
 0x930   : > { %7824 = vpow2.f32 %v5574_v1  ;;  %v10636_v60 = vadd.f32 %v5523_v29, %v10569_v31  ;;  %v10639_v32 = vadd.f32 %v5525_v37, %v10571_v23  ;;  %v5554_v13 = vsub.f32 0.0, %v10625_v15 }
 0x931   : > { %v7809_v7 = vpop.eup %7808  ;;  %7826 = vpow2.f32 %v5578_v57  ;;  %v5556_v45 = vsub.f32 0.0, %v10628_v61 }
 0x932   : > { %v7811_v51 = vpop.eup %7810  ;;  %v5590_v36 = vadd.f32 1.0, %v7809_v7  ;;  %7828 = vpow2.f32 %v5576_v55  ;;  %v5582_v6 = vmul.f32 1.442695, %v5554_v13  ;;  %v5555_v49 = vsub.f32 0.0, %v10636_v60 }
 0x933   : > { %v7813_v63 = vpop.eup %7812  ;;  %v5592_v44 = vadd.f32 1.0, %v7811_v51  ;;  %7830 = vpow2.f32 %v5580_v39  ;;  %v5557_v62 = vsub.f32 0.0, %v10639_v32  ;;  %v5586_v52 = vmul.f32 1.442695, %v5556_v45 }
 0x934   : > { %v7815_v12 = vpop.eup %7814  ;;  %7832 = vrcp.f32 %v5590_v36  ;;  %v5591_v9 = vadd.f32 1.0, %v7813_v63  ;;  %v5584_v4 = vmul.f32 1.442695, %v5555_v49 }
 0x935   : > { %v7817_v40 = vpop.eup %7816  ;;  %7834 = vrcp.f32 %v5592_v44  ;;  %v5593_v24 = vadd.f32 1.0, %v7815_v12  ;;  %v5588_v58 = vmul.f32 1.442695, %v5557_v62 }
 0x936   : > { %v7819_v18 = vpop.eup %7818  ;;  %7836 = vrcp.f32 %v5591_v9  ;;  %v5594_v31 = vadd.f32 1.0, %v7817_v40 }
 0x937   : > { %v7821_v59 = vpop.eup %7820  ;;  %7838 = vrcp.f32 %v5593_v24  ;;  %v5596_v10 = vadd.f32 1.0, %v7819_v18 }
 0x938   : > { %v7823_v54 = vpop.eup %7822  ;;  %7840 = vrcp.f32 %v5594_v31  ;;  %v5595_v23 = vadd.f32 1.0, %v7821_v59 }
 0x939   : > { %7842 = vrcp.f32 %v5596_v10  ;;  %v5597_v41 = vadd.f32 1.0, %v7823_v54 }
 0x93a   : > { %v7825_v21 = vpop.eup %7824  ;;  %7844 = vrcp.f32 %v5595_v23 }
 0x93b   : > { %v7827_v17 = vpop.eup %7826  ;;  %7846 = vrcp.f32 %v5597_v41  ;;  %v5598_v34 = vadd.f32 1.0, %v7825_v21 }
 0x93c   : > { %v7829_v19 = vpop.eup %7828  ;;  %v5600_v16 = vadd.f32 1.0, %v7827_v17  ;;  %7848 = vpow2.f32 %v5582_v6 }
 0x93d   : > { %v7831_v35 = vpop.eup %7830  ;;  %7850 = vrcp.f32 %v5598_v34  ;;  %v5599_v0 = vadd.f32 1.0, %v7829_v19  ;;  %v11506_v19 = vld [vmem:[#allocation123_spill] sm:$0xff] }
 0x93e   : > { %v7833_v48 = vpop.eup %7832  ;;  %7852 = vrcp.f32 %v5600_v16  ;;  %v5601_v56 = vadd.f32 1.0, %v7831_v35 }
 0x93f   : > { %v7835_v28 = vpop.eup %7834  ;;  %7854 = vrcp.f32 %v5599_v0  ;;  %v10649_v38 = vmul.f32 %v7833_v48, %v10577_v8 }
 0x940   : > { %v7837_v14 = vpop.eup %7836  ;;  %7856 = vrcp.f32 %v5601_v56  ;;  %v10655_v57 = vmul.f32 %v7835_v28, %v10579_v26 }
 0x941   : > { %v7839_v47 = vpop.eup %7838  ;;  %7858 = vpow2.f32 %v5586_v52  ;;  %v10646_v30 = vmul.f32 %v7837_v14, %v10583_v53 }
 0x942   : > { %v7841_v11 = vpop.eup %7840  ;;  %7860 = vpow2.f32 %v5584_v4  ;;  %v10652_v3 = vmul.f32 %v7839_v47, %v10585_v46  ;;  %v11507_v47 = vld [vmem:[#allocation124_spill] sm:$0xff] }
 0x943   : > { %v7843_v1 = vpop.eup %7842  ;;  %7862 = vpow2.f32 %v5588_v58  ;;  %5702 = vmatprep.mubr.f32.mxu0 %v10646_v30  ;;  %v10668_v26 = vmul.f32 %v7841_v11, %v10591_v20 }
 0x944   : > { %v7845_v55 = vpop.eup %7844  ;;  %5787 = vmatprep.mubr.f32.mxu1 %v10652_v3  ;;  %5703 = vmatmul.mubr.f32.vlgmr.msra.gmra.mrb[228].mxu0 %v10649_v38  ;;  %v10672_v29 = vmul.f32 %v7843_v1, %v10593_v2 }
 0x945   : > { %v7847_v53 = vpop.eup %7846  ;;  %5788 = vmatmul.mubr.f32.vlgmr.msra.gmra.mrb[224].mxu1 %v10655_v57  ;;  %v10662_v8 = vmul.f32 %v7845_v55, %v10597_v43 }
 0x946   : > { %v7849_v46 = vpop.eup %7848  ;;  %v10665_v39 = vmul.f32 %v7847_v53, %v10599_v22 }
 0x947   : > { %v7851_v50 = vpop.eup %7850  ;;  %5707 = vmatprep.mubr.f32.mxu0 %v10662_v8  ;;  %v5602_v37 = vadd.f32 1.0, %v7849_v46 }
 0x948   : > { %v7853_v27 = vpop.eup %7852  ;;  %5792 = vmatprep.mubr.f32.mxu1 %v10665_v39  ;;  %5708 = vmatmul.mubr.f32.gmra.mrb[230].mxu0 %v10668_v26  ;;  %v10684_v2 = vmul.f32 %v7851_v50, %v10610_v25 }
 0x949   : > { %v7855_v43 = vpop.eup %7854  ;;  %5793 = vmatmul.mubr.f32.gmra.mrb[226].mxu1 %v10672_v29  ;;  %v10688_v44 = vmul.f32 %v7853_v27, %v10615_v42  ;;  %7864 = vrcp.f32 %v5602_v37 }
 0x94a   : > { %v7857_v22 = vpop.eup %7856  ;;  %v10678_v7 = vmul.f32 %v7855_v43, %v10618_v33 }
 0x94b   : > { %v7859_v20 = vpop.eup %7858  ;;  %v10681_v51 = vmul.f32 %v7857_v22, %v10621_v5  ;;  %v11508_v22 = vld [vmem:[#allocation125_spill] sm:$0xff] }
 0x94c   : > { %v7861_v36 = vpop.eup %7860  ;;  %v5604_v63 = vadd.f32 1.0, %v7859_v20  ;;  %5712 = vmatprep.mubr.f32.mxu0 %v10678_v7 }
 0x94d   : > { %v7863_v12 = vpop.eup %7862  ;;  %v5603_v9 = vadd.f32 1.0, %v7861_v36  ;;  %5797 = vmatprep.mubr.f32.mxu1 %v10681_v51  ;;  %5713 = vmatmul.mubr.f32.gmra.mrb[232].mxu0 %v10684_v2 }
 0x94e   : > { %7866 = vrcp.f32 %v5604_v63  ;;  %v5605_v33 = vadd.f32 1.0, %v7863_v12  ;;  %5798 = vmatmul.mubr.f32.gmra.mrb[228].mxu1 %v10688_v44 }
 0x94f   : > { %7868 = vrcp.f32 %v5603_v9 }
 0x950   : > { %7870 = vrcp.f32 %v5605_v33  ;;  %v5813_v33 = vld [vmem:[%s10940_s14 + $0x8] sm:$0xff] }
 0x953   : > { %v7865_v25 = vpop.eup %7864 }
 0x954   : > { %v10700_v18 = vmul.f32 %v7865_v25, %v10625_v15  ;;  %v5814_v25 = vld [vmem:[%s10940_s14 + $0x10] sm:$0xff] }
 0x958   : > { %v7867_v5 = vpop.eup %7866 }
 0x959   : > { %v7869_v13 = vpop.eup %7868  ;;  %v10704_v31 = vmul.f32 %v7867_v5, %v10628_v61  ;;  %v11505_v61 = vld [vmem:[#allocation122_spill] sm:$0xff]  ;;  %v11509_v5 = vld [vmem:[#allocation129_spill] sm:$0xff] }
 0x95a   : > { %v7871_v40 = vpop.eup %7870  ;;  %v10694_v42 = vmul.f32 %v7869_v13, %v10636_v60  ;;  %v5812_v60 = vld [vmem:[%s10940_s14] sm:$0xff]  ;;  %v5815_v13 = vld [vmem:[%s10940_s14 + $0x18] sm:$0xff] }
 0x95b   : > { %v10697_v24 = vmul.f32 %v7871_v40, %v10639_v32  ;;  %v11510_v40 = vld [vmem:[#allocation127_spill] sm:$0xff] }
 0x95c   : > { %5717 = vmatprep.mubr.f32.mxu0 %v10694_v42 }
 0x95d   : > { %5802 = vmatprep.mubr.f32.mxu1 %v10697_v24  ;;  %5718 = vmatmul.mubr.f32.gmra.mrb[234].mxu0 %v10700_v18 }
 0x95e   : > { %5803 = vmatmul.mubr.f32.gmra.mrb[230].mxu1 %v10704_v31  ;;  %7368 = vmatprep.mubr.msk.f32.mxu0 %vm1550_vm8, %v5812_v60  ;;  %v11511_v60 = vmov 0.0  }
 0xa17   : > { %v7234_v32 = vpop.f32.mrb[228].mxu0 }
 0xa18   : > { %v7278_v15 = vpop.f32.mrb[224].mxu1  ;;  %v7235_v59 = vpop.f32.mrb[229].mxu0 }
 0xa19   : > { %v7236_v10 = vadd.f32 %v7235_v59, %v7234_v32  ;;  %v7279_v54 = vpop.f32.mrb[225].mxu1  ;;  %v5941_v32 = vld [vmem:[%s10942_s16] sm:$0xff]  ;;  %v5823_v59 = vpop.permute.xlu0 %5822 }
 0xa1a   : > { %v7280_v23 = vadd.f32 %v7279_v54, %v7278_v15  ;;  %7382 = vmatprep.mubr.msk.f32.mxu1 %vm1550_vm8, %v5941_v32  ;;  %v5828_v15 = vpop.permute.xlu1 %5827 }
 0xa1b   : > { %v5705_v6 = vadd.f32 %v7236_v10, %v11505_v61  ;;  %v7237_v41 = vpop.f32.mrb[230].mxu0 }
 0xa1c   : > { %v7281_v45 = vpop.f32.mrb[226].mxu1  ;;  %v7238_v21 = vpop.f32.mrb[231].mxu0 }
 0xa1d   : > { %v5790_v49 = vadd.f32 %v7280_v23, %v5705_v6  ;;  %v7239_v17 = vadd.f32 %v7238_v21, %v7237_v41  ;;  %v7282_v34 = vpop.f32.mrb[227].mxu1 }
 0xa1e   : > { %v7283_v62 = vadd.f32 %v7282_v34, %v7281_v45  ;;  %v5838_v41 = vpop.permute.xlu1 %5837 }
 0xa1f   : > { %v5710_v16 = vadd.f32 %v7239_v17, %v11506_v19  ;;  %v5808_v28 = vmul.f32 0.00390625, %v5790_v49  ;;  %v5833_v49 = vpop.permute.xlu0 %5832 }
 0xa20   : > { %v7240_v35 = vpop.f32.mrb[232].mxu0 }
 0xa21   : > { %v5795_v0 = vadd.f32 %v7283_v62, %v5710_v16  ;;  %v7284_v52 = vpop.f32.mrb[228].mxu1  ;;  %v7241_v48 = vpop.f32.mrb[233].mxu0 }
 0xa22   : > { %v7242_v56 = vadd.f32 %v7241_v48, %v7240_v35  ;;  %v7285_v4 = vpop.f32.mrb[229].mxu1  ;;  %v5943_v48 = vld [vmem:[%s10942_s16 + $0x10] sm:$0xff] }
 0xa23   : > { %v5809_v58 = vmul.f32 0.00390625, %v5795_v0  ;;  %v7286_v14 = vadd.f32 %v7285_v4, %v7284_v52  ;;  %v5942_v52 = vld [vmem:[%s10942_s16 + $0x8] sm:$0xff]  ;;  %v5944_v4 = vld [vmem:[%s10942_s16 + $0x18] sm:$0xff] }
 0xa24   : > { %v5715_v11 = vadd.f32 %v7242_v56, %v11507_v47  ;;  %v11512_v56 = vld [vmem:[#allocation128_spill] sm:$0xff]  ;;  %v5947_v47 = vld [vmem:[%s10942_s16 + $0x30] sm:$0xff] }
 0xa25   : > { %v7662_v1 = vpack.c.bf16 %v5809_v58, %v5808_v28  ;;  %v11513_v28 = vld [vmem:[#allocation126_spill] sm:$0xff]  ;;  %v5945_v58 = vld [vmem:[%s10942_s16 + $0x20] sm:$0xff] }
 0xa26   : > { %v5800_v55 = vadd.f32 %v7286_v14, %v5715_v11  ;;  %v5946_v14 = vld [vmem:[%s10942_s16 + $0x28] sm:$0xff]  ;;  %v5948_v11 = vld [vmem:[%s10942_s16 + $0x38] sm:$0xff] }
 0xa27   : > { %7663 = vmatprep.subr.bf16.mxu0 %v7662_v1 }
 0xa28   : > { %7665 = vmatpush3.bf16.msra.mxu0 %v7662_v1  ;;  %v5810_v63 = vmul.f32 0.00390625, %v5800_v55  ;;  %v5960_v1 = vpop.permute.xlu0 %5959  ;;  %v5980_v55 = vpop.permute.xlu1 %5979 }
 0xa30   : > { %v7243_v53 = vpop.f32.mrb[234].mxu0 }
 0xa31   : > { %v7287_v46 = vpop.f32.mrb[230].mxu1  ;;  %v7244_v50 = vpop.f32.mrb[235].mxu0 }
 0xa32   : > { %v7245_v27 = vadd.f32 %v7244_v50, %v7243_v53  ;;  %v7288_v43 = vpop.f32.mrb[231].mxu1  ;;  %v5965_v53 = vpop.permute.xlu0 %5964 }
 0xa33   : > { %v7289_v37 = vadd.f32 %v7288_v43, %v7287_v46  ;;  %v5985_v46 = vpop.permute.xlu1 %5984 }
 0xa34   : > { %v5720_v20 = vadd.f32 %v7245_v27, %v11508_v22 }
 0xa36   : > { %v5805_v36 = vadd.f32 %v7289_v37, %v5720_v20  ;;  %v5970_v37 = vpop.permute.xlu0 %5969 }
 0xa37   : > { %v5990_v20 = vpop.permute.xlu1 %5989 }
 0xa38   : > { %v5811_v12 = vmul.f32 0.00390625, %v5805_v36 }
 0xa3a   : > { %v7666_v9 = vpack.c.bf16 %v5811_v12, %v5810_v63 }
 0xa3b   : > { %v5995_v32 = vpop.permute.xlu1 %5994 }
 0xa3c   : > { %7667 = vmatprep.subr.bf16.mxu0 %v7666_v9 }
 0xa3d   : > { %7669 = vmatpush3.bf16.msra.mxu0 %v7666_v9 }
 0xa3e   : > { %6875 = vmatprep.subr.msk.mxu0 %vm3134_vm13, %v11509_v5 }
 0xa40   : > { %7369 = vmatmul.mubr.msk.f32.vlgmr.msra.gmra.mrb[236].mxu0 %vm1550_vm8, %v5813_v33 }
 0xa41   : > { %7371 = vmatprep.mubr.msk.f32.mxu0 %vm1550_vm8, %v5814_v25  ;;  %6876 = vmatpush1.msk.msra.mxu0 %vm3134_vm13, %v11510_v40 }
 0xa42   : > { %6887 = vmatprep.subr.msk.mxu0 %vm3134_vm13, %v11509_v5  ;;  %v5975_v5 = vpop.permute.xlu0 %5974 }
 0xa44   : > { %7372 = vmatmul.mubr.msk.f32.gmra.mrb[238].mxu0 %vm1550_vm8, %v5815_v13 }
 0xa45   : > { %6242 = vmatprep.mubr.f32.mxu0 %v11511_v60 }
 0xb13   : > { %v7370_v10 = vpop.f32.mrb[236].mxu0 }
 0xb14   : > { %v5924_v54 = vadd.f32 %v7370_v10, %v5828_v15  ;;  %v5918_v23 = vpop.f32.mrb[237].mxu0 }
 0xb15   : > { %v5919_v61 = vadd.f32 %v5918_v23, %v5823_v59 }
 0xb16   : > { %v5938_v6 = vmax.f32 %v5924_v54, 0.0 }
 0xb17   : > { %v5937_v45 = vmax.f32 %v5919_v61, 0.0  ;;  %v7373_v21 = vpop.f32.mrb[238].mxu0 }
 0xb18   : > { %v5934_v17 = vadd.f32 %v7373_v21, %v5838_v41  ;;  %v5928_v34 = vpop.f32.mrb[239].mxu0 }
 0xb19   : > { %v7670_v62 = vpack.c.bf16 %v5938_v6, %v5937_v45  ;;  %v5929_v19 = vadd.f32 %v5928_v34, %v5833_v49 }
 0xb1a   : > { %v5940_v16 = vmax.f32 %v5934_v17, 0.0 }
 0xb1b   : > { %v5939_v35 = vmax.f32 %v5929_v19, 0.0  ;;  %7671 = vmatprep.subr.bf16.mxu1 %v7670_v62 }
 0xb1c   : > { %7673 = vmatpush3.bf16.msra.mxu1 %v7670_v62 }
 0xb1d   : > { %v7674_v0 = vpack.c.bf16 %v5940_v16, %v5939_v35 }
 0xb1f   : > { %7675 = vmatprep.subr.bf16.mxu1 %v7674_v0 }
 0xb20   : > { %7677 = vmatpush3.bf16.msra.mxu1 %v7674_v0 }
 0xb21   : > { %6881 = vmatprep.subr.msk.mxu1 %vm3134_vm13, %v11512_v56 }
 0xb23   : > { %7383 = vmatmul.mubr.msk.f32.vlgmr.msra.gmra.mrb[232].mxu1 %vm1550_vm8, %v5942_v52 }
 0xb24   : > { %7385 = vmatprep.mubr.msk.f32.mxu1 %vm1550_vm8, %v5943_v48  ;;  %6882 = vmatpush1.msk.msra.mxu1 %vm3134_vm13, %v11513_v28 }
 0xb25   : > { %6893 = vmatprep.subr.msk.mxu1 %vm3134_vm13, %v11512_v56 }
 0xb27   : > { %7386 = vmatmul.mubr.msk.f32.gmra.mrb[234].mxu1 %vm1550_vm8, %v5944_v4 }
 0xb28   : > { %7388 = vmatprep.mubr.msk.f32.mxu1 %vm1550_vm8, %v5945_v58 }
 0xb2b   : > { %7389 = vmatmul.mubr.msk.f32.gmra.mrb[236].mxu1 %vm1550_vm8, %v5946_v14 }
 0xb2c   : > { %7391 = vmatprep.mubr.msk.f32.mxu1 %vm1550_vm8, %v5947_v47 }
 0xb2f   : > { %7392 = vmatmul.mubr.msk.f32.gmra.mrb[238].mxu1 %vm1550_vm8, %v5948_v11 }
 0xb30   : > { %6331 = vmatprep.mubr.f32.mxu1 %v11511_v60 }
 0xbf6   : > { %v7384_v50 = vpop.f32.mrb[232].mxu1 }
 0xbf7   : > { %v6087_v27 = vpop.f32.mrb[233].mxu1  ;;  %v6093_v63 = vadd.f32 %v7384_v50, %v5965_v53 }
 0xbf8   : > { %v6088_v33 = vadd.f32 %v6087_v27, %v5960_v1 }
 0xbfa   : > { %v7387_v43 = vpop.f32.mrb[234].mxu1 }
 0xbfb   : > { %v6097_v22 = vpop.f32.mrb[235].mxu1  ;;  %v6103_v10 = vadd.f32 %v7387_v43, %v5975_v5 }
 0xbfc   : > { %v6098_v41 = vadd.f32 %v6097_v22, %v5970_v37 }
 0xbfe   : > { %v7390_v36 = vpop.f32.mrb[236].mxu1 }
 0xbff   : > { %v6113_v12 = vadd.f32 %v7390_v36, %v5985_v46  ;;  %v6107_v9 = vpop.f32.mrb[237].mxu1 }
 0xc00   : > { %v6108_v25 = vadd.f32 %v6107_v9, %v5980_v55 }
 0xc01   : > { %v6127_v13 = vmax.f32 %v6093_v63, %v6113_v12 }
 0xc02   : > { %v6126_v15 = vmax.f32 %v6088_v33, %v6108_v25  ;;  %v7393_v59 = vpop.f32.mrb[238].mxu1 }
 0xc03   : > { %v6131_v54 = vsub.f32 %v6093_v63, %v6127_v13  ;;  %v6143_v23 = vsub.f32 %v6113_v12, %v6127_v13  ;;  %v6123_v61 = vadd.f32 %v7393_v59, %v5995_v32  ;;  %v6117_v6 = vpop.f32.mrb[239].mxu1 }
 0xc04   : > { %v6130_v45 = vsub.f32 %v6088_v33, %v6126_v15  ;;  %v6142_v21 = vsub.f32 %v6108_v25, %v6126_v15  ;;  %v6118_v49 = vadd.f32 %v6117_v6, %v5990_v20 }
 0xc05   : > { %v6136_v17 = vmul.f32 1.442695, %v6131_v54  ;;  %v6148_v34 = vmul.f32 1.442695, %v6143_v23  ;;  %v6129_v62 = vmax.f32 %v6103_v10, %v6123_v61 }
 0xc06   : > { %v6134_v19 = vmul.f32 1.442695, %v6130_v45  ;;  %v6146_v16 = vmul.f32 1.442695, %v6142_v21  ;;  %v6128_v35 = vmax.f32 %v6098_v41, %v6118_v49 }
 0xc07   : > { %7872 = vpow2.f32 %v6136_v17  ;;  %v6133_v0 = vsub.f32 %v6103_v10, %v6129_v62  ;;  %v6145_v52 = vsub.f32 %v6123_v61, %v6129_v62 }
 0xc08   : > { %7874 = vpow2.f32 %v6148_v34  ;;  %v6132_v48 = vsub.f32 %v6098_v41, %v6128_v35  ;;  %v6144_v56 = vsub.f32 %v6118_v49, %v6128_v35 }
 0xc09   : > { %7876 = vpow2.f32 %v6134_v19  ;;  %v6140_v4 = vmul.f32 1.442695, %v6133_v0  ;;  %v6152_v58 = vmul.f32 1.442695, %v6145_v52 }
 0xc0a   : > { %7878 = vpow2.f32 %v6146_v16  ;;  %v6138_v14 = vmul.f32 1.442695, %v6132_v48  ;;  %v6150_v47 = vmul.f32 1.442695, %v6144_v56 }
 0xc0b   : > { %7880 = vpow2.f32 %v6140_v4  ;;  %v11514_v4 = vld [vmem:[#allocation107_spill] sm:$0xff] }
 0xc0c   : > { %7882 = vpow2.f32 %v6152_v58 }
 0xc0d   : > { %7884 = vpow2.f32 %v6138_v14  ;;  %v11515_v14 = vld [vmem:[#allocation111_spill] sm:$0xff] }
 0xc0e   : > { %7886 = vpow2.f32 %v6150_v47 }
 0xc11   : > { %v7873_v11 = vpop.eup %7872 }
 0xc12   : > { %v7875_v1 = vpop.eup %7874 }
 0xc13   : > { %v7877_v55 = vpop.eup %7876  ;;  %v6155_v53 = vadd.f32 %v7875_v1, %v7873_v11 }
 0xc14   : > { %v7879_v46 = vpop.eup %7878 }
 0xc15   : > { %v7881_v50 = vpop.eup %7880  ;;  %7888 = vrcp.f32 %v6155_v53  ;;  %v6154_v27 = vadd.f32 %v7879_v46, %v7877_v55 }
 0xc16   : > { %v7883_v43 = vpop.eup %7882 }
 0xc17   : > { %v7885_v37 = vpop.eup %7884  ;;  %7890 = vrcp.f32 %v6154_v27  ;;  %v6157_v22 = vadd.f32 %v7883_v43, %v7881_v50  ;;  %v11517_v27 = vld [vmem:[#allocation110_spill] sm:$0xff] }
 0xc18   : > { %v7887_v20 = vpop.eup %7886 }
 0xc19   : > { %7892 = vrcp.f32 %v6157_v22  ;;  %v6156_v36 = vadd.f32 %v7887_v20, %v7885_v37 }
 0xc1b   : > { %7894 = vrcp.f32 %v6156_v36 }
 0xc1f   : > { %v7889_v63 = vpop.eup %7888 }
 0xc20   : > { %v6163_v12 = vmul.f32 %v7889_v63, %v7873_v11  ;;  %v6357_v9 = vmul.f32 %v7889_v63, %v7875_v1 }
 0xc21   : > { %v7891_v33 = vpop.eup %7890 }
 0xc22   : > { %v6162_v25 = vmul.f32 %v7891_v33, %v7877_v55  ;;  %v6356_v5 = vmul.f32 %v7891_v33, %v7879_v46  ;;  %v11516_v46 = vld [vmem:[#allocation106_spill] sm:$0xff] }
 0xc23   : > { %v7893_v13 = vpop.eup %7892 }
 0xc24   : > { %6877 = vmatmul.mubr.msk.f32.vlgmr.msra.gmra.mrb[240].mxu0 %vm3118_vm14, %v6162_v25  ;;  %6883 = vmatmul.mubr.msk.f32.vlgmr.msra.gmra.mrb[240].mxu1 %vm3118_vm14, %v6162_v25  ;;  %v6165_v32 = vmul.f32 %v7893_v13, %v7881_v50  ;;  %v6359_v15 = vmul.f32 %v7893_v13, %v7883_v43  ;;  %v11520_v13 = vld [vmem:[#allocation109_spill] sm:$0xff] }
 0xc25   : > { %v7895_v59 = vpop.eup %7894  ;;  %6248 = vmatprep.mubr.f32.mxu0 %v11511_v60  ;;  %6337 = vmatprep.mubr.f32.mxu1 %v11511_v60 }
 0xc26   : > { %v6164_v10 = vmul.f32 %v7895_v59, %v7885_v37  ;;  %6888 = vmatpush1.msk.msra.mxu0 %vm3134_vm13, %v11510_v40  ;;  %6894 = vmatpush1.msk.msra.mxu1 %vm3134_vm13, %v11513_v28  ;;  %v6358_v54 = vmul.f32 %v7895_v59, %v7887_v20 }
 0xc28   : > { %6878 = vmatmul.mubr.msk.f32.gmra.mrb[242].mxu0 %vm3118_vm14, %v6163_v12  ;;  %6884 = vmatmul.mubr.msk.f32.gmra.mrb[242].mxu1 %vm3118_vm14, %v6163_v12 }
 0xc29   : > { %6254 = vmatprep.mubr.f32.mxu0 %v11511_v60  ;;  %6343 = vmatprep.mubr.f32.mxu1 %v11511_v60 }
 0xc2c   : > { %6879 = vmatmul.mubr.msk.f32.gmra.mrb[244].mxu0 %vm3118_vm14, %v6164_v10  ;;  %6885 = vmatmul.mubr.msk.f32.gmra.mrb[244].mxu1 %vm3118_vm14, %v6164_v10 }
 0xc2d   : > { %6260 = vmatprep.mubr.f32.mxu0 %v11511_v60  ;;  %6349 = vmatprep.mubr.f32.mxu1 %v11511_v60 }
 0xc30   : > { %6880 = vmatmul.mubr.msk.f32.gmra.mrb[246].mxu0 %vm3118_vm14, %v6165_v32  ;;  %6886 = vmatmul.mubr.msk.f32.gmra.mrb[246].mxu1 %vm3118_vm14, %v6165_v32 }
 0xc31   : > { %6436 = vmatprep.mubr.f32.mxu0 %v11511_v60  ;;  %6525 = vmatprep.mubr.f32.mxu1 %v11511_v60 }
 0xc34   : > { %6889 = vmatmul.mubr.msk.f32.vlgmr.msra.gmra.mrb[248].mxu0 %vm3118_vm14, %v6356_v5  ;;  %6895 = vmatmul.mubr.msk.f32.vlgmr.msra.gmra.mrb[248].mxu1 %vm3118_vm14, %v6356_v5 }
 0xc35   : > { %6442 = vmatprep.mubr.f32.mxu0 %v11511_v60  ;;  %6531 = vmatprep.mubr.f32.mxu1 %v11511_v60 }
 0xc38   : > { %6890 = vmatmul.mubr.msk.f32.gmra.mrb[250].mxu0 %vm3118_vm14, %v6357_v9  ;;  %6896 = vmatmul.mubr.msk.f32.gmra.mrb[250].mxu1 %vm3118_vm14, %v6357_v9  ;;  %v11519_v9 = vld [vmem:[#allocation112_spill] sm:$0xff] }
 0xc39   : > { %6448 = vmatprep.mubr.f32.mxu0 %v11511_v60  ;;  %6537 = vmatprep.mubr.f32.mxu1 %v11511_v60 }
 0xc3c   : > { %6891 = vmatmul.mubr.msk.f32.gmra.mrb[252].mxu0 %vm3118_vm14, %v6358_v54  ;;  %6897 = vmatmul.mubr.msk.f32.gmra.mrb[252].mxu1 %vm3118_vm14, %v6358_v54 }
 0xc3d   : > { %6454 = vmatprep.mubr.f32.mxu0 %v11511_v60  ;;  %6543 = vmatprep.mubr.f32.mxu1 %v11511_v60 }
 0xc40   : > { %6892 = vmatmul.mubr.msk.f32.gmra.mrb[254].mxu0 %vm3118_vm14, %v6359_v15  ;;  %6898 = vmatmul.mubr.msk.f32.gmra.mrb[254].mxu1 %vm3118_vm14, %v6359_v15  ;;  %v11521_v15 = vld [vmem:[#allocation113_spill] sm:$0xff] }
 0xcf7   : > { %v6244_v40 = vpop.f32.mrb[240].mxu0  ;;  %v6333_v28 = vpop.f32.mrb[240].mxu1 }
 0xcf8   : > { %v6246_v23 = vpop.f32.mrb[241].mxu0  ;;  %v6335_v61 = vpop.f32.mrb[241].mxu1  ;;  %v6550_v48 = vmul.f32 %v6244_v40, %v10649_v38  ;;  %v6552_v56 = vmul.f32 %v6333_v28, %v10655_v57 }
 0xcf9   : > { %v6551_v55 = vmul.f32 %v6246_v23, %v10646_v30  ;;  %v6553_v53 = vmul.f32 %v6335_v61, %v10652_v3  ;;  %v11518_v30 = vld [vmem:[#allocation108_spill] sm:$0xff] }
 0xcfb   : > { %v6250_v6 = vpop.f32.mrb[242].mxu0  ;;  %v6339_v41 = vpop.f32.mrb[242].mxu1 }
 0xcfc   : > { %v6252_v45 = vpop.f32.mrb[243].mxu0  ;;  %v6341_v21 = vpop.f32.mrb[243].mxu1  ;;  %v6554_v63 = vmul.f32 %v6250_v6, %v10668_v26  ;;  %v6556_v12 = vmul.f32 %v6339_v41, %v10672_v29 }
 0xcfd   : > { %v6555_v26 = vmul.f32 %v6252_v45, %v10662_v8  ;;  %v6557_v29 = vmul.f32 %v6341_v21, %v10665_v39  ;;  %v11522_v39 = vld [vmem:[#allocation115_spill] sm:$0xff] }
 0xcfe   : > { %v11523_v45 = vld [vmem:[#allocation119_spill] sm:$0xff] }
 0xcff   : > { %v6256_v49 = vpop.f32.mrb[244].mxu0  ;;  %v6345_v17 = vpop.f32.mrb[244].mxu1 }
 0xd00   : > { %v6258_v34 = vpop.f32.mrb[245].mxu0  ;;  %v6347_v62 = vpop.f32.mrb[245].mxu1  ;;  %v6558_v6 = vmul.f32 %v6256_v49, %v10684_v2  ;;  %v6560_v8 = vmul.f32 %v6345_v17, %v10688_v44  ;;  %v11524_v2 = vld [vmem:[#allocation114_spill] sm:$0xff] }
 0xd01   : > { %v11525_v49 = vld [vmem:[#allocation118_spill] sm:$0xff] }
 0xd03   : > { %v10809_v19 = vpop.f32.mrb[246].mxu0  ;;  %v10811_v60 = vpop.f32.mrb[246].mxu1 }
 0xd04   : > { %v10814_v16 = vpop.f32.mrb[247].mxu0  ;;  %v10816_v35 = vpop.f32.mrb[247].mxu1 }
 0xd07   : > { %v6438_v0 = vpop.f32.mrb[248].mxu0  ;;  %v6527_v52 = vpop.f32.mrb[248].mxu1 }
 0xd08   : > { %v6566_v58 = vmul.f32 %v6438_v0, %v11514_v4  ;;  %v6568_v47 = vmul.f32 %v6527_v52, %v11515_v14  ;;  %v6440_v11 = vpop.f32.mrb[249].mxu0  ;;  %v6529_v1 = vpop.f32.mrb[249].mxu1 }
 0xd09   : > { %v6567_v50 = vmul.f32 %v6440_v11, %v11516_v46  ;;  %v6569_v43 = vmul.f32 %v6529_v1, %v11517_v27  ;;  %v6563_v27 = vmul.f32 %v10814_v16, %v10694_v42 }
 0xd0a   : > { %v6582_v37 = vadd.f32 %v6566_v58, %v6550_v48  ;;  %v6584_v22 = vadd.f32 %v6568_v47, %v6552_v56  ;;  %v6559_v48 = vmul.f32 %v6258_v34, %v10678_v7  ;;  %v6561_v56 = vmul.f32 %v6347_v62, %v10681_v51  ;;  %v11526_v34 = vld [vmem:[#allocation116_spill] sm:$0xff] }
 0xd0b   : > { %v6583_v20 = vadd.f32 %v6567_v50, %v6551_v55  ;;  %v6585_v38 = vadd.f32 %v6569_v43, %v6553_v53  ;;  %v6444_v36 = vpop.f32.mrb[250].mxu0  ;;  %v6533_v57 = vpop.f32.mrb[250].mxu1  ;;  %v6562_v7 = vmul.f32 %v10809_v19, %v10700_v18  ;;  %v6564_v51 = vmul.f32 %v10811_v60, %v10704_v31  ;;  %v11527_v55 = vld [vmem:[#allocation120_spill] sm:$0xff]  ;;  %v11528_v31 = vld [vmem:[#allocation117_spill] sm:$0xff] }
 0xd0c   : > { %6598 = vst [vmem:[%s10830_s20] sm:$0xff] %v6582_v37  ;;  %6600 = vst [vmem:[%s10830_s20 + $0x10] sm:$0xff] %v6584_v22  ;;  %v6570_v3 = vmul.f32 %v6444_v36, %v11518_v30  ;;  %v6572_v33 = vmul.f32 %v6533_v57, %v11519_v9  ;;  %v6446_v25 = vpop.f32.mrb[251].mxu0  ;;  %v6535_v5 = vpop.f32.mrb[251].mxu1  ;;  %v6565_v18 = vmul.f32 %v10816_v35, %v10697_v24  ;;  %v11529_v60 = vld [vmem:[#allocation121_spill] sm:$0xff] }
 0xd0d   : > { %6599 = vst [vmem:[%s10830_s20 + $0x8] sm:$0xff] %v6583_v20  ;;  %6601 = vst [vmem:[%s10830_s20 + $0x18] sm:$0xff] %v6585_v38  ;;  %v6571_v32 = vmul.f32 %v6446_v25, %v11520_v13  ;;  %v6573_v59 = vmul.f32 %v6535_v5, %v11521_v15 }
 0xd0e   : > { %v6586_v10 = vadd.f32 %v6570_v3, %v6554_v63  ;;  %v6588_v54 = vadd.f32 %v6572_v33, %v6556_v12 }
 0xd0f   : > { %v6587_v40 = vadd.f32 %v6571_v32, %v6555_v26  ;;  %v6589_v28 = vadd.f32 %v6573_v59, %v6557_v29  ;;  %v6450_v23 = vpop.f32.mrb[252].mxu0  ;;  %v6539_v61 = vpop.f32.mrb[252].mxu1 }
 0xd10   : > { %6602 = vst [vmem:[%s10830_s20 + $0x20] sm:$0xff] %v6586_v10  ;;  %6604 = vst [vmem:[%s10830_s20 + $0x30] sm:$0xff] %v6588_v54  ;;  %v6574_v41 = vmul.f32 %v6450_v23, %v11522_v39  ;;  %v6576_v21 = vmul.f32 %v6539_v61, %v11523_v45  ;;  %v6452_v0 = vpop.f32.mrb[253].mxu0  ;;  %v6541_v52 = vpop.f32.mrb[253].mxu1 }
 0xd11   : > { %6603 = vst [vmem:[%s10830_s20 + $0x28] sm:$0xff] %v6587_v40  ;;  %6605 = vst [vmem:[%s10830_s20 + $0x38] sm:$0xff] %v6589_v28  ;;  %v6575_v44 = vmul.f32 %v6452_v0, %v11524_v2  ;;  %v6577_v17 = vmul.f32 %v6541_v52, %v11525_v49 }
 0xd12   : > { %v6590_v4 = vadd.f32 %v6574_v41, %v6558_v6  ;;  %v6592_v58 = vadd.f32 %v6576_v21, %v6560_v8 }
 0xd13   : > { %v6591_v14 = vadd.f32 %v6575_v44, %v6559_v48  ;;  %v6593_v47 = vadd.f32 %v6577_v17, %v6561_v56  ;;  %v6456_v11 = vpop.f32.mrb[254].mxu0  ;;  %v6545_v1 = vpop.f32.mrb[254].mxu1 }
 0xd14   : > { %6606 = vst [vmem:[%s10830_s20 + $0x40] sm:$0xff] %v6590_v4  ;;  %6608 = vst [vmem:[%s10830_s20 + $0x50] sm:$0xff] %v6592_v58  ;;  %v6578_v62 = vmul.f32 %v6456_v11, %v11526_v34  ;;  %v6580_v53 = vmul.f32 %v6545_v1, %v11527_v55  ;;  %v6458_v46 = vpop.f32.mrb[255].mxu0  ;;  %v6547_v50 = vpop.f32.mrb[255].mxu1 }
 0xd15   : > { %6607 = vst [vmem:[%s10830_s20 + $0x48] sm:$0xff] %v6591_v14  ;;  %6609 = vst [vmem:[%s10830_s20 + $0x58] sm:$0xff] %v6593_v47  ;;  %v6579_v19 = vmul.f32 %v6458_v46, %v11528_v31  ;;  %v6581_v43 = vmul.f32 %v6547_v50, %v11529_v60 }
 0xd16   : > { %v6594_v37 = vadd.f32 %v6578_v62, %v6562_v7  ;;  %v6596_v22 = vadd.f32 %v6580_v53, %v6564_v51 }
 0xd17   : > { %v6595_v42 = vadd.f32 %v6579_v19, %v6563_v27  ;;  %v6597_v24 = vadd.f32 %v6581_v43, %v6565_v18 }
 0xd18   : > { %6610 = vst [vmem:[%s10830_s20 + $0x60] sm:$0xff] %v6594_v37  ;;  %6612 = vst [vmem:[%s10830_s20 + $0x70] sm:$0xff] %v6596_v22 }
 0xd19   : > { %6611 = vst [vmem:[%s10830_s20 + $0x68] sm:$0xff] %v6595_v42  ;;  %6613 = vst [vmem:[%s10830_s20 + $0x78] sm:$0xff] %v6597_v24 }
 0xd1a   : > { %7909 = shalt.err (!%p7906_p3)
}
 0xd1b   : > { %s7910_s24 = scalar_lea.hbm %s10875_s29, 2048  ;;  %s7914_s19 = scalar_lea.hbm %s10944_s18, 4096 }
 0xd1c   : > { %p7911_p4 = scmp.ne.s32.totalorder %s10875_s29, %s7910_s24  ;;  %p7915_p9 = scmp.lt.u32.totalorder %s10875_s29, %s10944_s18 }
 0xd1d   : > { %p7916_p10 = scmp.lt.u32.totalorder %s7914_s19, %s7910_s24  ;;  %p7918_p12 = scmp.lt.u32.totalorder %s7910_s24, %s10875_s29 }
 0xd1e   : > { %p7912_p7 = pnand %p7911_p4, %p8109_p5 }
 0xd1f   : > { %p7917_p11 = por %p7916_p10, %p7915_p9 }
 0xd20   : > { %p7913_p8 = pneg %p7912_p7 }
 0xd21   : > { %p7919_p13 = por %p7918_p12, %p7917_p11 }
 0xd23   : > { %p7920_p0 = pnand %p7919_p13, %p7913_p8 }
 0xd25   : > { %7923 = shalt.err (!%p7920_p0)
}
 0xd26   : > { %s7974_s1 = smov 512   ;;  %s7975_s21 = smov 32  }
 0xd27   : > { %7708 = dma.vmem_to_hbm [thread:$0]  (%p8109_p5), %s10877_s25, 2048, %s10875_s29, %s10885_s27, %s7974_s1, %s7974_s1, %s7975_s21  }
 0xd28 PF: > { %s11530_s20 = sld [smem:[#allocation6_spill]]  ;;  %p7714_p1 = scmp.ge.s32.totalorder %s7958_s30, 2 }
 0xd2a   : > { %p7711_p2 = pnand %p7714_p1, %p8113_p6 }
 0xd2e   : > { %s6643_s23 = sand.u32 1, %s11530_s20  }
 0xd2f   : > { %s6644_s24 = scalar_lea.sflag [#allocation4], %s6643_s23 }
 0xd30   : > { %7941 = dma.done.wait (!%p7711_p2), %s6644_s24, 2048  }
 0xd31   : > { %7943 = vsyncadd (!%p7711_p2), %s6644_s24, 4294965248  ;;  %s11532_s30 = sld [smem:[#allocation8_spill]]  ;;  %s11533_s19 = sld [smem:[#allocation7_spill]] }
 0xd32   : > { %s11534_s29 = sld [smem:[#allocation9_spill]]  ;;  %s11535_s27 = smov %s7950_s28 }
 0xd37   : > { %p28_p3 = scmp.ge.s32.totalorder %s11532_s30, 4   ;;  %s11536_s28 = smov %s11533_s19 }
 0xd39   :  { %30 = sbr.rel (!%p28_p3) target bundleno = 7 (0x7), region = 134 }
 0xd40   :  { %6649 = vsyncpa [#allocation4], 1 }
 0xd41   :  { %6651 = vsyncpa [#allocation4 + $0x1], 1 }

</bundles_post_ra>
